<compile_context>
chip_gen: v5e
topology: v5e:2x2
jax: 0.10.0
libtpu: 0.0.40
codegen_flags: <defaults>
</compile_context>

<pallas_src>
import jax
import jax.numpy as jnp
from jax import lax
from jax.experimental import pallas as pl
from jax.experimental.pallas import tpu as pltpu

# ---- CNN_1d default hyper-parameters -------------------------------------------------
N_OUT = 1
FW1, FW2 = 10, 5                     # filter widths
NUM_CHUNKS = 5
POOL = 4
C_IN, C1, C2 = 4, 32, 32             # nchannels
N_HIDDEN = 32
RF = FW1 + (FW2 - 1) * POOL          # 26
CHUNK = POOL * POOL                  # 16
SEQ_LEN = NUM_CHUNKS * CHUNK + RF    # 106
R1 = (SEQ_LEN - FW1) // POOL         # 24  conv1+AvgPool time positions per sample
L2 = R1 - FW2 + 1                    # 20  conv2 valid output length
WIN = POOL + FW1                     # 14  input positions feeding one pooled conv1 row
KDIM = WIN * C_IN                    # 56  conv1 im2col K
NVAR = FW1                           # 10  flipped-conv variants
NBIG = POOL * NVAR * C1              # 1280 conv1 matmul N (pool-pos x variant x channel)


def _elu(x):
    # ELU(alpha=1); clamp the exp argument so the unselected branch never overflows.
    return jnp.where(x > 0, x, jnp.exp(jnp.minimum(x, 0.0)) - 1.0)


def _round_up(v, m):
    return ((v + m - 1) // m) * m


# ---- kernel ---------------------------------------------------------------------------
def cnn1d_kernel(x_ref, w1_ref, avg_ref, w2_ref, b2_ref, wd1_ref, bd1_ref,
                 wd2_ref, bd2_ref, out_ref):
    n = out_ref.shape[0]          # samples in this batch tile (multiple of 8, static)

    # Stage 1: FlippedConv1d + bias + exp + variant-average + AvgPool1d(4), fused as
    #          matmul -> exp -> matmul.  Rows = (time r, sample) for this tile.
    pre = jnp.dot(x_ref[...], w1_ref[...],
                  preferred_element_type=jnp.float32)                  # (24n, 1280)
    h1 = jnp.dot(jnp.exp(pre), avg_ref[...],
                 preferred_element_type=jnp.float32)                   # (24n, 32)

    # Stage 2: Conv1d(32,32,5,valid) as ONE im2col matmul.  Rows are time-major /
    #          sample-minor, so a per-sample time shift of j is a global row offset
    #          of j*n (all slice starts are static multiples of n, n % 8 == 0).
    im2 = jnp.concatenate([h1[j * n:(j + L2) * n, :] for j in range(FW2)], axis=1)
    s2 = jnp.dot(im2.astype(jnp.bfloat16), w2_ref[...],
                 preferred_element_type=jnp.float32) + b2_ref[...]     # (20n, 32)

    # Stage 3: MaxPool1d(4) over time + ELU, producing (n, 160) with lanes (chunk, ch).
    pooled = []
    for u in range(NUM_CHUNKS):
        base = POOL * u * n
        m01 = jnp.maximum(s2[base:base + n, :], s2[base + n:base + 2 * n, :])
        m23 = jnp.maximum(s2[base + 2 * n:base + 3 * n, :],
                          s2[base + 3 * n:base + 4 * n, :])
        pooled.append(jnp.maximum(m01, m23))
    z = _elu(jnp.concatenate(pooled, axis=1))                          # (n, 160)

    # Stage 4: Linear(160,32) -> Dropout(identity at inference) -> ELU -> Linear(32,1).
    # The channel-major .view() permutation is folded into wd1_ref in the wrapper.
    y1 = jnp.dot(z.astype(jnp.bfloat16), wd1_ref[...],
                 preferred_element_type=jnp.float32) + bd1_ref[...]    # (n, 32)
    y1 = _elu(y1)
    out_ref[...] = jnp.dot(y1, wd2_ref[...],
                           preferred_element_type=jnp.float32) + bd2_ref[...]


# ---- parameters -----------------------------------------------------------------------
def make_params(key):
    """Synthetic parameters with the exact shapes/inits of CNN_1d.__init__."""
    ks = jax.random.split(key, 7)
    s = 0.1
    return dict(
        w1=jax.random.normal(ks[0], (C1, C_IN, FW1), jnp.float32) * s,
        # FlippedConv1d bias parameter: -1 everywhere except the last variant (=0).
        b1=jnp.concatenate([jnp.full((C1, NVAR - 1), -1.0, jnp.float32),
                            jnp.zeros((C1, 1), jnp.float32)], axis=1),
        w2=jax.random.normal(ks[1], (C2, C1, FW2), jnp.float32) * s,
        b2=jax.random.normal(ks[2], (C2,), jnp.float32) * s,
        wd1=jax.random.normal(ks[3], (N_HIDDEN, C2 * NUM_CHUNKS), jnp.float32) * s,
        bd1=jax.random.normal(ks[4], (N_HIDDEN,), jnp.float32) * s,
        wd2=jax.random.normal(ks[5], (N_OUT, N_HIDDEN), jnp.float32) * s,
        bd2=jax.random.normal(ks[6], (N_OUT,), jnp.float32) * s,
    )


def _prepare_weights(params):
    """Fold FlippedConv1d variants, biases, pool averages and flatten permutation
    into MXU-shaped matrices (glue only; all hot-path compute stays in the kernel)."""
    w1, b1, w2 = params["w1"], params["b1"], params["w2"]

    # Conv1 big weight: W1[pos*4+cin, (p*10+i)*32+c] = w1[c,cin,j] where pos = p+pos_i(j),
    # pos_i(j) = j if j<=i else j+1 (zero column inserted at i+1).
    w1t = jnp.transpose(w1, (2, 1, 0))                                # (10, 4, 32) [j,cin,c]
    zcol = jnp.zeros((1, C_IN, C1), w1.dtype)
    wvar = jnp.stack([jnp.concatenate([w1t[:i + 1], zcol, w1t[i + 1:]], axis=0)
                      for i in range(NVAR)], axis=0)                  # (10, 11, 4, 32)
    wbig = jnp.stack([jnp.pad(wvar, ((0, 0), (p, POOL - 1 - p), (0, 0), (0, 0)))
                      for p in range(POOL)], axis=0)                  # (4, 10, 14, 4, 32)
    w1big = jnp.transpose(wbig, (2, 3, 0, 1, 4)).reshape(KDIM, NBIG).astype(jnp.bfloat16)

    # Post-exp averaging matrix: folds exp(bias), 1/NVAR variant avg and 1/POOL AvgPool.
    scale = jnp.exp(b1) / float(NVAR * POOL)                          # (32, 10) [c, i]
    avg = scale.T[None, :, :, None] * jnp.eye(C1, dtype=jnp.float32)[None, None, :, :]
    avg = jnp.broadcast_to(avg, (POOL, NVAR, C1, C1)).reshape(NBIG, C1)   # f32 (1280, 32)

    # Conv2 im2col weight: rows = (shift j, in-channel).
    w2stack = jnp.transpose(w2, (2, 1, 0)).reshape(FW2 * C1, C2).astype(jnp.bfloat16)
    b2row = params["b2"].reshape(1, C2).astype(jnp.float32)

    # Dense1 with the kernel's (chunk u, channel c') lane order; PyTorch .view flattens
    # channel-major (flat = c'*NUM_CHUNKS + u), so permute rows accordingly.
    wd1p = jnp.transpose(params["wd1"].reshape(N_HIDDEN, C2, NUM_CHUNKS),
                         (2, 1, 0)).reshape(NUM_CHUNKS * C2, N_HIDDEN).astype(jnp.bfloat16)
    bd1row = params["bd1"].reshape(1, N_HIDDEN).astype(jnp.float32)
    wd2t = params["wd2"].T.astype(jnp.float32)                        # (32, 1)
    bd2row = params["bd2"].reshape(1, N_OUT).astype(jnp.float32)
    return w1big, avg, w2stack, b2row, wd1p, bd1row, wd2t, bd2row


# ---- forward --------------------------------------------------------------------------
@jax.jit
def cnn_1d_forward(x_ncl, params):
    """x_ncl: (B, 4, 106) float32, PyTorch NCL layout.  Returns (B, 1) float32."""
    B = x_ncl.shape[0]
    TB = min(32, _round_up(B, 8))          # samples per tile: M = 24*TB rows per matmul
    G = pl.cdiv(B, TB)
    Bp = G * TB

    # im2col slab: row ((g, r, n)) -> x[b = g*TB+n, cin, 4r + pos], lanes = pos*4 + cin.
    xt = jnp.transpose(x_ncl.astype(jnp.float32), (0, 2, 1))          # (B, 106, 4)
    windows = jnp.stack([xt[:, POOL * r:POOL * r + WIN, :] for r in range(R1)],
                        axis=1)                                       # (B, 24, 14, 4)
    windows = jnp.pad(windows, ((0, Bp - B), (0, 0), (0, 0), (0, 0)))
    slab = (windows.reshape(Bp, R1, KDIM)
            .reshape(G, TB, R1, KDIM)
            .transpose(0, 2, 1, 3)                                    # (G, r, n, 56)
            .reshape(G * R1 * TB, KDIM)
            .astype(jnp.bfloat16))

    w1big, avg, w2stack, b2row, wd1p, bd1row, wd2t, bd2row = _prepare_weights(params)

    rows = R1 * TB
    out_p = pl.pallas_call(
        cnn1d_kernel,
        out_shape=jax.ShapeDtypeStruct((Bp, N_OUT), jnp.float32),
        grid=(G,),
        in_specs=[
            pl.BlockSpec((rows, KDIM), lambda g: (g, 0)),             # im2col slab (per tile)
            pl.BlockSpec((KDIM, NBIG), lambda g: (0, 0)),             # conv1 weight
            pl.BlockSpec((NBIG, C1), lambda g: (0, 0)),               # exp-average matrix
            pl.BlockSpec((FW2 * C1, C2), lambda g: (0, 0)),           # conv2 weight
            pl.BlockSpec((1, C2), lambda g: (0, 0)),                  # conv2 bias
            pl.BlockSpec((NUM_CHUNKS * C2, N_HIDDEN), lambda g: (0, 0)),  # dense1 weight
            pl.BlockSpec((1, N_HIDDEN), lambda g: (0, 0)),            # dense1 bias
            pl.BlockSpec((N_HIDDEN, N_OUT), lambda g: (0, 0)),        # dense2 weight
            pl.BlockSpec((1, N_OUT), lambda g: (0, 0)),               # dense2 bias
        ],
        out_specs=pl.BlockSpec((TB, N_OUT), lambda g: (g, 0)),
        compiler_params=pltpu.CompilerParams(
            dimension_semantics=("parallel",),
            vmem_limit_bytes=32 * 1024 * 1024),
    )(slab, w1big, avg, w2stack, b2row, wd1p, bd1row, wd2t, bd2row)
    return out_p[:B]


# ---- pure-JAX reference (for validation only) ------------------------------------------
def _conv1d_valid(x_ncl, w):
    K, L = w.shape[2], x_ncl.shape[2]
    return sum(jnp.einsum("bcl,oc->bol", x_ncl[:, :, j:L - K + 1 + j], w[:, :, j],
                          precision=lax.Precision.HIGHEST) for j in range(K))


def cnn_1d_reference(x_ncl, params):
    B = x_ncl.shape[0]
    w1, b1 = params["w1"], params["b1"]
    f = 0.0
    for i in range(NVAR):
        wi = jnp.concatenate([w1[:, :, :i + 1], jnp.zeros((C1, C_IN, 1), w1.dtype),
                              w1[:, :, i + 1:]], axis=2)              # width-11 variant i
        f = f + jnp.exp(_conv1d_valid(x_ncl, wi) + b1[:, i][None, :, None])
    f = f / NVAR                                                      # (B, 32, 96)
    g = f.reshape(B, C1, R1, POOL).mean(axis=3)                       # AvgPool1d(4)
    h = _conv1d_valid(g, params["w2"]) + params["b2"][None, :, None]  # (B, 32, 20)
    p = h.reshape(B, C2, NUM_CHUNKS, POOL).max(axis=3)                # MaxPool1d(4)
    p = jnp.where(p > 0, p, jnp.exp(jnp.minimum(p, 0.0)) - 1.0)       # ELU
    flat = p.reshape(B, C2 * NUM_CHUNKS)                              # channel-major flatten
    y = jnp.dot(flat, params["wd1"].T, precision=lax.Precision.HIGHEST) + params["bd1"]
    y = jnp.where(y > 0, y, jnp.exp(jnp.minimum(y, 0.0)) - 1.0)       # Dropout=id, ELU
    return jnp.dot(y, params["wd2"].T, precision=lax.Precision.HIGHEST) + params["bd2"]


if __name__ == "__main__":
    key = jax.random.PRNGKey(0)
    pkey, xkey = jax.random.split(key)
    params = make_params(pkey)
    x = jax.random.normal(xkey, (2, C_IN, SEQ_LEN), jnp.float32)      # seq_len = 106
    out = cnn_1d_forward(x, params)
    jax.block_until_ready(out)
    ref = cnn_1d_reference(x, params)
    assert out.shape == (2, N_OUT)
    assert bool(jnp.all(jnp.isfinite(out)))
    assert bool(jnp.max(jnp.abs(out - ref)) < 5e-2)  # bf16-matmul tolerance vs f32 reference
    print("KERNEL_OK")
</pallas_src>

<mosaic_0001>
module attributes {stable_mosaic.version = 11 : i64} {
  func.func @cnn1d_kernel(%arg0: i32, %arg1: memref<192x56xbf16, #tpu.memory_space<vmem>>, %arg2: memref<56x1280xbf16, #tpu.memory_space<vmem>>, %arg3: memref<1280x32xf32, #tpu.memory_space<vmem>>, %arg4: memref<160x32xbf16, #tpu.memory_space<vmem>>, %arg5: memref<1x32xf32, #tpu.memory_space<vmem>>, %arg6: memref<160x32xbf16, #tpu.memory_space<vmem>>, %arg7: memref<1x32xf32, #tpu.memory_space<vmem>>, %arg8: memref<32x1xf32, #tpu.memory_space<vmem>>, %arg9: memref<1x1xf32, #tpu.memory_space<vmem>>, %arg10: memref<8x1xf32, #tpu.memory_space<vmem>>) attributes {dimension_semantics = [#tpu.dimension_semantics<parallel>], iteration_bounds = array<i64: 1>, scalar_prefetch = 0 : i64, scratch_operands = 0 : i64, tpu.core_type = #tpu.core_type<tc>, window_params = [{transform_indices = @transform_0, window_bounds = array<i64: 192, 56>}, {pipeline_mode = #tpu.pipeline_mode<synchronous>, transform_indices = @transform_1, window_bounds = array<i64: 56, 1280>}, {pipeline_mode = #tpu.pipeline_mode<synchronous>, transform_indices = @transform_2, window_bounds = array<i64: 1280, 32>}, {pipeline_mode = #tpu.pipeline_mode<synchronous>, transform_indices = @transform_3, window_bounds = array<i64: 160, 32>}, {pipeline_mode = #tpu.pipeline_mode<synchronous>, transform_indices = @transform_4, window_bounds = array<i64: 1, 32>}, {pipeline_mode = #tpu.pipeline_mode<synchronous>, transform_indices = @transform_5, window_bounds = array<i64: 160, 32>}, {pipeline_mode = #tpu.pipeline_mode<synchronous>, transform_indices = @transform_6, window_bounds = array<i64: 1, 32>}, {pipeline_mode = #tpu.pipeline_mode<synchronous>, transform_indices = @transform_7, window_bounds = array<i64: 32, 1>}, {pipeline_mode = #tpu.pipeline_mode<synchronous>, transform_indices = @transform_8, window_bounds = array<i64: 1, 1>}, {transform_indices = @transform_9, window_bounds = array<i64: 8, 1>}]} {
    %c0 = arith.constant 0 : index
    %c0_0 = arith.constant 0 : index
    %0 = vector.load %arg1[%c0, %c0_0] : memref<192x56xbf16, #tpu.memory_space<vmem>>, vector<192x56xbf16>
    %c0_1 = arith.constant 0 : index
    %c0_2 = arith.constant 0 : index
    %1 = vector.load %arg2[%c0_1, %c0_2] : memref<56x1280xbf16, #tpu.memory_space<vmem>>, vector<56x1280xbf16>
    %cst = arith.constant dense<0.000000e+00> : vector<192x1280xf32>
    %2 = tpu.matmul %0, %1, %cst {dimension_numbers = #tpu.dot_dimension_numbers<[1], [0], [0], [1], [0, 0, 1, 1], [], []>} : vector<192x56xbf16>, vector<56x1280xbf16>, vector<192x1280xf32> -> vector<192x1280xf32>
    %3 = math.exp %2 : vector<192x1280xf32>
    %c0_3 = arith.constant 0 : index
    %c0_4 = arith.constant 0 : index
    %4 = vector.load %arg3[%c0_3, %c0_4] : memref<1280x32xf32, #tpu.memory_space<vmem>>, vector<1280x32xf32>
    %cst_5 = arith.constant dense<0.000000e+00> : vector<192x32xf32>
    %5 = tpu.matmul %3, %4, %cst_5 {dimension_numbers = #tpu.dot_dimension_numbers<[1], [0], [0], [1], [0, 0, 1, 1], [], []>} : vector<192x1280xf32>, vector<1280x32xf32>, vector<192x32xf32> -> vector<192x32xf32>
    %6 = vector.extract_strided_slice %5 {offsets = [0, 0], sizes = [160, 32], strides = [1, 1]} : vector<192x32xf32> to vector<160x32xf32>
    %7 = vector.extract_strided_slice %5 {offsets = [8, 0], sizes = [160, 32], strides = [1, 1]} : vector<192x32xf32> to vector<160x32xf32>
    %8 = vector.extract_strided_slice %5 {offsets = [16, 0], sizes = [160, 32], strides = [1, 1]} : vector<192x32xf32> to vector<160x32xf32>
    %9 = vector.extract_strided_slice %5 {offsets = [24, 0], sizes = [160, 32], strides = [1, 1]} : vector<192x32xf32> to vector<160x32xf32>
    %10 = vector.extract_strided_slice %5 {offsets = [32, 0], sizes = [160, 32], strides = [1, 1]} : vector<192x32xf32> to vector<160x32xf32>
    %11 = tpu.concatenate %6, %7, %8, %9, %10 in 1 : vector<160x32xf32>, vector<160x32xf32>, vector<160x32xf32>, vector<160x32xf32>, vector<160x32xf32> -> vector<160x160xf32>
    %12 = arith.truncf %11 : vector<160x160xf32> to vector<160x160xbf16>
    %c0_6 = arith.constant 0 : index
    %c0_7 = arith.constant 0 : index
    %13 = vector.load %arg4[%c0_6, %c0_7] : memref<160x32xbf16, #tpu.memory_space<vmem>>, vector<160x32xbf16>
    %cst_8 = arith.constant dense<0.000000e+00> : vector<160x32xf32>
    %14 = tpu.matmul %12, %13, %cst_8 {dimension_numbers = #tpu.dot_dimension_numbers<[1], [0], [0], [1], [0, 0, 1, 1], [], []>} : vector<160x160xbf16>, vector<160x32xbf16>, vector<160x32xf32> -> vector<160x32xf32>
    %c0_9 = arith.constant 0 : index
    %c0_10 = arith.constant 0 : index
    %15 = vector.load %arg5[%c0_9, %c0_10] : memref<1x32xf32, #tpu.memory_space<vmem>>, vector<1x32xf32>
    %16 = vector.broadcast %15 : vector<1x32xf32> to vector<160x32xf32>
    %17 = arith.addf %14, %16 : vector<160x32xf32>
    %18 = vector.extract_strided_slice %17 {offsets = [0, 0], sizes = [8, 32], strides = [1, 1]} : vector<160x32xf32> to vector<8x32xf32>
    %19 = vector.extract_strided_slice %17 {offsets = [8, 0], sizes = [8, 32], strides = [1, 1]} : vector<160x32xf32> to vector<8x32xf32>
    %20 = arith.maximumf %18, %19 : vector<8x32xf32>
    %21 = vector.extract_strided_slice %17 {offsets = [16, 0], sizes = [8, 32], strides = [1, 1]} : vector<160x32xf32> to vector<8x32xf32>
    %22 = vector.extract_strided_slice %17 {offsets = [24, 0], sizes = [8, 32], strides = [1, 1]} : vector<160x32xf32> to vector<8x32xf32>
    %23 = arith.maximumf %21, %22 : vector<8x32xf32>
    %24 = arith.maximumf %20, %23 : vector<8x32xf32>
    %25 = vector.extract_strided_slice %17 {offsets = [32, 0], sizes = [8, 32], strides = [1, 1]} : vector<160x32xf32> to vector<8x32xf32>
    %26 = vector.extract_strided_slice %17 {offsets = [40, 0], sizes = [8, 32], strides = [1, 1]} : vector<160x32xf32> to vector<8x32xf32>
    %27 = arith.maximumf %25, %26 : vector<8x32xf32>
    %28 = vector.extract_strided_slice %17 {offsets = [48, 0], sizes = [8, 32], strides = [1, 1]} : vector<160x32xf32> to vector<8x32xf32>
    %29 = vector.extract_strided_slice %17 {offsets = [56, 0], sizes = [8, 32], strides = [1, 1]} : vector<160x32xf32> to vector<8x32xf32>
    %30 = arith.maximumf %28, %29 : vector<8x32xf32>
    %31 = arith.maximumf %27, %30 : vector<8x32xf32>
    %32 = vector.extract_strided_slice %17 {offsets = [64, 0], sizes = [8, 32], strides = [1, 1]} : vector<160x32xf32> to vector<8x32xf32>
    %33 = vector.extract_strided_slice %17 {offsets = [72, 0], sizes = [8, 32], strides = [1, 1]} : vector<160x32xf32> to vector<8x32xf32>
    %34 = arith.maximumf %32, %33 : vector<8x32xf32>
    %35 = vector.extract_strided_slice %17 {offsets = [80, 0], sizes = [8, 32], strides = [1, 1]} : vector<160x32xf32> to vector<8x32xf32>
    %36 = vector.extract_strided_slice %17 {offsets = [88, 0], sizes = [8, 32], strides = [1, 1]} : vector<160x32xf32> to vector<8x32xf32>
    %37 = arith.maximumf %35, %36 : vector<8x32xf32>
    %38 = arith.maximumf %34, %37 : vector<8x32xf32>
    %39 = vector.extract_strided_slice %17 {offsets = [96, 0], sizes = [8, 32], strides = [1, 1]} : vector<160x32xf32> to vector<8x32xf32>
    %40 = vector.extract_strided_slice %17 {offsets = [104, 0], sizes = [8, 32], strides = [1, 1]} : vector<160x32xf32> to vector<8x32xf32>
    %41 = arith.maximumf %39, %40 : vector<8x32xf32>
    %42 = vector.extract_strided_slice %17 {offsets = [112, 0], sizes = [8, 32], strides = [1, 1]} : vector<160x32xf32> to vector<8x32xf32>
    %43 = vector.extract_strided_slice %17 {offsets = [120, 0], sizes = [8, 32], strides = [1, 1]} : vector<160x32xf32> to vector<8x32xf32>
    %44 = arith.maximumf %42, %43 : vector<8x32xf32>
    %45 = arith.maximumf %41, %44 : vector<8x32xf32>
    %46 = vector.extract_strided_slice %17 {offsets = [128, 0], sizes = [8, 32], strides = [1, 1]} : vector<160x32xf32> to vector<8x32xf32>
    %47 = vector.extract_strided_slice %17 {offsets = [136, 0], sizes = [8, 32], strides = [1, 1]} : vector<160x32xf32> to vector<8x32xf32>
    %48 = arith.maximumf %46, %47 : vector<8x32xf32>
    %49 = vector.extract_strided_slice %17 {offsets = [144, 0], sizes = [8, 32], strides = [1, 1]} : vector<160x32xf32> to vector<8x32xf32>
    %50 = vector.extract_strided_slice %17 {offsets = [152, 0], sizes = [8, 32], strides = [1, 1]} : vector<160x32xf32> to vector<8x32xf32>
    %51 = arith.maximumf %49, %50 : vector<8x32xf32>
    %52 = arith.maximumf %48, %51 : vector<8x32xf32>
    %53 = tpu.concatenate %24, %31, %38, %45, %52 in 1 : vector<8x32xf32>, vector<8x32xf32>, vector<8x32xf32>, vector<8x32xf32>, vector<8x32xf32> -> vector<8x160xf32>
    %cst_11 = arith.constant 0.000000e+00 : f32
    %54 = vector.broadcast %cst_11 : f32 to vector<8x160xf32>
    %55 = arith.cmpf ogt, %53, %54 : vector<8x160xf32>
    %cst_12 = arith.constant 0.000000e+00 : f32
    %56 = vector.broadcast %cst_12 : f32 to vector<8x160xf32>
    %57 = arith.minimumf %53, %56 : vector<8x160xf32>
    %58 = math.exp %57 : vector<8x160xf32>
    %cst_13 = arith.constant 1.000000e+00 : f32
    %59 = vector.broadcast %cst_13 : f32 to vector<8x160xf32>
    %60 = arith.subf %58, %59 : vector<8x160xf32>
    %61 = arith.select %55, %53, %60 : vector<8x160xi1>, vector<8x160xf32>
    %62 = arith.truncf %61 : vector<8x160xf32> to vector<8x160xbf16>
    %c0_14 = arith.constant 0 : index
    %c0_15 = arith.constant 0 : index
    %63 = vector.load %arg6[%c0_14, %c0_15] : memref<160x32xbf16, #tpu.memory_space<vmem>>, vector<160x32xbf16>
    %cst_16 = arith.constant dense<0.000000e+00> : vector<8x32xf32>
    %64 = tpu.matmul %62, %63, %cst_16 {dimension_numbers = #tpu.dot_dimension_numbers<[1], [0], [0], [1], [0, 0, 1, 1], [], []>} : vector<8x160xbf16>, vector<160x32xbf16>, vector<8x32xf32> -> vector<8x32xf32>
    %c0_17 = arith.constant 0 : index
    %c0_18 = arith.constant 0 : index
    %65 = vector.load %arg7[%c0_17, %c0_18] : memref<1x32xf32, #tpu.memory_space<vmem>>, vector<1x32xf32>
    %66 = vector.broadcast %65 : vector<1x32xf32> to vector<8x32xf32>
    %67 = arith.addf %64, %66 : vector<8x32xf32>
    %cst_19 = arith.constant 0.000000e+00 : f32
    %68 = vector.broadcast %cst_19 : f32 to vector<8x32xf32>
    %69 = arith.cmpf ogt, %67, %68 : vector<8x32xf32>
    %cst_20 = arith.constant 0.000000e+00 : f32
    %70 = vector.broadcast %cst_20 : f32 to vector<8x32xf32>
    %71 = arith.minimumf %67, %70 : vector<8x32xf32>
    %72 = math.exp %71 : vector<8x32xf32>
    %cst_21 = arith.constant 1.000000e+00 : f32
    %73 = vector.broadcast %cst_21 : f32 to vector<8x32xf32>
    %74 = arith.subf %72, %73 : vector<8x32xf32>
    %75 = arith.select %69, %67, %74 : vector<8x32xi1>, vector<8x32xf32>
    %c0_22 = arith.constant 0 : index
    %c0_23 = arith.constant 0 : index
    %76 = vector.load %arg8[%c0_22, %c0_23] : memref<32x1xf32, #tpu.memory_space<vmem>>, vector<32x1xf32>
    %cst_24 = arith.constant dense<0.000000e+00> : vector<8x1xf32>
    %77 = tpu.matmul %75, %76, %cst_24 {dimension_numbers = #tpu.dot_dimension_numbers<[1], [0], [0], [1], [0, 0, 1, 1], [], []>} : vector<8x32xf32>, vector<32x1xf32>, vector<8x1xf32> -> vector<8x1xf32>
    %c0_25 = arith.constant 0 : index
    %c0_26 = arith.constant 0 : index
    %78 = vector.load %arg9[%c0_25, %c0_26] : memref<1x1xf32, #tpu.memory_space<vmem>>, vector<1x1xf32>
    %79 = vector.broadcast %78 : vector<1x1xf32> to vector<8x1xf32>
    %80 = arith.addf %77, %79 : vector<8x1xf32>
    %c0_27 = arith.constant 0 : index
    %c0_28 = arith.constant 0 : index
    %81 = vector.load %arg10[%c0_27, %c0_28] : memref<8x1xf32, #tpu.memory_space<vmem>>, vector<8x1xf32>
    tpu.vector_store %arg10[%c0_27, %c0_28], %80 {strides = array<i32>} : memref<8x1xf32, #tpu.memory_space<vmem>>, vector<8x1xf32>,
    return
  }
  func.func @transform_0(%arg0: i32) -> (i32, i32) {
    %c0_i32 = arith.constant 0 : i32
    %c0_i32_0 = arith.constant 0 : i32
    return %arg0, %c0_i32 : i32, i32
  }
  func.func @transform_1(%arg0: i32) -> (i32, i32) {
    %c0_i32 = arith.constant 0 : i32
    %c0_i32_0 = arith.constant 0 : i32
    %c0_i32_1 = arith.constant 0 : i32
    return %c0_i32, %c0_i32_0 : i32, i32
  }
  func.func @transform_2(%arg0: i32) -> (i32, i32) {
    %c0_i32 = arith.constant 0 : i32
    %c0_i32_0 = arith.constant 0 : i32
    %c0_i32_1 = arith.constant 0 : i32
    return %c0_i32, %c0_i32_0 : i32, i32
  }
  func.func @transform_3(%arg0: i32) -> (i32, i32) {
    %c0_i32 = arith.constant 0 : i32
    %c0_i32_0 = arith.constant 0 : i32
    %c0_i32_1 = arith.constant 0 : i32
    return %c0_i32, %c0_i32_0 : i32, i32
  }
  func.func @transform_4(%arg0: i32) -> (i32, i32) {
    %c0_i32 = arith.constant 0 : i32
    %c0_i32_0 = arith.constant 0 : i32
    %c0_i32_1 = arith.constant 0 : i32
    return %c0_i32, %c0_i32_0 : i32, i32
  }
  func.func @transform_5(%arg0: i32) -> (i32, i32) {
    %c0_i32 = arith.constant 0 : i32
    %c0_i32_0 = arith.constant 0 : i32
    %c0_i32_1 = arith.constant 0 : i32
    return %c0_i32, %c0_i32_0 : i32, i32
  }
  func.func @transform_6(%arg0: i32) -> (i32, i32) {
    %c0_i32 = arith.constant 0 : i32
    %c0_i32_0 = arith.constant 0 : i32
    %c0_i32_1 = arith.constant 0 : i32
    return %c0_i32, %c0_i32_0 : i32, i32
  }
  func.func @transform_7(%arg0: i32) -> (i32, i32) {
    %c0_i32 = arith.constant 0 : i32
    %c0_i32_0 = arith.constant 0 : i32
    %c0_i32_1 = arith.constant 0 : i32
    return %c0_i32, %c0_i32_0 : i32, i32
  }
  func.func @transform_8(%arg0: i32) -> (i32, i32) {
    %c0_i32 = arith.constant 0 : i32
    %c0_i32_0 = arith.constant 0 : i32
    %c0_i32_1 = arith.constant 0 : i32
    return %c0_i32, %c0_i32_0 : i32, i32
  }
  func.func @transform_9(%arg0: i32) -> (i32, i32) {
    %c0_i32 = arith.constant 0 : i32
    %c0_i32_0 = arith.constant 0 : i32
    return %arg0, %c0_i32 : i32, i32
  }
}

</mosaic_0001>

<bundles_post_ra>
// kernel: cnn_1d_forward.1
= control target key start
LH: loop header
LB: loop body
LE: loop exit
PB: predicated region body
PF: predicated region fallthrough
CT: control target
= control target key end

     0   :  { %vm366_vm0 = vcmask 1043456   ;;  %vm329_vm1 = vcmask 457728   ;;  %s4433_s17 = smov 32   ;;  %s4434_s20 = smov 64   ;;  %vm2819_vm2 = vcmask 261120   ;;  %vm2840_vm3 = vcmask 523264   ;;  %s6867_s1 = inlined_call_operand.vmem [shape: bf16[56,1280], index: 1, kind: input, shape index: {}]   ;;  %s6868_s0 = inlined_call_operand.vmem [shape: bf16[192,56], index: 0, kind: input, shape index: {}]   ;;  %s6869_s2 = inlined_call_operand.vmem [shape: f32[1280,32], index: 2, kind: input, shape index: {}]   ;;  %s6870_s3 = inlined_call_operand.vmem [shape: bf16[160,32], index: 3, kind: input, shape index: {}]   ;;  %s6871_s4 = inlined_call_operand.vmem [shape: f32[1,32], index: 4, kind: input, shape index: {}]   ;;  %s6872_s5 = inlined_call_operand.vmem [shape: bf16[160,32], index: 5, kind: input, shape index: {}]   ;;  %s6873_s6 = inlined_call_operand.vmem [shape: f32[1,32], index: 6, kind: input, shape index: {}]   ;;  %s6874_s7 = inlined_call_operand.vmem [shape: f32[32,1], index: 7, kind: input, shape index: {}]   ;;  %s6875_s8 = inlined_call_operand.<no memory space> [shape: f32[1,1], index: 8, kind: input, shape index: {}]   ;;  %s6876_s9 = inlined_call_operand.vmem [shape: f32[8,1], index: 9, kind: output, shape index: {}]  }
   0x1   :  { %v89_v0 = vld [vmem:[%s6867_s1 + $0xf0] sm:$0xff]  ;;  %v3464_v5 = vld [vmem:[%s6867_s1 + $0xa0] sm:$0xf]  ;;  %v3754_v6 = vld [vmem:[%s6867_s1 + $0xc4] sm:$0xf0]  ;;  %s4435_s21 = smov 96  }
   0x2   :  { %v249_v1 = vunpack.c.l.b16 %v89_v0  ;;  %v250_v2 = vunpack.c.h.b16 %v89_v0  ;;  %v3749_v7 = vld [vmem:[%s6867_s1 + $0xa4] sm:$0xf]  ;;  %v3466_v8 = vld [vmem:[%s6867_s1 + $0xc8] sm:$0xf0]  ;;  %v3465_v11 = vor.u32 %v3754_v6, %v3464_v5  ;;  %v90_v12 = vld [vmem:[%s6867_s1 + $0xf8] sm:$0xff]  ;;  %vm2861_vm4 = vcmask 785408  }
   0x3   :  { %v3469_v13 = vor.u32 %v3749_v7, %v3466_v8  ;;  %v3424_v14 = vld [vmem:[%s6867_s1 + $0x50] sm:$0xf]  ;;  %v3744_v15 = vld [vmem:[%s6867_s1 + $0x74] sm:$0xf0]  ;;  %v3739_v16 = vld [vmem:[%s6867_s1 + $0x54] sm:$0xf]  ;;  %v251_v18 = vunpack.c.l.b16 %v90_v12  ;;  %v252_v19 = vunpack.c.h.b16 %v90_v12 }
   0x4   :  { %v289_v3 = vpack.c.b16 %v249_v1, %v249_v1  ;;  %v290_v4 = vpack.c.b16 %v250_v2, %v250_v2  ;;  %v3426_v17 = vld [vmem:[%s6867_s1 + $0x78] sm:$0xf0]  ;;  %v3425_v20 = vor.u32 %v3744_v15, %v3424_v14  ;;  %v3384_v22 = vld [vmem:[%s6867_s1] sm:$0xf]  ;;  %v3734_v23 = vld [vmem:[%s6867_s1 + $0x24] sm:$0xf0] }
   0x5   :  { %v3429_v21 = vor.u32 %v3739_v16, %v3426_v17  ;;  %v3729_v24 = vld [vmem:[%s6867_s1 + $0x4] sm:$0xf]  ;;  %v3386_v25 = vld [vmem:[%s6867_s1 + $0x28] sm:$0xf0]  ;;  %v291_v26 = vpack.c.b16 %v251_v18, %v251_v18  ;;  %v292_v27 = vpack.c.b16 %v252_v19, %v252_v19  ;;  %v3385_v28 = vor.u32 %v3734_v23, %v3384_v22  ;;  %v3472_v32 = vld [vmem:[%s6867_s1 + $0xa8] sm:$0xf] }
   0x6   :  { %v368_v9 = vsel %vm366_vm0, %v289_v3, 0  ;;  %v371_v10 = vsel %vm366_vm0, %v290_v4, 0  ;;  %v3389_v29 = vor.u32 %v3729_v24, %v3386_v25  ;;  %v4533_v30 = vld [vmem:[%s6868_s0] sm:$0xff]  ;;  %v3755_v33 = vld [vmem:[%s6867_s1 + $0xcc] sm:$0xf0]  ;;  %v4577_v46 = vld [vmem:[%s6868_s0 + $0x8] sm:$0xff] }
   0x7   :  { %401 = vmatpush.bf16.msra.mxu0 %v368_v9  ;;  %3779 = vmatpush.bf16.msra.mxu3 %v368_v9  ;;  %v4538_v31 = vld [vmem:[%s6868_s0 + $0x40] sm:$0xff]  ;;  %v374_v34 = vsel %vm366_vm0, %v291_v26, 0  ;;  %v377_v35 = vsel %vm366_vm0, %v292_v27, 0  ;;  %v3750_v36 = vld [vmem:[%s6867_s1 + $0xac] sm:$0xf]  ;;  %v3473_v38 = vor.u32 %v3755_v33, %v3472_v32  ;;  %v4607_v54 = vld [vmem:[%s6868_s0 + $0x10] sm:$0xff] }
   0x8   :  { %470 = vmatpush.bf16.msra.mxu1 %v371_v10  ;;  %3783 = vmatpush.bf16.msra.mxu2 %v371_v10  ;;  %v3474_v37 = vld [vmem:[%s6867_s1 + $0xd0] sm:$0xf0]  ;;  %v3432_v40 = vld [vmem:[%s6867_s1 + $0x58] sm:$0xf]  ;;  %v3745_v41 = vld [vmem:[%s6867_s1 + $0x7c] sm:$0xf0] }
   0x9   :  { %v3477_v39 = vor.u32 %v3750_v36, %v3474_v37  ;;  %v3740_v42 = vld [vmem:[%s6867_s1 + $0x5c] sm:$0xf]  ;;  %v3434_v43 = vld [vmem:[%s6867_s1 + $0x80] sm:$0xf0]  ;;  %v3433_v44 = vor.u32 %v3745_v41, %v3432_v40  ;;  %v4582_v47 = vld [vmem:[%s6868_s0 + $0x48] sm:$0xff]  ;;  %vm3328_vm8 = vcmask 7168  }
   0xa   :  { %v3437_v45 = vor.u32 %v3740_v42, %v3434_v43  ;;  %v3392_v48 = vld [vmem:[%s6867_s1 + $0x8] sm:$0xf]  ;;  %v3735_v49 = vld [vmem:[%s6867_s1 + $0x2c] sm:$0xf0]  ;;  %v3730_v50 = vld [vmem:[%s6867_s1 + $0xc] sm:$0xf] }
   0xb   :  { %402 = vmatpush.bf16.msra.mxu0 %v3465_v11  ;;  %3780 = vmatpush.bf16.msra.mxu3 %v3465_v11  ;;  %v3393_v51 = vor.u32 %v3735_v49, %v3392_v48  ;;  %v3394_v52 = vld [vmem:[%s6867_s1 + $0x30] sm:$0xf0]  ;;  %v92_v56 = vld [vmem:[%s6867_s1 + $0x108] sm:$0xff]  ;;  %v4630_v63 = vld [vmem:[%s6868_s0 + $0x18] sm:$0xff] }
   0xc   :  { %471 = vmatpush.bf16.msra.mxu1 %v3469_v13  ;;  %3784 = vmatpush.bf16.msra.mxu2 %v3469_v13  ;;  %v3397_v53 = vor.u32 %v3730_v50, %v3394_v52  ;;  %v4612_v55 = vld [vmem:[%s6868_s0 + $0x50] sm:$0xff]  ;;  %v255_v57 = vunpack.c.l.b16 %v92_v56  ;;  %v256_v58 = vunpack.c.h.b16 %v92_v56  ;;  %v4635_v0 = vld [vmem:[%s6868_s0 + $0x58] sm:$0xff]  ;;  %v4648_v1 = vld [vmem:[%s6868_s0 + $0x20] sm:$0xff] }
   0xd   :  { %v4661_v2 = vld [vmem:[%s6868_s0 + $0x28] sm:$0xff]  ;;  %v91_v3 = vld [vmem:[%s6867_s1 + $0x100] sm:$0xff]  ;;  %v3488_v8 = vld [vmem:[%s6867_s1 + $0xb8] sm:$0xf] }
   0xe   :  { %v295_v59 = vpack.c.b16 %v255_v57, %v255_v57  ;;  %v296_v60 = vpack.c.b16 %v256_v58, %v256_v58  ;;  %v253_v4 = vunpack.c.l.b16 %v91_v3  ;;  %v254_v5 = vunpack.c.h.b16 %v91_v3  ;;  %v3757_v9 = vld [vmem:[%s6867_s1 + $0xdc] sm:$0xf0]  ;;  %v3752_v13 = vld [vmem:[%s6867_s1 + $0xbc] sm:$0xf]  ;;  %v3490_v14 = vld [vmem:[%s6867_s1 + $0xe0] sm:$0xf0] }
   0xf   :  { %403 = vmatpush.bf16.msra.mxu0 %v3425_v20  ;;  %3781 = vmatpush.bf16.msra.mxu3 %v3425_v20  ;;  %v3489_v12 = vor.u32 %v3757_v9, %v3488_v8  ;;  %v3480_v15 = vld [vmem:[%s6867_s1 + $0xb0] sm:$0xf]  ;;  %v3493_v16 = vor.u32 %v3752_v13, %v3490_v14  ;;  %v3756_v17 = vld [vmem:[%s6867_s1 + $0xd4] sm:$0xf0]  ;;  %v3751_v18 = vld [vmem:[%s6867_s1 + $0xb4] sm:$0xf] }
  0x10   :  { %472 = vmatpush.bf16.msra.mxu1 %v3429_v21  ;;  %3785 = vmatpush.bf16.msra.mxu2 %v3429_v21  ;;  %v386_v61 = vsel %vm366_vm0, %v295_v59, 0  ;;  %v389_v62 = vsel %vm366_vm0, %v296_v60, 0  ;;  %v293_v6 = vpack.c.b16 %v253_v4, %v253_v4  ;;  %v294_v7 = vpack.c.b16 %v254_v5, %v254_v5  ;;  %v3482_v19 = vld [vmem:[%s6867_s1 + $0xd8] sm:$0xf0]  ;;  %v3440_v22 = vld [vmem:[%s6867_s1 + $0x60] sm:$0xf] }
  0x11   :  { %v3481_v20 = vor.u32 %v3756_v17, %v3480_v15  ;;  %v3485_v21 = vor.u32 %v3751_v18, %v3482_v19  ;;  %v3746_v23 = vld [vmem:[%s6867_s1 + $0x84] sm:$0xf0]  ;;  %v3741_v24 = vld [vmem:[%s6867_s1 + $0x64] sm:$0xf]  ;;  %v3442_v25 = vld [vmem:[%s6867_s1 + $0x88] sm:$0xf0] }
  0x12   :  { %v380_v10 = vsel %vm366_vm0, %v293_v6, 0  ;;  %v383_v11 = vsel %vm366_vm0, %v294_v7, 0  ;;  %v3441_v26 = vor.u32 %v3746_v23, %v3440_v22  ;;  %v3445_v27 = vor.u32 %v3741_v24, %v3442_v25  ;;  %v3731_v32 = vld [vmem:[%s6867_s1 + $0x14] sm:$0xf]  ;;  %v4740_v37 = vld [vmem:[%s6868_s0 + $0x38] sm:$0xff] }
  0x13   :  { %404 = vmatpush.bf16.msra.mxu0 %v3385_v28  ;;  %3782 = vmatpush.bf16.msra.mxu3 %v3385_v28  ;;  %v3400_v28 = vld [vmem:[%s6867_s1 + $0x10] sm:$0xf]  ;;  %v3448_v40 = vld [vmem:[%s6867_s1 + $0x68] sm:$0xf]  ;;  %v3742_v42 = vld [vmem:[%s6867_s1 + $0x6c] sm:$0xf] }
  0x14   :  { %473 = vmatpush.bf16.msra.mxu1 %v3389_v29  ;;  %3786 = vmatpush.bf16.msra.mxu2 %v3389_v29  ;;  %v3736_v29 = vld [vmem:[%s6867_s1 + $0x34] sm:$0xf0]  ;;  %v4724_v33 = vld [vmem:[%s6868_s0 + $0x30] sm:$0xff]  ;;  %v3737_v15 = vld [vmem:[%s6867_s1 + $0x3c] sm:$0xf0] }
  0x15   :  { %v3747_v41 = vld [vmem:[%s6867_s1 + $0x8c] sm:$0xf0]  ;;  %v3408_v14 = vld [vmem:[%s6867_s1 + $0x18] sm:$0xf]  ;;  %v3410_v18 = vld [vmem:[%s6867_s1 + $0x40] sm:$0xf0] }
  0x16   :  { %3502 = vmatmul.msk.bf16.vlgmr.msra.gmra.mxu0 %vm329_vm1, %v4533_v30  ;;  %3510 = vmatmul.msk.bf16.vlgmr.msra.gmra.mxu3 %vm329_vm1, %v4538_v31  ;;  %v3449_v43 = vor.u32 %v3747_v41, %v3448_v40  ;;  %v3409_v17 = vor.u32 %v3737_v15, %v3408_v14 }
  0x17   :  { %608 = vmatpush.bf16.msrb.mxu3 %v377_v35  ;;  %3514 = vmatmul.msk.bf16.vlgmr.msra.gmra.mxu1 %vm329_vm1, %v4533_v30  ;;  %v3402_v35 = vld [vmem:[%s6867_s1 + $0x38] sm:$0xf0] }
  0x18   :  { %539 = vmatpush.bf16.msrb.mxu2 %v374_v34  ;;  %677 = vmatpush.bf16.msrb.mxu0 %v380_v10  ;;  %v3401_v34 = vor.u32 %v3736_v29, %v3400_v28  ;;  %v3405_v36 = vor.u32 %v3731_v32, %v3402_v35 }
  0x19   :  { %3522 = vmatmul.msk.bf16.vlgmr.msra.gmra.mxu2 %vm329_vm1, %v4538_v31  ;;  %746 = vmatpush.bf16.msrb.mxu1 %v383_v11 }
  0x1b   :  { %609 = vmatpush.bf16.msrb.mxu3 %v3477_v39 }
  0x1c   :  { %540 = vmatpush.bf16.msrb.mxu2 %v3473_v38  ;;  %678 = vmatpush.bf16.msrb.mxu0 %v3481_v20 }
  0x1d   :  { %747 = vmatpush.bf16.msrb.mxu1 %v3485_v21 }
  0x1f   :  { %610 = vmatpush.bf16.msrb.mxu3 %v3437_v45 }
  0x20   :  { %541 = vmatpush.bf16.msrb.mxu2 %v3433_v44  ;;  %679 = vmatpush.bf16.msrb.mxu0 %v3441_v26  ;;  %v3450_v44 = vld [vmem:[%s6867_s1 + $0x90] sm:$0xf0] }
  0x21   :  { %748 = vmatpush.bf16.msrb.mxu1 %v3445_v27  ;;  %v3453_v48 = vor.u32 %v3742_v42, %v3450_v44 }
  0x23   :  { %611 = vmatpush.bf16.msrb.mxu3 %v3397_v53 }
  0x24   :  { %542 = vmatpush.bf16.msrb.mxu2 %v3393_v51  ;;  %680 = vmatpush.bf16.msrb.mxu0 %v3401_v34 }
  0x25   :  { %749 = vmatpush.bf16.msrb.mxu1 %v3405_v36 }
  0x26   :  { %3503 = vmatmul.msk.bf16.gmra.mxu0 %vm329_vm1, %v4577_v46  ;;  %3511 = vmatmul.msk.bf16.gmra.mxu3 %vm329_vm1, %v4582_v47 }
  0x27   :  { %3515 = vmatmul.msk.bf16.gmra.mxu1 %vm329_vm1, %v4577_v46  ;;  %884 = vmatpush.bf16.msra.mxu3 %v389_v62 }
  0x28   :  { %815 = vmatpush.bf16.msra.mxu2 %v386_v61 }
  0x29   :  { %3523 = vmatmul.msk.bf16.gmra.mxu2 %vm329_vm1, %v4582_v47 }
  0x2b   :  { %885 = vmatpush.bf16.msra.mxu3 %v3493_v16  ;;  %v3732_v16 = vld [vmem:[%s6867_s1 + $0x1c] sm:$0xf] }
  0x2c   :  { %816 = vmatpush.bf16.msra.mxu2 %v3489_v12  ;;  %v3413_v20 = vor.u32 %v3732_v16, %v3410_v18  ;;  %v1582_v18 = vld [vmem:[%s6869_s2 + $0x78] sm:$0xff] }
  0x2f   :  { %886 = vmatpush.bf16.msra.mxu3 %v3453_v48 }
  0x30   :  { %817 = vmatpush.bf16.msra.mxu2 %v3449_v43 }
  0x33   :  { %887 = vmatpush.bf16.msra.mxu3 %v3413_v20  ;;  %v93_v20 = vld [vmem:[%s6867_s1 + $0x110] sm:$0xff] }
  0x34   :  { %818 = vmatpush.bf16.msra.mxu2 %v3409_v17 }
  0x36   :  { %3504 = vmatmul.msk.bf16.gmra.mxu0 %vm329_vm1, %v4607_v54  ;;  %3512 = vmatmul.msk.bf16.gmra.mxu3 %vm329_vm1, %v4612_v55 }
  0x37   :  { %3516 = vmatmul.msk.bf16.gmra.mxu1 %vm329_vm1, %v4607_v54 }
  0x39   :  { %3524 = vmatmul.msk.bf16.gmra.mxu2 %vm329_vm1, %v4612_v55 }
  0x46   :  { %3505 = vmatmul.msk.bf16.gmra.mxu0 %vm329_vm1, %v4630_v63  ;;  %3513 = vmatmul.msk.bf16.gmra.mxu3 %vm329_vm1, %v4635_v0 }
  0x47   :  { %3517 = vmatmul.msk.bf16.gmra.mxu1 %vm329_vm1, %v4630_v63 }
  0x49   :  { %3525 = vmatmul.msk.bf16.gmra.mxu2 %vm329_vm1, %v4635_v0 }
  0x56   :  { %3506 = vmatmul.msk.bf16.gmra.mxu0 %vm329_vm1, %v4648_v1  ;;  %3538 = vmatmul.msk.bf16.vlgmr.msrb.gmra.mxu3 %vm329_vm1, %v4533_v30 }
  0x57   :  { %3518 = vmatmul.msk.bf16.gmra.mxu1 %vm329_vm1, %v4648_v1 }
  0x59   :  { %3526 = vmatmul.msk.bf16.vlgmr.msrb.gmra.mxu2 %vm329_vm1, %v4533_v30 }
  0x5a   :  { %1727 = vmatpush.msrb.mxu2 %v1582_v18 }
  0x66   :  { %3507 = vmatmul.msk.bf16.gmra.mxu0 %vm329_vm1, %v4661_v2  ;;  %3539 = vmatmul.msk.bf16.gmra.mxu3 %vm329_vm1, %v4577_v46 }
  0x67   :  { %3519 = vmatmul.msk.bf16.gmra.mxu1 %vm329_vm1, %v4661_v2 }
  0x69   :  { %3527 = vmatmul.msk.bf16.gmra.mxu2 %vm329_vm1, %v4577_v46 }
  0x76   :  { %3508 = vmatmul.msk.bf16.gmra.mxu0 %vm329_vm1, %v4724_v33  ;;  %3540 = vmatmul.msk.bf16.gmra.mxu3 %vm329_vm1, %v4607_v54 }
  0x77   :  { %3520 = vmatmul.msk.bf16.gmra.mxu1 %vm329_vm1, %v4724_v33 }
  0x79   :  { %3528 = vmatmul.msk.bf16.gmra.mxu2 %vm329_vm1, %v4607_v54 }
  0x86   :  { %3509 = vmatmul.msk.bf16.gmra.mxu0 %vm329_vm1, %v4740_v37  ;;  %3541 = vmatmul.msk.bf16.gmra.mxu3 %vm329_vm1, %v4630_v63 }
  0x87   :  { %3521 = vmatmul.msk.bf16.gmra.mxu1 %vm329_vm1, %v4740_v37 }
  0x89   :  { %3529 = vmatmul.msk.bf16.gmra.mxu2 %vm329_vm1, %v4630_v63 }
  0x93   :  { %v4750_v38 = vpop.f32.mrf.mxu0 }
  0x94   :  { %v4752_v39 = vpop.f32.mrf.mxu1 }
  0x96   :  { %3542 = vmatmul.msk.bf16.gmra.mxu3 %vm329_vm1, %v4648_v1  ;;  %3550 = vmatmul.msk.bf16.vlgmr.msrb.gmra.mxu0 %vm329_vm1, %v4533_v30 }
  0x97   :  { %3562 = vmatmul.msk.bf16.vlgmr.msrb.gmra.mxu1 %vm329_vm1, %v4533_v30 }
  0x99   :  { %3530 = vmatmul.msk.bf16.gmra.mxu2 %vm329_vm1, %v4648_v1  ;;  %v4774_v45 = vpop.f32.mrf.mxu3 }
  0x9a   :  { %6877 = vst [vmem:[#allocation3_spill] sm:$0xff] %v4774_v45 }
  0x9b   :  { %v4778_v50 = vpop.f32.mrf.mxu0 }
  0x9c   :  { %v4776_v49 = vpop.f32.mrf.mxu2  ;;  %v4780_v51 = vpop.f32.mrf.mxu1 }
  0x9d   :  { %6878 = vst [vmem:[#allocation4_spill] sm:$0xff] %v4776_v49 }
  0xa1   :  { %v4782_v52 = vpop.f32.mrf.mxu3 }
  0xa2   :  { %6879 = vst [vmem:[#allocation5_spill] sm:$0xff] %v4782_v52  ;;  %v1596_v52 = vld [vmem:[%s6869_s2 + $0xe8] sm:$0xff] }
  0xa3   :  { %v4786_v56 = vpop.f32.mrf.mxu0 }
  0xa4   :  { %v4784_v53 = vpop.f32.mrf.mxu2  ;;  %v4788_v57 = vpop.f32.mrf.mxu1 }
  0xa5   :  { %6880 = vst [vmem:[#allocation6_spill] sm:$0xff] %v4784_v53 }
  0xa6   :  { %3543 = vmatmul.msk.bf16.gmra.mxu3 %vm329_vm1, %v4661_v2  ;;  %3551 = vmatmul.msk.bf16.gmra.mxu0 %vm329_vm1, %v4577_v46 }
  0xa7   :  { %3563 = vmatmul.msk.bf16.gmra.mxu1 %vm329_vm1, %v4577_v46 }
  0xa9   :  { %3531 = vmatmul.msk.bf16.gmra.mxu2 %vm329_vm1, %v4661_v2  ;;  %v4798_v58 = vpop.f32.mrf.mxu3 }
  0xaa   :  { %6881 = vst [vmem:[#allocation7_spill] sm:$0xff] %v4798_v58 }
  0xab   :  { %v4802_v60 = vpop.f32.mrf.mxu0 }
  0xac   :  { %v4800_v59 = vpop.f32.mrf.mxu2  ;;  %v4804_v61 = vpop.f32.mrf.mxu1 }
  0xad   :  { %6882 = vst [vmem:[#allocation8_spill] sm:$0xff] %v4800_v59 }
  0xb1   :  { %v4806_v62 = vpop.f32.mrf.mxu3 }
  0xb2   :  { %6883 = vst [vmem:[#allocation9_spill] sm:$0xff] %v4806_v62 }
  0xb3   :  { %v4810_v4 = vpop.f32.mrf.mxu0 }
  0xb4   :  { %v4808_v3 = vpop.f32.mrf.mxu2  ;;  %v4812_v5 = vpop.f32.mrf.mxu1 }
  0xb5   :  { %6884 = vst [vmem:[#allocation10_spill] sm:$0xff] %v4808_v3  ;;  %v258_v3 = vunpack.c.h.b16 %v93_v20 }
  0xb6   :  { %3544 = vmatmul.msk.bf16.gmra.mxu3 %vm329_vm1, %v4724_v33  ;;  %3552 = vmatmul.msk.bf16.gmra.mxu0 %vm329_vm1, %v4607_v54 }
  0xb7   :  { %3564 = vmatmul.msk.bf16.gmra.mxu1 %vm329_vm1, %v4607_v54  ;;  %v298_v62 = vpack.c.b16 %v258_v3, %v258_v3 }
  0xb9   :  { %3532 = vmatmul.msk.bf16.gmra.mxu2 %vm329_vm1, %v4724_v33  ;;  %v4822_v6 = vpop.f32.mrf.mxu3  ;;  %v395_v18 = vsel %vm366_vm0, %v298_v62, 0  ;;  %v1597_v62 = vld [vmem:[%s6869_s2 + $0xf0] sm:$0xff] }
  0xba   :  { %6885 = vst [vmem:[#allocation11_spill] sm:$0xff] %v4822_v6  ;;  %1022 = vmatpush.bf16.msra.mxu1 %v395_v18  ;;  %v1580_v18 = vld [vmem:[%s6869_s2 + $0x68] sm:$0xff] }
  0xbb   :  { %v4826_v8 = vpop.f32.mrf.mxu0 }
  0xbc   :  { %v4824_v7 = vpop.f32.mrf.mxu2  ;;  %v4828_v9 = vpop.f32.mrf.mxu1 }
  0xbd   :  { %6886 = vst [vmem:[#allocation12_spill] sm:$0xff] %v4824_v7 }
  0xc1   :  { %v4830_v10 = vpop.f32.mrf.mxu3 }
  0xc2   :  { %6887 = vst [vmem:[#allocation13_spill] sm:$0xff] %v4830_v10 }
  0xc3   :  { %v4834_v12 = vpop.f32.mrf.mxu0 }
  0xc4   :  { %v4832_v11 = vpop.f32.mrf.mxu2  ;;  %v4836_v13 = vpop.f32.mrf.mxu1 }
  0xc5   :  { %6888 = vst [vmem:[#allocation14_spill] sm:$0xff] %v4832_v11 }
  0xc6   :  { %3545 = vmatmul.msk.bf16.gmra.mxu3 %vm329_vm1, %v4740_v37  ;;  %3553 = vmatmul.msk.bf16.gmra.mxu0 %vm329_vm1, %v4630_v63 }
  0xc7   :  { %3565 = vmatmul.msk.bf16.gmra.mxu1 %vm329_vm1, %v4630_v63 }
  0xc9   :  { %3533 = vmatmul.msk.bf16.gmra.mxu2 %vm329_vm1, %v4740_v37  ;;  %v4858_v19 = vpop.f32.mrf.mxu3 }
  0xca   :  { %6889 = vst [vmem:[#allocation15_spill] sm:$0xff] %v4858_v19 }
  0xcb   :  { %v4862_v22 = vpop.f32.mrf.mxu0 }
  0xcc   :  { %v4860_v21 = vpop.f32.mrf.mxu2  ;;  %v4864_v23 = vpop.f32.mrf.mxu1 }
  0xcd   :  { %6890 = vst [vmem:[#allocation16_spill] sm:$0xff] %v4860_v21 }
  0xd1   :  { %v4866_v24 = vpop.f32.mrf.mxu3 }
  0xd2   :  { %6891 = vst [vmem:[#allocation17_spill] sm:$0xff] %v4866_v24  ;;  %v257_v24 = vunpack.c.l.b16 %v93_v20 }
  0xd3   :  { %v4870_v26 = vpop.f32.mrf.mxu0 }
  0xd4   :  { %v4868_v25 = vpop.f32.mrf.mxu2  ;;  %v4872_v27 = vpop.f32.mrf.mxu1  ;;  %v297_v11 = vpack.c.b16 %v257_v24, %v257_v24  ;;  %v1581_v24 = vld [vmem:[%s6869_s2 + $0x70] sm:$0xff] }
  0xd5   :  { %6892 = vst [vmem:[#allocation18_spill] sm:$0xff] %v4868_v25  ;;  %v1598_v25 = vld [vmem:[%s6869_s2 + $0xf8] sm:$0xff]  ;;  %1728 = vmatpush.msrb.mxu2 %v1581_v24 }
  0xd6   :  { %3546 = vmatmul.msk.bf16.gmra.mxu3 %vm329_vm1, %v4538_v31  ;;  %3554 = vmatmul.msk.bf16.gmra.mxu0 %vm329_vm1, %v4648_v1  ;;  %v392_v6 = vsel %vm366_vm0, %v297_v11, 0 }
  0xd7   :  { %3566 = vmatmul.msk.bf16.gmra.mxu1 %vm329_vm1, %v4648_v1  ;;  %1816 = vmatpush.msrb.mxu3 %v1598_v25 }
  0xd8   :  { %953 = vmatpush.bf16.msra.mxu0 %v392_v6  ;;  %1729 = vmatpush.msrb.mxu2 %v1580_v18 }
  0xd9   :  { %3534 = vmatmul.msk.bf16.gmra.mxu2 %vm329_vm1, %v4538_v31  ;;  %v4882_v28 = vpop.f32.mrf.mxu3  ;;  %1817 = vmatpush.msrb.mxu3 %v1597_v62 }
  0xdb   :  { %v4886_v32 = vpop.f32.mrf.mxu0  ;;  %1818 = vmatpush.msrb.mxu3 %v1596_v52 }
  0xdc   :  { %v4884_v29 = vpop.f32.mrf.mxu2  ;;  %v4888_v34 = vpop.f32.mrf.mxu1 }
  0xe1   :  { %v4890_v35 = vpop.f32.mrf.mxu3 }
  0xe3   :  { %v4894_v40 = vpop.f32.mrf.mxu0 }
  0xe4   :  { %v4892_v36 = vpop.f32.mrf.mxu2  ;;  %v4896_v41 = vpop.f32.mrf.mxu1 }
  0xe6   :  { %3547 = vmatmul.msk.bf16.gmra.mxu3 %vm329_vm1, %v4582_v47  ;;  %3555 = vmatmul.msk.bf16.gmra.mxu0 %vm329_vm1, %v4661_v2 }
  0xe7   :  { %3567 = vmatmul.msk.bf16.gmra.mxu1 %vm329_vm1, %v4661_v2 }
  0xe9   :  { %3535 = vmatmul.msk.bf16.gmra.mxu2 %vm329_vm1, %v4582_v47  ;;  %v4906_v42 = vpop.f32.mrf.mxu3 }
  0xeb   :  { %v4910_v44 = vpop.f32.mrf.mxu0 }
  0xec   :  { %v4908_v43 = vpop.f32.mrf.mxu2  ;;  %v4912_v48 = vpop.f32.mrf.mxu1 }
  0xf1   :  { %v4914_v14 = vpop.f32.mrf.mxu3 }
  0xf3   :  { %v4918_v16 = vpop.f32.mrf.mxu0 }
  0xf4   :  { %v4916_v15 = vpop.f32.mrf.mxu2  ;;  %v4920_v17 = vpop.f32.mrf.mxu1 }
  0xf6   :  { %3548 = vmatmul.msk.bf16.gmra.mxu3 %vm329_vm1, %v4612_v55  ;;  %3556 = vmatmul.msk.bf16.gmra.mxu0 %vm329_vm1, %v4724_v33 }
  0xf7   :  { %3568 = vmatmul.msk.bf16.gmra.mxu1 %vm329_vm1, %v4724_v33 }
  0xf9   :  { %3536 = vmatmul.msk.bf16.gmra.mxu2 %vm329_vm1, %v4612_v55  ;;  %v4939_v21 = vpop.f32.mrf.mxu3 }
  0xfb   :  { %v4943_v10 = vpop.f32.mrf.mxu0 }
  0xfc   :  { %v4941_v19 = vpop.f32.mrf.mxu2  ;;  %v4945_v7 = vpop.f32.mrf.mxu1 }
 0x101   :  { %v4948_v59 = vpop.f32.mrf.mxu3 }
 0x103   :  { %v4953_v25 = vpop.f32.mrf.mxu0 }
 0x104   :  { %v4951_v58 = vpop.f32.mrf.mxu2  ;;  %v4955_v53 = vpop.f32.mrf.mxu1 }
 0x106   :  { %3549 = vmatmul.msk.bf16.gmra.mxu3 %vm329_vm1, %v4635_v0  ;;  %3557 = vmatmul.msk.bf16.gmra.mxu0 %vm329_vm1, %v4740_v37 }
 0x107   :  { %3569 = vmatmul.msk.bf16.gmra.mxu1 %vm329_vm1, %v4740_v37 }
 0x109   :  { %3537 = vmatmul.msk.bf16.gmra.mxu2 %vm329_vm1, %v4635_v0  ;;  %v4971_v3 = vpop.f32.mrf.mxu3 }
 0x10a   :  { %6893 = vst [vmem:[#allocation19_spill] sm:$0xff] %v4971_v3 }
 0x10b   :  { %v4975_v11 = vpop.f32.mrf.mxu0 }
 0x10c   :  { %v4973_v6 = vpop.f32.mrf.mxu2  ;;  %6895 = vst [vmem:[#allocation21_spill] sm:$0xff] %v4975_v11  ;;  %v4977_v20 = vpop.f32.mrf.mxu1 }
 0x10d   :  { %6894 = vst [vmem:[#allocation20_spill] sm:$0xff] %v4973_v6 }
 0x10e   :  { %6896 = vst [vmem:[#allocation22_spill] sm:$0xff] %v4977_v20 }
 0x111   :  { %v4985_v24 = vpop.f32.mrf.mxu3 }
 0x112   :  { %6897 = vst [vmem:[#allocation23_spill] sm:$0xff] %v4985_v24 }
 0x113   :  { %v4989_v49 = vpop.f32.mrf.mxu0 }
 0x114   :  { %v4987_v62 = vpop.f32.mrf.mxu2  ;;  %6899 = vst [vmem:[#allocation25_spill] sm:$0xff] %v4989_v49  ;;  %v4991_v45 = vpop.f32.mrf.mxu1 }
 0x115   :  { %6898 = vst [vmem:[#allocation24_spill] sm:$0xff] %v4987_v62  ;;  %v1595_v62 = vld [vmem:[%s6869_s2 + $0xe0] sm:$0xff] }
 0x116   :  { %6900 = vst [vmem:[#allocation26_spill] sm:$0xff] %v4991_v45  ;;  %3558 = vmatmul.msk.bf16.gmra.mxu0 %vm329_vm1, %v4538_v31  ;;  %3586 = vmatmul.msk.bf16.vlgmr.msra.gmra.mxu3 %vm329_vm1, %v4533_v30  ;;  %v1579_v45 = vld [vmem:[%s6869_s2 + $0x60] sm:$0xff] }
 0x117   :  { %3570 = vmatmul.msk.bf16.gmra.mxu1 %vm329_vm1, %v4538_v31  ;;  %1730 = vmatpush.msrb.mxu2 %v1579_v45  ;;  %v1578_v45 = vld [vmem:[%s6869_s2 + $0x58] sm:$0xff] }
 0x118   :  { %1819 = vmatpush.msrb.mxu3 %v1595_v62  ;;  %v3496_v62 = vld [vmem:[%s6867_s1 + $0xc0] sm:$0xf] }
 0x119   :  { %3574 = vmatmul.msk.bf16.vlgmr.msra.gmra.mxu2 %vm329_vm1, %v4533_v30  ;;  %v5001_v52 = vpop.f32.mrf.mxu3 }
 0x11a   :  { %6901 = vst [vmem:[#allocation27_spill] sm:$0xff] %v5001_v52  ;;  %1731 = vmatpush.msrb.mxu2 %v1578_v45 }
 0x11b   :  { %v5005_v24 = vpop.f32.mrf.mxu0 }
 0x11c   :  { %v5003_v18 = vpop.f32.mrf.mxu2  ;;  %6903 = vst [vmem:[#allocation29_spill] sm:$0xff] %v5005_v24  ;;  %v5007_v49 = vpop.f32.mrf.mxu1 }
 0x11d   :  { %6902 = vst [vmem:[#allocation28_spill] sm:$0xff] %v5003_v18 }
 0x11e   :  { %6904 = vst [vmem:[#allocation30_spill] sm:$0xff] %v5007_v49  ;;  %v1594_v49 = vld [vmem:[%s6869_s2 + $0xd8] sm:$0xff] }
 0x11f   :  { %1820 = vmatpush.msrb.mxu3 %v1594_v49  ;;  %v3456_v49 = vld [vmem:[%s6867_s1 + $0x70] sm:$0xf] }
 0x121   :  { %v5015_v20 = vpop.f32.mrf.mxu3 }
 0x122   :  { %6905 = vst [vmem:[#allocation31_spill] sm:$0xff] %v5015_v20  ;;  %v3753_v20 = vld [vmem:[%s6867_s1 + $0xc4] sm:$0xf] }
 0x123   :  { %v5019_v52 = vpop.f32.mrf.mxu0 }
 0x124   :  { %v5017_v11 = vpop.f32.mrf.mxu2  ;;  %6907 = vst [vmem:[#allocation33_spill] sm:$0xff] %v5019_v52  ;;  %v5021_v18 = vpop.f32.mrf.mxu1 }
 0x125   :  { %6906 = vst [vmem:[#allocation32_spill] sm:$0xff] %v5017_v11  ;;  %v3498_v11 = vld [vmem:[%s6867_s1 + $0xe8] sm:$0xf0] }
 0x126   :  { %6908 = vst [vmem:[#allocation34_spill] sm:$0xff] %v5021_v18  ;;  %3559 = vmatmul.msk.bf16.gmra.mxu0 %vm329_vm1, %v4582_v47  ;;  %3587 = vmatmul.msk.bf16.gmra.mxu3 %vm329_vm1, %v4577_v46  ;;  %v3758_v18 = vld [vmem:[%s6867_s1 + $0xe4] sm:$0xf0]  ;;  %v3501_v45 = vor.u32 %v3753_v20, %v3498_v11  ;;  %v3458_v11 = vld [vmem:[%s6867_s1 + $0x98] sm:$0xf0] }
 0x127   :  { %3571 = vmatmul.msk.bf16.gmra.mxu1 %vm329_vm1, %v4582_v47  ;;  %v3497_v52 = vor.u32 %v3758_v18, %v3496_v62 }
 0x128   :  { %1023 = vmatpush.bf16.msra.mxu1 %v3501_v45  ;;  %v3416_v45 = vld [vmem:[%s6867_s1 + $0x20] sm:$0xf] }
 0x129   :  { %3575 = vmatmul.msk.bf16.gmra.mxu2 %vm329_vm1, %v4577_v46  ;;  %v5043_v24 = vpop.f32.mrf.mxu3  ;;  %954 = vmatpush.bf16.msra.mxu0 %v3497_v52 }
 0x12a   :  { %6909 = vst [vmem:[#allocation35_spill] sm:$0xff] %v5043_v24  ;;  %v3748_v24 = vld [vmem:[%s6867_s1 + $0x94] sm:$0xf0] }
 0x12b   :  { %v5053_v18 = vpop.f32.mrf.mxu0  ;;  %v3457_v6 = vor.u32 %v3748_v24, %v3456_v49  ;;  %v3738_v24 = vld [vmem:[%s6867_s1 + $0x44] sm:$0xf0]  ;;  %v3733_v49 = vld [vmem:[%s6867_s1 + $0x24] sm:$0xf] }
 0x12c   :  { %v5051_v3 = vpop.f32.mrf.mxu2  ;;  %6911 = vst [vmem:[#allocation37_spill] sm:$0xff] %v5053_v18  ;;  %v5055_v62 = vpop.f32.mrf.mxu1  ;;  %v3417_v18 = vor.u32 %v3738_v24, %v3416_v45 }
 0x12d   :  { %6910 = vst [vmem:[#allocation36_spill] sm:$0xff] %v5051_v3  ;;  %v3743_v3 = vld [vmem:[%s6867_s1 + $0x74] sm:$0xf]  ;;  %955 = vmatpush.bf16.msra.mxu0 %v3457_v6 }
 0x12e   :  { %6912 = vst [vmem:[#allocation38_spill] sm:$0xff] %v5055_v62  ;;  %v3461_v20 = vor.u32 %v3743_v3, %v3458_v11  ;;  %v3418_v3 = vld [vmem:[%s6867_s1 + $0x48] sm:$0xf0] }
 0x12f   :  { %v3421_v11 = vor.u32 %v3733_v49, %v3418_v3 }
 0x130   :  { %1024 = vmatpush.bf16.msra.mxu1 %v3461_v20 }
 0x131   :  { %v5069_v52 = vpop.f32.mrf.mxu3  ;;  %956 = vmatpush.bf16.msra.mxu0 %v3417_v18  ;;  %v1593_v18 = vld [vmem:[%s6869_s2 + $0xd0] sm:$0xff] }
 0x132   :  { %6913 = vst [vmem:[#allocation39_spill] sm:$0xff] %v5069_v52  ;;  %v1577_v52 = vld [vmem:[%s6869_s2 + $0x50] sm:$0xff]  ;;  %1821 = vmatpush.msrb.mxu3 %v1593_v18 }
 0x133   :  { %v5085_v6 = vpop.f32.mrf.mxu0  ;;  %1732 = vmatpush.msrb.mxu2 %v1577_v52 }
 0x134   :  { %v5080_v62 = vpop.f32.mrf.mxu2  ;;  %6914 = vst [vmem:[#allocation40_spill] sm:$0xff] %v5085_v6  ;;  %v5087_v20 = vpop.f32.mrf.mxu1  ;;  %1025 = vmatpush.bf16.msra.mxu1 %v3421_v11  ;;  %v1576_v11 = vld [vmem:[%s6869_s2 + $0x48] sm:$0xff] }
 0x135   :  { %6915 = vst [vmem:[#allocation41_spill] sm:$0xff] %v5087_v20  ;;  %v1592_v20 = vld [vmem:[%s6869_s2 + $0xc8] sm:$0xff]  ;;  %1733 = vmatpush.msrb.mxu2 %v1576_v11 }
 0x136   :  { %3560 = vmatmul.msk.bf16.gmra.mxu0 %vm329_vm1, %v4612_v55  ;;  %3588 = vmatmul.msk.bf16.gmra.mxu3 %vm329_vm1, %v4607_v54 }
 0x137   :  { %3572 = vmatmul.msk.bf16.gmra.mxu1 %vm329_vm1, %v4612_v55  ;;  %1822 = vmatpush.msrb.mxu3 %v1592_v20 }
 0x139   :  { %3576 = vmatmul.msk.bf16.gmra.mxu2 %vm329_vm1, %v4607_v54  ;;  %v5103_v45 = vpop.f32.mrf.mxu3 }
 0x13a   :  { %6916 = vst [vmem:[#allocation42_spill] sm:$0xff] %v5103_v45 }
 0x13b   :  { %v5107_v49 = vpop.f32.mrf.mxu0 }
 0x13c   :  { %v5105_v24 = vpop.f32.mrf.mxu2  ;;  %6918 = vst [vmem:[#allocation44_spill] sm:$0xff] %v5107_v49  ;;  %v5109_v3 = vpop.f32.mrf.mxu1  ;;  %v1591_v49 = vld [vmem:[%s6869_s2 + $0xc0] sm:$0xff] }
 0x13d   :  { %6917 = vst [vmem:[#allocation43_spill] sm:$0xff] %v5105_v24  ;;  %1823 = vmatpush.msrb.mxu3 %v1591_v49  ;;  %v1590_v49 = vld [vmem:[%s6869_s2 + $0xb8] sm:$0xff] }
 0x13e   :  { %6919 = vst [vmem:[#allocation45_spill] sm:$0xff] %v5109_v3 }
 0x13f   :  { %1824 = vmatpush.msrb.mxu3 %v1590_v49  ;;  %v1589_v49 = vld [vmem:[%s6869_s2 + $0xb0] sm:$0xff] }
 0x141   :  { %v5117_v52 = vpop.f32.mrf.mxu3  ;;  %1825 = vmatpush.msrb.mxu3 %v1589_v49 }
 0x142   :  { %6920 = vst [vmem:[#allocation46_spill] sm:$0xff] %v5117_v52 }
 0x143   :  { %v5121_v6 = vpop.f32.mrf.mxu0 }
 0x144   :  { %v5119_v18 = vpop.f32.mrf.mxu2  ;;  %6922 = vst [vmem:[#allocation48_spill] sm:$0xff] %v5121_v6  ;;  %v5123_v45 = vpop.f32.mrf.mxu1 }
 0x145   :  { %6921 = vst [vmem:[#allocation47_spill] sm:$0xff] %v5119_v18 }
 0x146   :  { %6923 = vst [vmem:[#allocation49_spill] sm:$0xff] %v5123_v45  ;;  %3561 = vmatmul.msk.bf16.gmra.mxu0 %vm329_vm1, %v4635_v0  ;;  %3589 = vmatmul.msk.bf16.gmra.mxu3 %vm329_vm1, %v4630_v63  ;;  %v1575_v45 = vld [vmem:[%s6869_s2 + $0x40] sm:$0xff] }
 0x147   :  { %3573 = vmatmul.msk.bf16.gmra.mxu1 %vm329_vm1, %v4635_v0  ;;  %1734 = vmatpush.msrb.mxu2 %v1575_v45  ;;  %v1574_v45 = vld [vmem:[%s6869_s2 + $0x38] sm:$0xff] }
 0x149   :  { %3577 = vmatmul.msk.bf16.gmra.mxu2 %vm329_vm1, %v4630_v63  ;;  %v5133_v20 = vpop.f32.mrf.mxu3 }
 0x14a   :  { %6924 = vst [vmem:[#allocation50_spill] sm:$0xff] %v5133_v20  ;;  %1735 = vmatpush.msrb.mxu2 %v1574_v45  ;;  %v1573_v45 = vld [vmem:[%s6869_s2 + $0x30] sm:$0xff] }
 0x14b   :  { %v5137_v3 = vpop.f32.mrf.mxu0 }
 0x14c   :  { %v5135_v11 = vpop.f32.mrf.mxu2  ;;  %6926 = vst [vmem:[#allocation52_spill] sm:$0xff] %v5137_v3  ;;  %v5139_v6 = vpop.f32.mrf.mxu1  ;;  %1736 = vmatpush.msrb.mxu2 %v1573_v45 }
 0x14d   :  { %6925 = vst [vmem:[#allocation51_spill] sm:$0xff] %v5135_v11 }
 0x14e   :  { %6927 = vst [vmem:[#allocation53_spill] sm:$0xff] %v5139_v6 }
 0x151   :  { %v5147_v52 = vpop.f32.mrf.mxu3 }
 0x152   :  { %6928 = vst [vmem:[#allocation54_spill] sm:$0xff] %v5147_v52 }
 0x153   :  { %v5151_v20 = vpop.f32.mrf.mxu0 }
 0x154   :  { %v5149_v18 = vpop.f32.mrf.mxu2  ;;  %6930 = vst [vmem:[#allocation56_spill] sm:$0xff] %v5151_v20  ;;  %v5153_v11 = vpop.f32.mrf.mxu1 }
 0x155   :  { %6929 = vst [vmem:[#allocation55_spill] sm:$0xff] %v5149_v18 }
 0x156   :  { %6931 = vst [vmem:[#allocation57_spill] sm:$0xff] %v5153_v11  ;;  %3590 = vmatmul.msk.bf16.gmra.mxu3 %vm329_vm1, %v4648_v1  ;;  %3598 = vmatmul.msk.bf16.vlgmr.msra.gmra.mxu0 %vm329_vm1, %v4533_v30 }
 0x157   :  { %3610 = vmatmul.msk.bf16.vlgmr.msra.gmra.mxu1 %vm329_vm1, %v4533_v30 }
 0x159   :  { %3578 = vmatmul.msk.bf16.gmra.mxu2 %vm329_vm1, %v4648_v1  ;;  %v5169_v11 = vpop.f32.mrf.mxu3 }
 0x15b   :  { %v5173_v6 = vpop.f32.mrf.mxu0 }
 0x15c   :  { %v5171_v20 = vpop.f32.mrf.mxu2  ;;  %6932 = vst [vmem:[#allocation58_spill] sm:$0xff] %v5173_v6  ;;  %v5175_v3 = vpop.f32.mrf.mxu1 }
 0x15d   :  { %6933 = vst [vmem:[#allocation59_spill] sm:$0xff] %v5175_v3 }
 0x161   :  { %v5177_v52 = vpop.f32.mrf.mxu3 }
 0x162   :  { %6934 = vst [vmem:[#allocation60_spill] sm:$0xff] %v5177_v52  ;;  %v1572_v52 = vld [vmem:[%s6869_s2 + $0x28] sm:$0xff] }
 0x163   :  { %v5181_v18 = vpop.f32.mrf.mxu0  ;;  %1737 = vmatpush.msrb.mxu2 %v1572_v52 }
 0x164   :  { %v5179_v30 = vpop.f32.mrf.mxu2  ;;  %6935 = vst [vmem:[#allocation61_spill] sm:$0xff] %v5181_v18  ;;  %v5183_v24 = vpop.f32.mrf.mxu1 }
 0x165   :  { %6936 = vst [vmem:[#allocation62_spill] sm:$0xff] %v5183_v24 }
 0x166   :  { %3591 = vmatmul.msk.bf16.gmra.mxu3 %vm329_vm1, %v4661_v2  ;;  %3599 = vmatmul.msk.bf16.gmra.mxu0 %vm329_vm1, %v4577_v46 }
 0x167   :  { %3611 = vmatmul.msk.bf16.gmra.mxu1 %vm329_vm1, %v4577_v46  ;;  %v1588_v46 = vld [vmem:[%s6869_s2 + $0xa8] sm:$0xff] }
 0x168   :  { %1826 = vmatpush.msrb.mxu3 %v1588_v46 }
 0x169   :  { %3579 = vmatmul.msk.bf16.gmra.mxu2 %vm329_vm1, %v4661_v2  ;;  %v5199_v24 = vpop.f32.mrf.mxu3 }
 0x16a   :  { %6937 = vst [vmem:[#allocation63_spill] sm:$0xff] %v5199_v24 }
 0x16b   :  { %v5203_v3 = vpop.f32.mrf.mxu0 }
 0x16c   :  { %v5201_v18 = vpop.f32.mrf.mxu2  ;;  %6939 = vst [vmem:[#allocation65_spill] sm:$0xff] %v5203_v3  ;;  %v5205_v6 = vpop.f32.mrf.mxu1  ;;  %v1587_v3 = vld [vmem:[%s6869_s2 + $0xa0] sm:$0xff] }
 0x16d   :  { %6938 = vst [vmem:[#allocation64_spill] sm:$0xff] %v5201_v18  ;;  %1827 = vmatpush.msrb.mxu3 %v1587_v3  ;;  %v1570_v3 = vld [vmem:[%s6869_s2 + $0x18] sm:$0xff] }
 0x16e   :  { %6940 = vst [vmem:[#allocation66_spill] sm:$0xff] %v5205_v6 }
 0x171   :  { %v5213_v45 = vpop.f32.mrf.mxu3 }
 0x172   :  { %6941 = vst [vmem:[#allocation67_spill] sm:$0xff] %v5213_v45 }
 0x173   :  { %v5217_v24 = vpop.f32.mrf.mxu0 }
 0x174   :  { %v5215_v49 = vpop.f32.mrf.mxu2  ;;  %6943 = vst [vmem:[#allocation69_spill] sm:$0xff] %v5217_v24  ;;  %v5219_v18 = vpop.f32.mrf.mxu1 }
 0x175   :  { %6942 = vst [vmem:[#allocation68_spill] sm:$0xff] %v5215_v49 }
 0x176   :  { %6944 = vst [vmem:[#allocation70_spill] sm:$0xff] %v5219_v18  ;;  %3592 = vmatmul.msk.bf16.gmra.mxu3 %vm329_vm1, %v4724_v33  ;;  %3600 = vmatmul.msk.bf16.gmra.mxu0 %vm329_vm1, %v4607_v54  ;;  %v1571_v18 = vld [vmem:[%s6869_s2 + $0x20] sm:$0xff] }
 0x177   :  { %3612 = vmatmul.msk.bf16.gmra.mxu1 %vm329_vm1, %v4607_v54  ;;  %1738 = vmatpush.msrb.mxu2 %v1571_v18  ;;  %v1586_v18 = vld [vmem:[%s6869_s2 + $0x98] sm:$0xff] }
 0x178   :  { %1828 = vmatpush.msrb.mxu3 %v1586_v18  ;;  %v1585_v18 = vld [vmem:[%s6869_s2 + $0x90] sm:$0xff] }
 0x179   :  { %3580 = vmatmul.msk.bf16.gmra.mxu2 %vm329_vm1, %v4724_v33  ;;  %v5229_v52 = vpop.f32.mrf.mxu3 }
 0x17a   :  { %6945 = vst [vmem:[#allocation71_spill] sm:$0xff] %v5229_v52  ;;  %1739 = vmatpush.msrb.mxu2 %v1570_v3  ;;  %v1569_v3 = vld [vmem:[%s6869_s2 + $0x10] sm:$0xff]  ;;  %1829 = vmatpush.msrb.mxu3 %v1585_v18 }
 0x17b   :  { %v5233_v6 = vpop.f32.mrf.mxu0 }
 0x17c   :  { %v5231_v46 = vpop.f32.mrf.mxu2  ;;  %6947 = vst [vmem:[#allocation73_spill] sm:$0xff] %v5233_v6  ;;  %v5235_v24 = vpop.f32.mrf.mxu1  ;;  %1740 = vmatpush.msrb.mxu2 %v1569_v3 }
 0x17d   :  { %6946 = vst [vmem:[#allocation72_spill] sm:$0xff] %v5231_v46 }
 0x17e   :  { %6948 = vst [vmem:[#allocation74_spill] sm:$0xff] %v5235_v24 }
 0x181   :  { %v5243_v45 = vpop.f32.mrf.mxu3 }
 0x182   :  { %6949 = vst [vmem:[#allocation75_spill] sm:$0xff] %v5243_v45 }
 0x183   :  { %v5247_v52 = vpop.f32.mrf.mxu0 }
 0x184   :  { %v5245_v54 = vpop.f32.mrf.mxu2  ;;  %6951 = vst [vmem:[#allocation77_spill] sm:$0xff] %v5247_v52  ;;  %v5249_v46 = vpop.f32.mrf.mxu1 }
 0x185   :  { %6950 = vst [vmem:[#allocation76_spill] sm:$0xff] %v5245_v54 }
 0x186   :  { %6952 = vst [vmem:[#allocation78_spill] sm:$0xff] %v5249_v46  ;;  %3593 = vmatmul.msk.bf16.gmra.mxu3 %vm329_vm1, %v4740_v37  ;;  %3601 = vmatmul.msk.bf16.gmra.mxu0 %vm329_vm1, %v4630_v63 }
 0x187   :  { %3613 = vmatmul.msk.bf16.gmra.mxu1 %vm329_vm1, %v4630_v63 }
 0x189   :  { %3581 = vmatmul.msk.bf16.gmra.mxu2 %vm329_vm1, %v4740_v37  ;;  %v5265_v46 = vpop.f32.mrf.mxu3 }
 0x18b   :  { %v5269_v24 = vpop.f32.mrf.mxu0 }
 0x18c   :  { %v5267_v52 = vpop.f32.mrf.mxu2  ;;  %6953 = vst [vmem:[#allocation79_spill] sm:$0xff] %v5269_v24  ;;  %v5271_v6 = vpop.f32.mrf.mxu1 }
 0x18d   :  { %6954 = vst [vmem:[#allocation80_spill] sm:$0xff] %v5271_v6 }
 0x191   :  { %v5273_v45 = vpop.f32.mrf.mxu3 }
 0x193   :  { %v5277_v54 = vpop.f32.mrf.mxu0 }
 0x194   :  { %v5275_v63 = vpop.f32.mrf.mxu2  ;;  %6955 = vst [vmem:[#allocation81_spill] sm:$0xff] %v5277_v54  ;;  %v5279_v49 = vpop.f32.mrf.mxu1 }
 0x195   :  { %6956 = vst [vmem:[#allocation82_spill] sm:$0xff] %v5279_v49 }
 0x196   :  { %3594 = vmatmul.msk.bf16.gmra.mxu3 %vm329_vm1, %v4538_v31  ;;  %3602 = vmatmul.msk.bf16.gmra.mxu0 %vm329_vm1, %v4648_v1 }
 0x197   :  { %3614 = vmatmul.msk.bf16.gmra.mxu1 %vm329_vm1, %v4648_v1  ;;  %v1584_v1 = vld [vmem:[%s6869_s2 + $0x88] sm:$0xff] }
 0x198   :  { %1830 = vmatpush.msrb.mxu3 %v1584_v1 }
 0x199   :  { %3582 = vmatmul.msk.bf16.gmra.mxu2 %vm329_vm1, %v4538_v31  ;;  %v5295_v49 = vpop.f32.mrf.mxu3  ;;  %v1568_v31 = vld [vmem:[%s6869_s2 + $0x8] sm:$0xff] }
 0x19a   :  { %6957 = vst [vmem:[#allocation83_spill] sm:$0xff] %v5295_v49  ;;  %1741 = vmatpush.msrb.mxu2 %v1568_v31 }
 0x19b   :  { %v5299_v6 = vpop.f32.mrf.mxu0 }
 0x19c   :  { %v5297_v54 = vpop.f32.mrf.mxu2  ;;  %6959 = vst [vmem:[#allocation85_spill] sm:$0xff] %v5299_v6  ;;  %v5301_v24 = vpop.f32.mrf.mxu1 }
 0x19d   :  { %6958 = vst [vmem:[#allocation84_spill] sm:$0xff] %v5297_v54 }
 0x19e   :  { %6960 = vst [vmem:[#allocation86_spill] sm:$0xff] %v5301_v24 }
 0x1a1   :  { %v5309_v3 = vpop.f32.mrf.mxu3 }
 0x1a3   :  { %v5313_v49 = vpop.f32.mrf.mxu0 }
 0x1a4   :  { %v5311_v18 = vpop.f32.mrf.mxu2  ;;  %6961 = vst [vmem:[#allocation87_spill] sm:$0xff] %v5313_v49  ;;  %v5315_v54 = vpop.f32.mrf.mxu1 }
 0x1a5   :  { %6962 = vst [vmem:[#allocation88_spill] sm:$0xff] %v5315_v54  ;;  %v1567_v54 = vld [vmem:[%s6869_s2] sm:$0xff] }
 0x1a6   :  { %3595 = vmatmul.msk.bf16.gmra.mxu3 %vm329_vm1, %v4582_v47  ;;  %3603 = vmatmul.msk.bf16.gmra.mxu0 %vm329_vm1, %v4661_v2 }
 0x1a7   :  { %3615 = vmatmul.msk.bf16.gmra.mxu1 %vm329_vm1, %v4661_v2  ;;  %1742 = vmatpush.msrb.mxu2 %v1567_v54  ;;  %v1646_v54 = vld [vmem:[%s6869_s2 + $0x278] sm:$0xff] }
 0x1a9   :  { %3583 = vmatmul.msk.bf16.gmra.mxu2 %vm329_vm1, %v4582_v47  ;;  %v5325_v31 = vpop.f32.mrf.mxu3  ;;  %v1583_v47 = vld [vmem:[%s6869_s2 + $0x80] sm:$0xff] }
 0x1aa   :  { %6963 = vst [vmem:[#allocation89_spill] sm:$0xff] %v5325_v31  ;;  %1831 = vmatpush.msrb.mxu3 %v1583_v47  ;;  %v1614_v47 = vld [vmem:[%s6869_s2 + $0x178] sm:$0xff]  ;;  %2083 = vmatpush.msra.mxu2 %v1646_v54 }
 0x1ab   :  { %v5329_v24 = vpop.f32.mrf.mxu0  ;;  %1905 = vmatpush.msrb.mxu0 %v1614_v47 }
 0x1ac   :  { %v5327_v1 = vpop.f32.mrf.mxu2  ;;  %6965 = vst [vmem:[#allocation91_spill] sm:$0xff] %v5329_v24  ;;  %v5331_v49 = vpop.f32.mrf.mxu1  ;;  %v1630_v24 = vld [vmem:[%s6869_s2 + $0x1f8] sm:$0xff] }
 0x1ad   :  { %6964 = vst [vmem:[#allocation90_spill] sm:$0xff] %v5327_v1  ;;  %1994 = vmatpush.msrb.mxu1 %v1630_v24  ;;  %v1613_v24 = vld [vmem:[%s6869_s2 + $0x170] sm:$0xff] }
 0x1ae   :  { %6966 = vst [vmem:[#allocation92_spill] sm:$0xff] %v5331_v49  ;;  %1906 = vmatpush.msrb.mxu0 %v1613_v24  ;;  %v1109_v24 = vmul.f32 1.442695, %v4780_v51 }
 0x1b1   :  { %v5339_v6 = vpop.f32.mrf.mxu3 }
 0x1b2   :  { %6967 = vst [vmem:[#allocation93_spill] sm:$0xff] %v5339_v6 }
 0x1b3   :  { %v5343_v31 = vpop.f32.mrf.mxu0 }
 0x1b4   :  { %v5341_v2 = vpop.f32.mrf.mxu2  ;;  %6969 = vst [vmem:[#allocation95_spill] sm:$0xff] %v5343_v31  ;;  %v5345_v1 = vpop.f32.mrf.mxu1 }
 0x1b5   :  { %6968 = vst [vmem:[#allocation94_spill] sm:$0xff] %v5341_v2 }
 0x1b6   :  { %6970 = vst [vmem:[#allocation96_spill] sm:$0xff] %v5345_v1  ;;  %3596 = vmatmul.msk.bf16.gmra.mxu3 %vm329_vm1, %v4612_v55  ;;  %3604 = vmatmul.msk.bf16.gmra.mxu0 %vm329_vm1, %v4724_v33  ;;  %v1662_v1 = vld [vmem:[%s6869_s2 + $0x2f8] sm:$0xff] }
 0x1b7   :  { %3616 = vmatmul.msk.bf16.gmra.mxu1 %vm329_vm1, %v4724_v33  ;;  %2172 = vmatpush.msra.mxu3 %v1662_v1  ;;  %v1645_v1 = vld [vmem:[%s6869_s2 + $0x270] sm:$0xff] }
 0x1b8   :  { %2084 = vmatpush.msra.mxu2 %v1645_v1  ;;  %v1644_v1 = vld [vmem:[%s6869_s2 + $0x268] sm:$0xff] }
 0x1b9   :  { %3584 = vmatmul.msk.bf16.gmra.mxu2 %vm329_vm1, %v4612_v55  ;;  %v5364_v31 = vpop.f32.mrf.mxu3 }
 0x1ba   :  { %2085 = vmatpush.msra.mxu2 %v1644_v1 }
 0x1bb   :  { %v5368_v33 = vpop.f32.mrf.mxu0 }
 0x1bc   :  { %v5366_v55 = vpop.f32.mrf.mxu2  ;;  %6971 = vst [vmem:[#allocation97_spill] sm:$0xff] %v5368_v33  ;;  %v5370_v49 = vpop.f32.mrf.mxu1 }
 0x1bd   :  { %6972 = vst [vmem:[#allocation98_spill] sm:$0xff] %v5370_v49 }
 0x1c1   :  { %v5375_v6 = vpop.f32.mrf.mxu3 }
 0x1c2   :  { %6973 = vst [vmem:[#allocation99_spill] sm:$0xff] %v5375_v6  ;;  %v1087_v6 = vmul.f32 1.442695, %v4750_v38 }
 0x1c3   :  { %v5379_v54 = vpop.f32.mrf.mxu0 }
 0x1c4   :  { %v5377_v2 = vpop.f32.mrf.mxu2  ;;  %6975 = vst [vmem:[#allocation101_spill] sm:$0xff] %v5379_v54  ;;  %v5381_v47 = vpop.f32.mrf.mxu1  ;;  %v1629_v54 = vld [vmem:[%s6869_s2 + $0x1f0] sm:$0xff] }
 0x1c5   :  { %6974 = vst [vmem:[#allocation100_spill] sm:$0xff] %v5377_v2  ;;  %1995 = vmatpush.msrb.mxu1 %v1629_v54  ;;  %v1660_v54 = vld [vmem:[%s6869_s2 + $0x2e8] sm:$0xff] }
 0x1c6   :  { %6976 = vst [vmem:[#allocation102_spill] sm:$0xff] %v5381_v47  ;;  %3597 = vmatmul.msk.bf16.gmra.mxu3 %vm329_vm1, %v4635_v0  ;;  %3605 = vmatmul.msk.bf16.gmra.mxu0 %vm329_vm1, %v4740_v37  ;;  %v1661_v47 = vld [vmem:[%s6869_s2 + $0x2f0] sm:$0xff] }
 0x1c7   :  { %3617 = vmatmul.msk.bf16.gmra.mxu1 %vm329_vm1, %v4740_v37  ;;  %2173 = vmatpush.msra.mxu3 %v1661_v47  ;;  %v1089_v37 = vmul.f32 1.442695, %v4752_v39  ;;  %v1612_v47 = vld [vmem:[%s6869_s2 + $0x168] sm:$0xff] }
 0x1c8   :  { %1907 = vmatpush.msrb.mxu0 %v1612_v47  ;;  %v4429_v47 = vld [vmem:[%s6868_s0 + $0x40] sm:$0xff] }
 0x1c9   :  { %3585 = vmatmul.msk.bf16.gmra.mxu2 %vm329_vm1, %v4635_v0  ;;  %v5403_v49 = vpop.f32.mrf.mxu3  ;;  %3943 = vpow2.f32 %v1089_v37  ;;  %2174 = vmatpush.msra.mxu3 %v1660_v54  ;;  %v1129_v54 = vmul.f32 1.442695, %v4788_v57 }
 0x1ca   :  { %6977 = vst [vmem:[#allocation103_spill] sm:$0xff] %v5403_v49  ;;  %3945 = vpow2.f32 %v1087_v6  ;;  %v1628_v6 = vld [vmem:[%s6869_s2 + $0x1e8] sm:$0xff] }
 0x1cb   :  { %v5408_v33 = vpop.f32.mrf.mxu0  ;;  %3947 = vpow2.f32 %v1109_v24  ;;  %1996 = vmatpush.msrb.mxu1 %v1628_v6  ;;  %v1627_v24 = vld [vmem:[%s6869_s2 + $0x1e0] sm:$0xff]  ;;  %v1610_v6 = vld [vmem:[%s6869_s2 + $0x158] sm:$0xff] }
 0x1cc   :  { %v5405_v0 = vpop.f32.mrf.mxu2  ;;  %6978 = vst [vmem:[#allocation104_spill] sm:$0xff] %v5408_v33  ;;  %v5411_v2 = vpop.f32.mrf.mxu1 }
 0x1cd   :  { %6979 = vst [vmem:[#allocation105_spill] sm:$0xff] %v5411_v2  ;;  %v1107_v2 = vmul.f32 1.442695, %v4778_v50  ;;  %1997 = vmatpush.msrb.mxu1 %v1627_v24  ;;  %v1147_v24 = vmul.f32 1.442695, %v4802_v60  ;;  %v1623_v60 = vld [vmem:[%s6869_s2 + $0x1c0] sm:$0xff] }
 0x1cf   :  { %v3944_v49 = vpop.eup %3943  ;;  %3949 = vpow2.f32 %v1107_v2  ;;  %v1611_v2 = vld [vmem:[%s6869_s2 + $0x160] sm:$0xff] }
 0x1d0   :  { %v3946_v1 = vpop.eup %3945  ;;  %3951 = vpow2.f32 %v1129_v54  ;;  %1908 = vmatpush.msrb.mxu0 %v1611_v2  ;;  %v1625_v54 = vld [vmem:[%s6869_s2 + $0x1d0] sm:$0xff]  ;;  %v1149_v2 = vmul.f32 1.442695, %v4804_v61  ;;  %v1607_v61 = vld [vmem:[%s6869_s2 + $0x140] sm:$0xff] }
 0x1d1   :  { %v5422_v39 = vpop.f32.mrf.mxu3 }
 0x1d2   :  { %6980 = vst [vmem:[#allocation106_spill] sm:$0xff] %v5422_v39  ;;  %1909 = vmatpush.msrb.mxu0 %v1610_v6 }
 0x1d3   :  { %v5427_v37 = vpop.f32.mrf.mxu0 }
 0x1d4   :  { %v5424_v38 = vpop.f32.mrf.mxu2  ;;  %6982 = vst [vmem:[#allocation108_spill] sm:$0xff] %v5427_v37  ;;  %v5430_v33 = vpop.f32.mrf.mxu1  ;;  %v1127_v37 = vmul.f32 1.442695, %v4786_v56  ;;  %v1659_v56 = vld [vmem:[%s6869_s2 + $0x2e0] sm:$0xff] }
 0x1d5   :  { %6981 = vst [vmem:[#allocation107_spill] sm:$0xff] %v5424_v38  ;;  %v3948_v38 = vpop.eup %3947  ;;  %2175 = vmatpush.msra.mxu3 %v1659_v56 }
 0x1d6   :  { %6983 = vst [vmem:[#allocation109_spill] sm:$0xff] %v5430_v33  ;;  %3606 = vmatmul.msk.bf16.gmra.mxu0 %vm329_vm1, %v4429_v47  ;;  %1832 = vmatmul.f32.vlgmr.msrb.gmra.mxu3 %v3944_v49  ;;  %v1643_v49 = vld [vmem:[%s6869_s2 + $0x260] sm:$0xff]  ;;  %v3950_v57 = vpop.eup %3949  ;;  %3953 = vpow2.f32 %v1127_v37  ;;  %v1608_v37 = vld [vmem:[%s6869_s2 + $0x148] sm:$0xff] }
 0x1d7   :  { %3618 = vmatmul.msk.bf16.gmra.mxu1 %vm329_vm1, %v4429_v47  ;;  %2086 = vmatpush.msra.mxu2 %v1643_v49  ;;  %v1609_v47 = vld [vmem:[%s6869_s2 + $0x150] sm:$0xff]  ;;  %v3952_v6 = vpop.eup %3951  ;;  %3955 = vpow2.f32 %v1149_v2  ;;  %v1658_v2 = vld [vmem:[%s6869_s2 + $0x2d8] sm:$0xff] }
 0x1d8   :  { %1910 = vmatpush.msrb.mxu0 %v1609_v47  ;;  %3957 = vpow2.f32 %v1147_v24  ;;  %2176 = vmatpush.msra.mxu3 %v1658_v2  ;;  %v1169_v24 = vmul.f32 1.442695, %v4812_v5  ;;  %v1604_v2 = vld [vmem:[%s6869_s2 + $0x128] sm:$0xff] }
 0x1d9   :  { %1743 = vmatmul.f32.vlgmr.msrb.gmra.mxu2 %v3946_v1  ;;  %v5440_v50 = vpop.f32.mrf.mxu3  ;;  %v1626_v1 = vld [vmem:[%s6869_s2 + $0x1d8] sm:$0xff]  ;;  %v1620_v5 = vld [vmem:[%s6869_s2 + $0x1a8] sm:$0xff] }
 0x1da   :  { %1998 = vmatpush.msrb.mxu1 %v1626_v1  ;;  %1911 = vmatpush.msrb.mxu0 %v1608_v37  ;;  %v1624_v1 = vld [vmem:[%s6869_s2 + $0x1c8] sm:$0xff]  ;;  %v1606_v37 = vld [vmem:[%s6869_s2 + $0x138] sm:$0xff]  ;;  %3959 = vpow2.f32 %v1169_v24 }
 0x1db   :  { %v5445_v33 = vpop.f32.mrf.mxu0 }
 0x1dc   :  { %v5442_v51 = vpop.f32.mrf.mxu2  ;;  %6984 = vst [vmem:[#allocation110_spill] sm:$0xff] %v5445_v33  ;;  %v5448_v39 = vpop.f32.mrf.mxu1  ;;  %1999 = vmatpush.msrb.mxu1 %v1625_v54  ;;  %v1642_v54 = vld [vmem:[%s6869_s2 + $0x258] sm:$0xff]  ;;  %1912 = vmatpush.msrb.mxu0 %v1607_v61  ;;  %v1621_v61 = vld [vmem:[%s6869_s2 + $0x1b0] sm:$0xff] }
 0x1dd   :  { %6985 = vst [vmem:[#allocation111_spill] sm:$0xff] %v5448_v39  ;;  %v3954_v47 = vpop.eup %3953  ;;  %2087 = vmatpush.msra.mxu2 %v1642_v54  ;;  %v1167_v54 = vmul.f32 1.442695, %v4810_v4  ;;  %v1603_v4 = vld [vmem:[%s6869_s2 + $0x120] sm:$0xff] }
 0x1de   :  { %1835 = vmatmul.f32.gmra.mxu3 %v3948_v38  ;;  %2000 = vmatpush.msrb.mxu1 %v1624_v1 }
 0x1df   :  { %1913 = vmatpush.msrb.mxu0 %v1606_v37  ;;  %3961 = vpow2.f32 %v1167_v54  ;;  %v1189_v54 = vmul.f32 1.442695, %v4828_v9  ;;  %v4431_v9 = vld [vmem:[%s6868_s0 + $0x50] sm:$0xff] }
 0x1e0   :  { %2001 = vmatpush.msrb.mxu1 %v1623_v60  ;;  %v3956_v60 = vpop.eup %3955 }
 0x1e1   :  { %1746 = vmatmul.f32.gmra.mxu2 %v3950_v57  ;;  %v5468_v38 = vpop.f32.mrf.mxu3  ;;  %v3958_v37 = vpop.eup %3957  ;;  %3963 = vpow2.f32 %v1189_v54 }
 0x1e3   :  { %v5479_v57 = vpop.f32.mrf.mxu0 }
 0x1e4   :  { %v5476_v49 = vpop.f32.mrf.mxu2  ;;  %6986 = vst [vmem:[#allocation112_spill] sm:$0xff] %v5479_v57  ;;  %v5485_v56 = vpop.f32.mrf.mxu1  ;;  %v4430_v57 = vld [vmem:[%s6868_s0 + $0x48] sm:$0xff] }
 0x1e5   :  { %6987 = vst [vmem:[#allocation113_spill] sm:$0xff] %v5485_v56 }
 0x1e6   :  { %3607 = vmatmul.msk.bf16.gmra.mxu0 %vm329_vm1, %v4430_v57  ;;  %1838 = vmatmul.f32.gmra.mxu3 %v3952_v6  ;;  %v1622_v6 = vld [vmem:[%s6869_s2 + $0x1b8] sm:$0xff] }
 0x1e7   :  { %3619 = vmatmul.msk.bf16.gmra.mxu1 %vm329_vm1, %v4430_v57 }
 0x1e8   :  { %2002 = vmatpush.msrb.mxu1 %v1622_v6  ;;  %v1619_v6 = vld [vmem:[%s6869_s2 + $0x1a0] sm:$0xff] }
 0x1e9   :  { %1749 = vmatmul.f32.gmra.mxu2 %v3954_v47  ;;  %v5510_v57 = vpop.f32.mrf.mxu3  ;;  %v1605_v47 = vld [vmem:[%s6869_s2 + $0x130] sm:$0xff] }
 0x1ea   :  { %1914 = vmatpush.msrb.mxu0 %v1605_v47  ;;  %2003 = vmatpush.msrb.mxu1 %v1621_v61  ;;  %v1602_v47 = vld [vmem:[%s6869_s2 + $0x118] sm:$0xff] }
 0x1eb   :  { %v5521_v1 = vpop.f32.mrf.mxu0  ;;  %v1618_v61 = vld [vmem:[%s6869_s2 + $0x198] sm:$0xff] }
 0x1ec   :  { %v5518_v56 = vpop.f32.mrf.mxu2  ;;  %6988 = vst [vmem:[#allocation114_spill] sm:$0xff] %v5521_v1  ;;  %v5527_v39 = vpop.f32.mrf.mxu1  ;;  %1915 = vmatpush.msrb.mxu0 %v1604_v2  ;;  %2004 = vmatpush.msrb.mxu1 %v1620_v5  ;;  %v1601_v2 = vld [vmem:[%s6869_s2 + $0x110] sm:$0xff]  ;;  %v1187_v5 = vmul.f32 1.442695, %v4826_v8  ;;  %v1600_v8 = vld [vmem:[%s6869_s2 + $0x108] sm:$0xff] }
 0x1ed   :  { %6989 = vst [vmem:[#allocation115_spill] sm:$0xff] %v5527_v39  ;;  %v1641_v1 = vld [vmem:[%s6869_s2 + $0x250] sm:$0xff] }
 0x1ee   :  { %1841 = vmatmul.f32.gmra.mxu3 %v3956_v60  ;;  %1916 = vmatpush.msrb.mxu0 %v1603_v4  ;;  %v3960_v4 = vpop.eup %3959  ;;  %3965 = vpow2.f32 %v1187_v5 }
 0x1ef   :  { %2005 = vmatpush.msrb.mxu1 %v1619_v6  ;;  %v1617_v6 = vld [vmem:[%s6869_s2 + $0x190] sm:$0xff]  ;;  %v3962_v33 = vpop.eup %3961  ;;  %2088 = vmatpush.msra.mxu2 %v1641_v1  ;;  %v1207_v1 = vmul.f32 1.442695, %v4834_v12 }
 0x1f0   :  { %1917 = vmatpush.msrb.mxu0 %v1602_v47  ;;  %v1616_v47 = vld [vmem:[%s6869_s2 + $0x188] sm:$0xff] }
 0x1f1   :  { %1752 = vmatmul.f32.gmra.mxu2 %v3958_v37  ;;  %v5544_v39 = vpop.f32.mrf.mxu3  ;;  %2006 = vmatpush.msrb.mxu1 %v1618_v61  ;;  %v1657_v61 = vld [vmem:[%s6869_s2 + $0x2d0] sm:$0xff] }
 0x1f2   :  { %1918 = vmatpush.msrb.mxu0 %v1601_v2  ;;  %v1599_v2 = vld [vmem:[%s6869_s2 + $0x100] sm:$0xff]  ;;  %2177 = vmatpush.msra.mxu3 %v1657_v61  ;;  %v1640_v61 = vld [vmem:[%s6869_s2 + $0x248] sm:$0xff] }
 0x1f3   :  { %v5555_v60 = vpop.f32.mrf.mxu0  ;;  %2007 = vmatpush.msrb.mxu1 %v1617_v6  ;;  %2089 = vmatpush.msra.mxu2 %v1640_v61 }
 0x1f4   :  { %v5549_v24 = vpop.f32.mrf.mxu2  ;;  %6990 = vst [vmem:[#allocation116_spill] sm:$0xff] %v5555_v60  ;;  %v5558_v37 = vpop.f32.mrf.mxu1  ;;  %1919 = vmatpush.msrb.mxu0 %v1600_v8 }
 0x1f5   :  { %6991 = vst [vmem:[#allocation117_spill] sm:$0xff] %v5558_v37  ;;  %2008 = vmatpush.msrb.mxu1 %v1616_v47  ;;  %v3964_v37 = vpop.eup %3963 }
 0x1f6   :  { %3608 = vmatmul.msk.bf16.gmra.mxu0 %vm329_vm1, %v4431_v9  ;;  %1844 = vmatmul.f32.gmra.mxu3 %v3960_v4  ;;  %v3966_v8 = vpop.eup %3965 }
 0x1f7   :  { %3620 = vmatmul.msk.bf16.gmra.mxu1 %vm329_vm1, %v4431_v9  ;;  %v1209_v9 = vmul.f32 1.442695, %v4836_v13  ;;  %1920 = vmatpush.msrb.mxu0 %v1599_v2  ;;  %v1656_v13 = vld [vmem:[%s6869_s2 + $0x2c8] sm:$0xff]  ;;  %v1229_v2 = vmul.f32 1.442695, %v4864_v23 }
 0x1f8   :  { %2178 = vmatpush.msra.mxu3 %v1656_v13  ;;  %v1247_v23 = vmul.f32 1.442695, %v4870_v26  ;;  %v1639_v26 = vld [vmem:[%s6869_s2 + $0x240] sm:$0xff] }
 0x1f9   :  { %1755 = vmatmul.f32.gmra.mxu2 %v3962_v33  ;;  %v5583_v4 = vpop.f32.mrf.mxu3  ;;  %v1615_v33 = vld [vmem:[%s6869_s2 + $0x180] sm:$0xff]  ;;  %3967 = vpow2.f32 %v1209_v9 }
 0x1fa   :  { %2009 = vmatpush.msrb.mxu1 %v1615_v33  ;;  %3969 = vpow2.f32 %v1207_v1  ;;  %v1227_v33 = vmul.f32 1.442695, %v4862_v22  ;;  %v4432_v1 = vld [vmem:[%s6868_s0 + $0x58] sm:$0xff]  ;;  %v1249_v22 = vmul.f32 1.442695, %v4872_v27  ;;  %2090 = vmatpush.msra.mxu2 %v1639_v26  ;;  %v1655_v27 = vld [vmem:[%s6869_s2 + $0x2c0] sm:$0xff] }
 0x1fb   :  { %v5591_v5 = vpop.f32.mrf.mxu0  ;;  %3971 = vpow2.f32 %v1229_v2  ;;  %2179 = vmatpush.msra.mxu3 %v1655_v27  ;;  %v1113_v26 = vmul.f32 1.442695, %v4890_v35  ;;  %v1287_v35 = vmul.f32 1.442695, %v4894_v40  ;;  %v1307_v40 = vmul.f32 1.442695, %v4910_v44 }
 0x1fc   :  { %v5588_v54 = vpop.f32.mrf.mxu2  ;;  %6992 = vst [vmem:[#allocation118_spill] sm:$0xff] %v5591_v5  ;;  %v5594_v6 = vpop.f32.mrf.mxu1  ;;  %3973 = vpow2.f32 %v1227_v33  ;;  %v1093_v5 = vmul.f32 1.442695, %v4882_v28  ;;  %v1267_v28 = vmul.f32 1.442695, %v4886_v32  ;;  %v1638_v32 = vld [vmem:[%s6869_s2 + $0x238] sm:$0xff] }
 0x1fd   :  { %6993 = vst [vmem:[#allocation119_spill] sm:$0xff] %v5594_v6  ;;  %3975 = vpow2.f32 %v1247_v23  ;;  %v1269_v33 = vmul.f32 1.442695, %v4888_v34  ;;  %v1654_v34 = vld [vmem:[%s6869_s2 + $0x2b8] sm:$0xff]  ;;  %2091 = vmatpush.msra.mxu2 %v1638_v32  ;;  %v1637_v44 = vld [vmem:[%s6869_s2 + $0x230] sm:$0xff] }
 0x1fe   :  { %1847 = vmatmul.f32.gmra.mxu3 %v3964_v37  ;;  %3977 = vpow2.f32 %v1249_v22  ;;  %v1111_v22 = vmul.f32 1.442695, %v4892_v36 }
 0x1ff   :  { %2180 = vmatpush.msra.mxu3 %v1654_v34  ;;  %2092 = vmatpush.msra.mxu2 %v1637_v44 }
 0x201   :  { %1758 = vmatmul.f32.gmra.mxu2 %v3966_v8  ;;  %v5602_v12 = vpop.f32.mrf.mxu3  ;;  %v3968_v8 = vpop.eup %3967 }
 0x202   :  { %v3970_v6 = vpop.eup %3969 }
 0x203   :  { %v5607_v37 = vpop.f32.mrf.mxu0  ;;  %v3972_v2 = vpop.eup %3971 }
 0x204   :  { %v5604_v47 = vpop.f32.mrf.mxu2  ;;  %6994 = vst [vmem:[#allocation120_spill] sm:$0xff] %v5607_v37  ;;  %v5610_v9 = vpop.f32.mrf.mxu1 }
 0x205   :  { %6995 = vst [vmem:[#allocation121_spill] sm:$0xff] %v5610_v9  ;;  %v1091_v9 = vmul.f32 1.442695, %v4884_v29 }
 0x206   :  { %3609 = vmatmul.msk.bf16.gmra.mxu0 %vm329_vm1, %v4432_v1  ;;  %1850 = vmatmul.f32.gmra.mxu3 %v3968_v8 }
 0x207   :  { %3621 = vmatmul.msk.bf16.gmra.mxu1 %vm329_vm1, %v4432_v1  ;;  %3979 = vpow2.f32 %v1091_v9 }
 0x208   :  { %3981 = vpow2.f32 %v1093_v5 }
 0x209   :  { %1761 = vmatmul.f32.gmra.mxu2 %v3970_v6  ;;  %v5618_v61 = vpop.f32.mrf.mxu3  ;;  %v3974_v6 = vpop.eup %3973  ;;  %3983 = vpow2.f32 %v1267_v28  ;;  %v1289_v28 = vmul.f32 1.442695, %v4896_v41 }
 0x20a   :  { %v3976_v23 = vpop.eup %3975  ;;  %3985 = vpow2.f32 %v1269_v33 }
 0x20b   :  { %v5624_v37 = vpop.f32.mrf.mxu0  ;;  %v3978_v9 = vpop.eup %3977  ;;  %3987 = vpow2.f32 %v1111_v22  ;;  %v1131_v22 = vmul.f32 1.442695, %v4908_v43  ;;  %v1309_v43 = vmul.f32 1.442695, %v4912_v48  ;;  %v1653_v48 = vld [vmem:[%s6869_s2 + $0x2b0] sm:$0xff] }
 0x20c   :  { %v5621_v13 = vpop.f32.mrf.mxu2  ;;  %6996 = vst [vmem:[#allocation122_spill] sm:$0xff] %v5624_v37  ;;  %v5627_v8 = vpop.f32.mrf.mxu1  ;;  %3989 = vpow2.f32 %v1113_v26  ;;  %2181 = vmatpush.msra.mxu3 %v1653_v48 }
 0x20d   :  { %6997 = vst [vmem:[#allocation123_spill] sm:$0xff] %v5627_v8  ;;  %v3980_v5 = vpop.eup %3979  ;;  %3991 = vpow2.f32 %v1287_v35 }
 0x20e   :  { %1853 = vmatmul.f32.gmra.mxu3 %v3972_v2  ;;  %v3982_v27 = vpop.eup %3981  ;;  %3993 = vpow2.f32 %v1289_v28 }
 0x20f   :  { %3995 = vpow2.f32 %v1131_v22 }
 0x211   :  { %1764 = vmatmul.f32.gmra.mxu2 %v3974_v6  ;;  %v5636_v29 = vpop.f32.mrf.mxu3 }
 0x213   :  { %v5642_v2 = vpop.f32.mrf.mxu0 }
 0x214   :  { %v5639_v1 = vpop.f32.mrf.mxu2  ;;  %6998 = vst [vmem:[#allocation124_spill] sm:$0xff] %v5642_v2  ;;  %v5645_v6 = vpop.f32.mrf.mxu1 }
 0x215   :  { %6999 = vst [vmem:[#allocation125_spill] sm:$0xff] %v5645_v6  ;;  %v7045_v6 = vld [vmem:[#allocation36_spill] sm:$0xff] }
 0x216   :  { %1856 = vmatmul.f32.gmra.mxu3 %v3978_v9  ;;  %1921 = vmatmul.f32.vlgmr.msrb.gmra.mxu0 %v3980_v5 }
 0x217   :  { %2010 = vmatmul.f32.vlgmr.msrb.gmra.mxu1 %v3982_v27  ;;  %v1133_v27 = vmul.f32 1.442695, %v4906_v42 }
 0x219   :  { %1767 = vmatmul.f32.gmra.mxu2 %v3976_v23  ;;  %v5654_v36 = vpop.f32.mrf.mxu3  ;;  %v3984_v23 = vpop.eup %3983  ;;  %3997 = vpow2.f32 %v1133_v27 }
 0x21a   :  { %v3986_v5 = vpop.eup %3985  ;;  %3999 = vpow2.f32 %v1307_v40 }
 0x21b   :  { %v5660_v9 = vpop.f32.mrf.mxu0  ;;  %v3988_v26 = vpop.eup %3987  ;;  %4001 = vpow2.f32 %v1309_v43 }
 0x21c   :  { %v5657_v33 = vpop.f32.mrf.mxu2  ;;  %7000 = vst [vmem:[#allocation126_spill] sm:$0xff] %v5660_v9  ;;  %v5663_v2 = vpop.f32.mrf.mxu1  ;;  %v1151_v9 = vmul.f32 1.442695, %v4916_v15 }
 0x21d   :  { %7001 = vst [vmem:[#allocation127_spill] sm:$0xff] %v5663_v2  ;;  %v3990_v32 = vpop.eup %3989 }
 0x21e   :  { %1859 = vmatmul.f32.gmra.mxu3 %v3986_v5  ;;  %1924 = vmatmul.f32.gmra.mxu0 %v3988_v26  ;;  %v3992_v42 = vpop.eup %3991  ;;  %v1153_v5 = vmul.f32 1.442695, %v4914_v14  ;;  %4003 = vpow2.f32 %v1151_v9  ;;  %v1327_v14 = vmul.f32 1.442695, %v4918_v16  ;;  %v1329_v26 = vmul.f32 1.442695, %v4920_v17 }
 0x21f   :  { %2013 = vmatmul.f32.gmra.mxu1 %v3990_v32  ;;  %v3994_v28 = vpop.eup %3993  ;;  %v1171_v9 = vmul.f32 1.442695, %v4941_v19  ;;  %v1636_v19 = vld [vmem:[%s6869_s2 + $0x228] sm:$0xff] }
 0x220   :  { %4005 = vpow2.f32 %v1153_v5  ;;  %v1652_v16 = vld [vmem:[%s6869_s2 + $0x2a8] sm:$0xff]  ;;  %2093 = vmatpush.msra.mxu2 %v1636_v19 }
 0x221   :  { %1770 = vmatmul.f32.gmra.mxu2 %v3984_v23  ;;  %v5666_v41 = vpop.f32.mrf.mxu3  ;;  %v3996_v23 = vpop.eup %3995  ;;  %4007 = vpow2.f32 %v1327_v14  ;;  %2182 = vmatpush.msra.mxu3 %v1652_v16  ;;  %v7015_v16 = vld [vmem:[#allocation20_spill] sm:$0xff] }
 0x222   :  { %7002 = vst [vmem:[#allocation128_spill] sm:$0xff] %v5666_v41  ;;  %v3998_v27 = vpop.eup %3997  ;;  %4009 = vpow2.f32 %v1329_v26  ;;  %v1191_v26 = vmul.f32 1.442695, %v4951_v58 }
 0x223   :  { %v5672_v35 = vpop.f32.mrf.mxu0  ;;  %v4000_v40 = vpop.eup %3999  ;;  %4011 = vpow2.f32 %v1171_v9 }
 0x224   :  { %v5669_v34 = vpop.f32.mrf.mxu2  ;;  %7003 = vst [vmem:[#allocation129_spill] sm:$0xff] %v5672_v35  ;;  %v5675_v22 = vpop.f32.mrf.mxu1 }
 0x225   :  { %7004 = vst [vmem:[#allocation130_spill] sm:$0xff] %v5675_v22 }
 0x226   :  { %1862 = vmatmul.f32.gmra.mxu3 %v3994_v28  ;;  %1927 = vmatmul.f32.gmra.mxu0 %v3996_v23  ;;  %v1173_v28 = vmul.f32 1.442695, %v4939_v21  ;;  %v1347_v21 = vmul.f32 1.442695, %v4943_v10  ;;  %v1369_v10 = vmul.f32 1.442695, %v4955_v53 }
 0x227   :  { %2016 = vmatmul.f32.gmra.mxu1 %v3998_v27  ;;  %v1349_v27 = vmul.f32 1.442695, %v4945_v7  ;;  %v1367_v7 = vmul.f32 1.442695, %v4953_v25 }
 0x228   :  { %4013 = vpow2.f32 %v1173_v28 }
 0x229   :  { %1773 = vmatmul.f32.gmra.mxu2 %v3992_v42  ;;  %v5684_v15 = vpop.f32.mrf.mxu3  ;;  %v4002_v42 = vpop.eup %4001  ;;  %4015 = vpow2.f32 %v1347_v21 }
 0x22a   :  { %7005 = vst [vmem:[#allocation131_spill] sm:$0xff] %v5684_v15  ;;  %v4004_v5 = vpop.eup %4003  ;;  %4017 = vpow2.f32 %v1349_v27  ;;  %v1635_v27 = vld [vmem:[%s6869_s2 + $0x220] sm:$0xff] }
 0x22b   :  { %v5690_v43 = vpop.f32.mrf.mxu0  ;;  %v4006_v44 = vpop.eup %4005  ;;  %4019 = vpow2.f32 %v1191_v26  ;;  %v7017_v26 = vld [vmem:[#allocation19_spill] sm:$0xff]  ;;  %2094 = vmatpush.msra.mxu2 %v1635_v27  ;;  %v7021_v27 = vld [vmem:[#allocation22_spill] sm:$0xff] }
 0x22c   :  { %v5687_v32 = vpop.f32.mrf.mxu2  ;;  %7007 = vst [vmem:[#allocation133_spill] sm:$0xff] %v5690_v43  ;;  %v5693_v23 = vpop.f32.mrf.mxu1  ;;  %v7033_v43 = vld [vmem:[#allocation27_spill] sm:$0xff] }
 0x22d   :  { %7006 = vst [vmem:[#allocation132_spill] sm:$0xff] %v5687_v32  ;;  %v4008_v14 = vpop.eup %4007 }
 0x22e   :  { %7008 = vst [vmem:[#allocation134_spill] sm:$0xff] %v5693_v23  ;;  %1865 = vmatmul.f32.gmra.mxu3 %v4002_v42  ;;  %1930 = vmatmul.f32.gmra.mxu0 %v4004_v5  ;;  %v4010_v9 = vpop.eup %4009  ;;  %v1193_v42 = vmul.f32 1.442695, %v4948_v59  ;;  %v1253_v23 = vmul.f32 1.442695, %v7033_v43 }
 0x22f   :  { %2019 = vmatmul.f32.gmra.mxu1 %v4006_v44  ;;  %v4012_v28 = vpop.eup %4011 }
 0x230   :  { %v4014_v44 = vpop.eup %4013  ;;  %4021 = vpow2.f32 %v1193_v42 }
 0x231   :  { %1776 = vmatmul.f32.gmra.mxu2 %v4000_v40  ;;  %v5702_v17 = vpop.f32.mrf.mxu3  ;;  %v4016_v59 = vpop.eup %4015  ;;  %4023 = vpow2.f32 %v1367_v7 }
 0x232   :  { %7009 = vst [vmem:[#allocation135_spill] sm:$0xff] %v5702_v17  ;;  %4025 = vpow2.f32 %v1369_v10 }
 0x233   :  { %v5708_v40 = vpop.f32.mrf.mxu0 }
 0x234   :  { %v5705_v48 = vpop.f32.mrf.mxu2  ;;  %7011 = vst [vmem:[#allocation137_spill] sm:$0xff] %v5708_v40  ;;  %v5711_v5 = vpop.f32.mrf.mxu1  ;;  %v1211_v40 = vmul.f32 1.442695, %v7015_v16 }
 0x235   :  { %7010 = vst [vmem:[#allocation136_spill] sm:$0xff] %v5705_v48  ;;  %v7099_v48 = vld [vmem:[#allocation71_spill] sm:$0xff] }
 0x236   :  { %7012 = vst [vmem:[#allocation138_spill] sm:$0xff] %v5711_v5  ;;  %1868 = vmatmul.f32.gmra.mxu3 %v4010_v9  ;;  %1933 = vmatmul.f32.gmra.mxu0 %v4012_v28  ;;  %v1213_v9 = vmul.f32 1.442695, %v7017_v26  ;;  %4027 = vpow2.f32 %v1211_v40  ;;  %v1651_v28 = vld [vmem:[%s6869_s2 + $0x2a0] sm:$0xff] }
 0x237   :  { %2022 = vmatmul.f32.gmra.mxu1 %v4014_v44  ;;  %2183 = vmatpush.msra.mxu3 %v1651_v28  ;;  %v7019_v44 = vld [vmem:[#allocation21_spill] sm:$0xff] }
 0x238   :  { %4029 = vpow2.f32 %v1213_v9  ;;  %v1387_v16 = vmul.f32 1.442695, %v7019_v44  ;;  %v1634_v44 = vld [vmem:[%s6869_s2 + $0x218] sm:$0xff] }
 0x239   :  { %1779 = vmatmul.f32.gmra.mxu2 %v4008_v14  ;;  %v5714_v58 = vpop.f32.mrf.mxu3  ;;  %v4018_v14 = vpop.eup %4017 }
 0x23a   :  { %7013 = vst [vmem:[#allocation139_spill] sm:$0xff] %v5714_v58  ;;  %v4020_v25 = vpop.eup %4019  ;;  %4031 = vpow2.f32 %v1387_v16  ;;  %2095 = vmatpush.msra.mxu2 %v1634_v44  ;;  %v7094_v58 = vld [vmem:[#allocation67_spill] sm:$0xff] }
 0x23b   :  { %v5720_v21 = vpop.f32.mrf.mxu0  ;;  %v4022_v53 = vpop.eup %4021 }
 0x23c   :  { %v5717_v19 = vpop.f32.mrf.mxu2  ;;  %7016 = vst [vmem:[#allocation20_spill] sm:$0xff] %v5720_v21  ;;  %v5726_v42 = vpop.f32.mrf.mxu1  ;;  %v1389_v21 = vmul.f32 1.442695, %v7021_v27  ;;  %v1650_v27 = vld [vmem:[%s6869_s2 + $0x298] sm:$0xff] }
 0x23d   :  { %7014 = vst [vmem:[#allocation140_spill] sm:$0xff] %v5717_v19  ;;  %v4024_v10 = vpop.eup %4023  ;;  %2184 = vmatpush.msra.mxu3 %v1650_v27  ;;  %v7035_v27 = vld [vmem:[#allocation5_spill] sm:$0xff]  ;;  %v1473_v19 = vmul.f32 1.442695, %v7094_v58  ;;  %v1671_v58 = vld [vmem:[%s6869_s2 + $0x340] sm:$0xff] }
 0x23e   :  { %7018 = vst [vmem:[#allocation19_spill] sm:$0xff] %v5726_v42  ;;  %1871 = vmatmul.f32.gmra.mxu3 %v4018_v14  ;;  %1936 = vmatmul.f32.gmra.mxu0 %v4020_v25  ;;  %v7023_v14 = vld [vmem:[#allocation24_spill] sm:$0xff]  ;;  %4033 = vpow2.f32 %v1389_v21 }
 0x23f   :  { %2025 = vmatmul.f32.gmra.mxu1 %v4022_v53  ;;  %v1231_v25 = vmul.f32 1.442695, %v7023_v14  ;;  %v7025_v53 = vld [vmem:[#allocation23_spill] sm:$0xff]  ;;  %v7029_v21 = vld [vmem:[#allocation4_spill] sm:$0xff] }
 0x240   :  { %v1233_v42 = vmul.f32 1.442695, %v7025_v53  ;;  %v7027_v14 = vld [vmem:[#allocation3_spill] sm:$0xff] }
 0x241   :  { %1782 = vmatmul.f32.gmra.mxu2 %v4016_v59  ;;  %v5732_v26 = vpop.f32.mrf.mxu3  ;;  %v4026_v59 = vpop.eup %4025  ;;  %4035 = vpow2.f32 %v1231_v25  ;;  %v1407_v16 = vmul.f32 1.442695, %v7027_v14  ;;  %v1427_v14 = vmul.f32 1.442695, %v7035_v27  ;;  %v7043_v27 = vld [vmem:[#allocation7_spill] sm:$0xff] }
 0x242   :  { %7020 = vst [vmem:[#allocation21_spill] sm:$0xff] %v5732_v26  ;;  %v4028_v9 = vpop.eup %4027  ;;  %4037 = vpow2.f32 %v1233_v42  ;;  %v7087_v26 = vld [vmem:[#allocation64_spill] sm:$0xff] }
 0x243   :  { %v5738_v40 = vpop.f32.mrf.mxu0  ;;  %v4030_v28 = vpop.eup %4029  ;;  %4039 = vpow2.f32 %v1407_v16 }
 0x244   :  { %v5735_v7 = vpop.f32.mrf.mxu2  ;;  %7024 = vst [vmem:[#allocation24_spill] sm:$0xff] %v5738_v40  ;;  %v5741_v5 = vpop.f32.mrf.mxu1 }
 0x245   :  { %7022 = vst [vmem:[#allocation22_spill] sm:$0xff] %v5735_v7  ;;  %v1451_v7 = vmul.f32 1.442695, %v7087_v26  ;;  %v1675_v26 = vld [vmem:[%s6869_s2 + $0x360] sm:$0xff] }
 0x246   :  { %7026 = vst [vmem:[#allocation23_spill] sm:$0xff] %v5741_v5  ;;  %1874 = vmatmul.f32.gmra.mxu3 %v4026_v59  ;;  %1939 = vmatmul.f32.gmra.mxu0 %v4028_v9  ;;  %v1409_v59 = vmul.f32 1.442695, %v7029_v21  ;;  %v7031_v9 = vld [vmem:[#allocation28_spill] sm:$0xff] }
 0x247   :  { %2028 = vmatmul.f32.gmra.mxu1 %v4030_v28  ;;  %v1251_v28 = vmul.f32 1.442695, %v7031_v9  ;;  %v7037_v9 = vld [vmem:[#allocation6_spill] sm:$0xff] }
 0x248   :  { %4041 = vpow2.f32 %v1409_v59 }
 0x249   :  { %1785 = vmatmul.f32.gmra.mxu2 %v4024_v10  ;;  %v5750_v53 = vpop.f32.mrf.mxu3  ;;  %v4032_v10 = vpop.eup %4031  ;;  %4043 = vpow2.f32 %v1251_v28 }
 0x24a   :  { %7028 = vst [vmem:[#allocation3_spill] sm:$0xff] %v5750_v53  ;;  %v4034_v5 = vpop.eup %4033  ;;  %4045 = vpow2.f32 %v1253_v23 }
 0x24b   :  { %v5756_v40 = vpop.f32.mrf.mxu0  ;;  %v4036_v42 = vpop.eup %4035  ;;  %4047 = vpow2.f32 %v1427_v14 }
 0x24c   :  { %v5753_v25 = vpop.f32.mrf.mxu2  ;;  %7032 = vst [vmem:[#allocation28_spill] sm:$0xff] %v5756_v40  ;;  %v5759_v35 = vpop.f32.mrf.mxu1  ;;  %v1429_v40 = vmul.f32 1.442695, %v7037_v9  ;;  %v1447_v9 = vmul.f32 1.442695, %v7043_v27 }
 0x24d   :  { %7030 = vst [vmem:[#allocation4_spill] sm:$0xff] %v5753_v25  ;;  %v4038_v44 = vpop.eup %4037  ;;  %v7074_v25 = vld [vmem:[#allocation55_spill] sm:$0xff] }
 0x24e   :  { %7034 = vst [vmem:[#allocation27_spill] sm:$0xff] %v5759_v35  ;;  %1877 = vmatmul.f32.gmra.mxu3 %v4034_v5  ;;  %1942 = vmatmul.f32.gmra.mxu0 %v4036_v42  ;;  %v4040_v43 = vpop.eup %4039  ;;  %v7039_v35 = vld [vmem:[#allocation32_spill] sm:$0xff]  ;;  %4049 = vpow2.f32 %v1429_v40  ;;  %v1291_v40 = vmul.f32 1.442695, %v7045_v6 }
 0x24f   :  { %2031 = vmatmul.f32.gmra.mxu1 %v4038_v44  ;;  %v1271_v2 = vmul.f32 1.442695, %v7039_v35  ;;  %v1633_v5 = vld [vmem:[%s6869_s2 + $0x210] sm:$0xff]  ;;  %v4042_v59 = vpop.eup %4041  ;;  %v1632_v6 = vld [vmem:[%s6869_s2 + $0x208] sm:$0xff] }
 0x250   :  { %2096 = vmatpush.msra.mxu2 %v1633_v5  ;;  %v4044_v42 = vpop.eup %4043  ;;  %v1649_v35 = vld [vmem:[%s6869_s2 + $0x290] sm:$0xff] }
 0x251   :  { %1788 = vmatmul.f32.gmra.mxu2 %v4032_v10  ;;  %v5762_v21 = vpop.f32.mrf.mxu3  ;;  %v7041_v10 = vld [vmem:[#allocation31_spill] sm:$0xff]  ;;  %v4046_v44 = vpop.eup %4045  ;;  %4051 = vpow2.f32 %v1271_v2  ;;  %2185 = vmatpush.msra.mxu3 %v1649_v35 }
 0x252   :  { %7036 = vst [vmem:[#allocation5_spill] sm:$0xff] %v5762_v21  ;;  %v1273_v23 = vmul.f32 1.442695, %v7041_v10  ;;  %v4048_v14 = vpop.eup %4047  ;;  %2097 = vmatpush.msra.mxu2 %v1632_v6 }
 0x253   :  { %v5768_v16 = vpop.f32.mrf.mxu0 }
 0x254   :  { %v5765_v22 = vpop.f32.mrf.mxu2  ;;  %7040 = vst [vmem:[#allocation32_spill] sm:$0xff] %v5768_v16  ;;  %v5774_v28 = vpop.f32.mrf.mxu1  ;;  %4053 = vpow2.f32 %v1273_v23  ;;  %v7044_v16 = vld [vmem:[#allocation8_spill] sm:$0xff] }
 0x255   :  { %7038 = vst [vmem:[#allocation6_spill] sm:$0xff] %v5765_v22  ;;  %v1449_v5 = vmul.f32 1.442695, %v7044_v16  ;;  %4055 = vpow2.f32 %v1447_v9  ;;  %v1648_v16 = vld [vmem:[%s6869_s2 + $0x288] sm:$0xff] }
 0x256   :  { %7042 = vst [vmem:[#allocation31_spill] sm:$0xff] %v5774_v28  ;;  %1880 = vmatmul.f32.gmra.mxu3 %v4042_v59  ;;  %1945 = vmatmul.f32.gmra.mxu0 %v4044_v42  ;;  %v7047_v42 = vld [vmem:[#allocation35_spill] sm:$0xff] }
 0x257   :  { %2034 = vmatmul.f32.gmra.mxu1 %v4046_v44  ;;  %v1293_v44 = vmul.f32 1.442695, %v7047_v42  ;;  %4057 = vpow2.f32 %v1449_v5  ;;  %2186 = vmatpush.msra.mxu3 %v1648_v16 }
 0x258   :  { %4059 = vpow2.f32 %v1291_v40 }
 0x259   :  { %1791 = vmatmul.f32.gmra.mxu2 %v4040_v43  ;;  %v1833_v10 = vpop.f32.mrf.mxu3  ;;  %v4050_v43 = vpop.eup %4049  ;;  %4061 = vpow2.f32 %v1293_v44 }
 0x25a   :  { %v4052_v23 = vpop.eup %4051 }
 0x25b   :  { %v5784_v2 = vpop.f32.mrf.mxu0  ;;  %v4054_v35 = vpop.eup %4053 }
 0x25c   :  { %v1744_v28 = vpop.f32.mrf.mxu2  ;;  %7046 = vst [vmem:[#allocation7_spill] sm:$0xff] %v5784_v2  ;;  %v5787_v21 = vpop.f32.mrf.mxu1  ;;  %v7052_v2 = vld [vmem:[#allocation39_spill] sm:$0xff] }
 0x25d   :  { %v5782_v59 = vadd.f32 %v1833_v10, %v1744_v28  ;;  %7048 = vst [vmem:[#allocation8_spill] sm:$0xff] %v5787_v21  ;;  %v7049_v28 = vld [vmem:[#allocation9_spill] sm:$0xff]  ;;  %v7050_v10 = vld [vmem:[#allocation10_spill] sm:$0xff]  ;;  %v4056_v40 = vpop.eup %4055  ;;  %v1313_v21 = vmul.f32 1.442695, %v7052_v2  ;;  %v7056_v2 = vld [vmem:[#allocation43_spill] sm:$0xff] }
 0x25e   :  { %1883 = vmatmul.f32.gmra.mxu3 %v4050_v43  ;;  %1948 = vmatmul.f32.gmra.mxu0 %v4052_v23  ;;  %v1467_v27 = vmul.f32 1.442695, %v7049_v28  ;;  %v1469_v5 = vmul.f32 1.442695, %v7050_v10  ;;  %v1331_v8 = vmul.f32 1.442695, %v7056_v2 }
 0x25f   :  { %2037 = vmatmul.f32.gmra.mxu1 %v4054_v35  ;;  %v4058_v35 = vpop.eup %4057  ;;  %v7061_v2 = vld [vmem:[#allocation14_spill] sm:$0xff] }
 0x260   :  { %v4060_v44 = vpop.eup %4059  ;;  %4063 = vpow2.f32 %v1467_v27 }
 0x261   :  { %1794 = vmatmul.f32.gmra.mxu2 %v4048_v14  ;;  %v1836_v9 = vpop.f32.mrf.mxu3  ;;  %v1311_v14 = vmul.f32 1.442695, %v5080_v62  ;;  %v4062_v6 = vpop.eup %4061  ;;  %4065 = vpow2.f32 %v1469_v5  ;;  %v7054_v62 = vld [vmem:[#allocation11_spill] sm:$0xff] }
 0x262   :  { %v1487_v16 = vmul.f32 1.442695, %v7054_v62  ;;  %v1631_v5 = vld [vmem:[%s6869_s2 + $0x200] sm:$0xff] }
 0x263   :  { %v5800_v23 = vpop.f32.mrf.mxu0  ;;  %4067 = vpow2.f32 %v1311_v14  ;;  %v7058_v14 = vld [vmem:[#allocation42_spill] sm:$0xff]  ;;  %2098 = vmatpush.msra.mxu2 %v1631_v5  ;;  %v1509_v5 = vmul.f32 1.442695, %v7061_v2 }
 0x264   :  { %v1747_v43 = vpop.f32.mrf.mxu2  ;;  %7051 = vst [vmem:[#allocation36_spill] sm:$0xff] %v5800_v23  ;;  %v5803_v22 = vpop.f32.mrf.mxu1  ;;  %4069 = vpow2.f32 %v1313_v21  ;;  %v1333_v21 = vmul.f32 1.442695, %v7058_v14  ;;  %v1647_v62 = vld [vmem:[%s6869_s2 + $0x280] sm:$0xff] }
 0x265   :  { %v5798_v42 = vadd.f32 %v1836_v9, %v1747_v43  ;;  %7053 = vst [vmem:[#allocation35_spill] sm:$0xff] %v5803_v22  ;;  %v7055_v9 = vld [vmem:[#allocation12_spill] sm:$0xff]  ;;  %4071 = vpow2.f32 %v1487_v16  ;;  %2187 = vmatpush.msra.mxu3 %v1647_v62 }
 0x266   :  { %1886 = vmatmul.f32.gmra.mxu3 %v4058_v35  ;;  %1951 = vmatmul.f32.gmra.mxu0 %v4060_v44  ;;  %v1489_v10 = vmul.f32 1.442695, %v7055_v9  ;;  %v4064_v23 = vpop.eup %4063 }
 0x267   :  { %2040 = vmatmul.f32.gmra.mxu1 %v4062_v6 }
 0x268   :  { %4073 = vpow2.f32 %v1489_v10 }
 0x269   :  { %1797 = vmatmul.f32.gmra.mxu2 %v4056_v40  ;;  %v1839_v28 = vpop.f32.mrf.mxu3  ;;  %v4066_v40 = vpop.eup %4065  ;;  %4075 = vpow2.f32 %v1331_v8 }
 0x26a   :  { %v4068_v44 = vpop.eup %4067  ;;  %4077 = vpow2.f32 %v1333_v21 }
 0x26b   :  { %v5810_v27 = vpop.f32.mrf.mxu0  ;;  %v4070_v6 = vpop.eup %4069 }
 0x26c   :  { %v1750_v43 = vpop.f32.mrf.mxu2  ;;  %7057 = vst [vmem:[#allocation9_spill] sm:$0xff] %v5810_v27  ;;  %v5816_v35 = vpop.f32.mrf.mxu1  ;;  %v7062_v27 = vld [vmem:[#allocation47_spill] sm:$0xff] }
 0x26d   :  { %v5808_v22 = vadd.f32 %v1839_v28, %v1750_v43  ;;  %7059 = vst [vmem:[#allocation10_spill] sm:$0xff] %v5816_v35  ;;  %v7060_v28 = vld [vmem:[#allocation13_spill] sm:$0xff]  ;;  %v4072_v16 = vpop.eup %4071  ;;  %v1351_v10 = vmul.f32 1.442695, %v7062_v27 }
 0x26e   :  { %1889 = vmatmul.f32.gmra.mxu3 %v4066_v40  ;;  %1954 = vmatmul.f32.gmra.mxu0 %v4068_v44  ;;  %v1507_v9 = vmul.f32 1.442695, %v7060_v28  ;;  %v7064_v44 = vld [vmem:[#allocation46_spill] sm:$0xff] }
 0x26f   :  { %2043 = vmatmul.f32.gmra.mxu1 %v4070_v6  ;;  %v1353_v6 = vmul.f32 1.442695, %v7064_v44  ;;  %v1710_v27 = vld [vmem:[%s6869_s2 + $0x478] sm:$0xff]  ;;  %v7068_v44 = vld [vmem:[#allocation51_spill] sm:$0xff] }
 0x270   :  { %4079 = vpow2.f32 %v1507_v9  ;;  %v1678_v28 = vld [vmem:[%s6869_s2 + $0x378] sm:$0xff]  ;;  %2439 = vmatpush.msrb.mxu2 %v1710_v27  ;;  %v7066_v9 = vld [vmem:[#allocation15_spill] sm:$0xff] }
 0x271   :  { %1800 = vmatmul.f32.gmra.mxu2 %v4064_v23  ;;  %v1842_v43 = vpop.f32.mrf.mxu3  ;;  %v4074_v23 = vpop.eup %4073  ;;  %4081 = vpow2.f32 %v1509_v5  ;;  %2261 = vmatpush.msra.mxu0 %v1678_v28  ;;  %v1527_v2 = vmul.f32 1.442695, %v7066_v9  ;;  %v7070_v28 = vld [vmem:[#allocation50_spill] sm:$0xff] }
 0x272   :  { %v4076_v21 = vpop.eup %4075  ;;  %4083 = vpow2.f32 %v1351_v10 }
 0x273   :  { %v5826_v8 = vpop.f32.mrf.mxu0  ;;  %v4078_v62 = vpop.eup %4077  ;;  %4085 = vpow2.f32 %v1353_v6  ;;  %v1694_v6 = vld [vmem:[%s6869_s2 + $0x3f8] sm:$0xff] }
 0x274   :  { %v1753_v14 = vpop.f32.mrf.mxu2  ;;  %7063 = vst [vmem:[#allocation39_spill] sm:$0xff] %v5826_v8  ;;  %v5829_v35 = vpop.f32.mrf.mxu1  ;;  %2350 = vmatpush.msra.mxu1 %v1694_v6  ;;  %4087 = vpow2.f32 %v1527_v2 }
 0x275   :  { %v5824_v40 = vadd.f32 %v1842_v43, %v1753_v14  ;;  %7065 = vst [vmem:[#allocation11_spill] sm:$0xff] %v5829_v35  ;;  %v1726_v43 = vld [vmem:[%s6869_s2 + $0x4f8] sm:$0xff]  ;;  %v7067_v14 = vld [vmem:[#allocation16_spill] sm:$0xff]  ;;  %v1373_v35 = vmul.f32 1.442695, %v7070_v28 }
 0x276   :  { %1892 = vmatmul.f32.gmra.mxu3 %v4074_v23  ;;  %1957 = vmatmul.f32.gmra.mxu0 %v4076_v21  ;;  %v4080_v23 = vpop.eup %4079  ;;  %v1371_v21 = vmul.f32 1.442695, %v7068_v44 }
 0x277   :  { %2046 = vmatmul.f32.gmra.mxu1 %v4078_v62  ;;  %2528 = vmatpush.msrb.mxu3 %v1726_v43  ;;  %v4082_v27 = vpop.eup %4081 }
 0x278   :  { %v4084_v43 = vpop.eup %4083 }
 0x279   :  { %1803 = vmatmul.f32.gmra.mxu2 %v4072_v16  ;;  %v1845_v5 = vpop.f32.mrf.mxu3  ;;  %v1529_v16 = vmul.f32 1.442695, %v7067_v14  ;;  %v4086_v14 = vpop.eup %4085 }
 0x27a   :  { %v4088_v28 = vpop.eup %4087 }
 0x27b   :  { %v5845_v8 = vpop.f32.mrf.mxu0  ;;  %4089 = vpow2.f32 %v1529_v16  ;;  %v1709_v16 = vld [vmem:[%s6869_s2 + $0x470] sm:$0xff] }
 0x27c   :  { %v1756_v10 = vpop.f32.mrf.mxu2  ;;  %7069 = vst [vmem:[#allocation12_spill] sm:$0xff] %v5845_v8  ;;  %v5851_v9 = vpop.f32.mrf.mxu1  ;;  %4091 = vpow2.f32 %v1371_v21  ;;  %v7073_v8 = vld [vmem:[#allocation18_spill] sm:$0xff]  ;;  %2440 = vmatpush.msrb.mxu2 %v1709_v16 }
 0x27d   :  { %v5843_v62 = vadd.f32 %v1845_v5, %v1756_v10  ;;  %7071 = vst [vmem:[#allocation43_spill] sm:$0xff] %v5851_v9  ;;  %4093 = vpow2.f32 %v1373_v35  ;;  %v7072_v5 = vld [vmem:[#allocation17_spill] sm:$0xff]  ;;  %v1549_v37 = vmul.f32 1.442695, %v7073_v8  ;;  %v1391_v9 = vmul.f32 1.442695, %v7074_v25 }
 0x27e   :  { %1895 = vmatmul.f32.gmra.mxu3 %v4082_v27  ;;  %1960 = vmatmul.f32.gmra.mxu0 %v4084_v43  ;;  %v1547_v10 = vmul.f32 1.442695, %v7072_v5  ;;  %v7076_v21 = vld [vmem:[#allocation54_spill] sm:$0xff]  ;;  %v1725_v25 = vld [vmem:[%s6869_s2 + $0x4f0] sm:$0xff] }
 0x27f   :  { %2049 = vmatmul.f32.gmra.mxu1 %v4086_v14  ;;  %v1393_v35 = vmul.f32 1.442695, %v7076_v21  ;;  %v1693_v14 = vld [vmem:[%s6869_s2 + $0x3f0] sm:$0xff]  ;;  %2529 = vmatpush.msrb.mxu3 %v1725_v25 }
 0x280   :  { %4095 = vpow2.f32 %v1547_v10  ;;  %2351 = vmatpush.msra.mxu1 %v1693_v14  ;;  %v1676_v14 = vld [vmem:[%s6869_s2 + $0x368] sm:$0xff] }
 0x281   :  { %1806 = vmatmul.f32.gmra.mxu2 %v4080_v23  ;;  %v1848_v44 = vpop.f32.mrf.mxu3  ;;  %v4090_v23 = vpop.eup %4089  ;;  %4097 = vpow2.f32 %v1549_v37  ;;  %v7078_v37 = vld [vmem:[#allocation25_spill] sm:$0xff] }
 0x282   :  { %v4092_v43 = vpop.eup %4091  ;;  %4099 = vpow2.f32 %v1391_v9  ;;  %v1095_v5 = vmul.f32 1.442695, %v7078_v37  ;;  %v7082_v37 = vld [vmem:[#allocation29_spill] sm:$0xff] }
 0x283   :  { %v5858_v2 = vpop.f32.mrf.mxu0  ;;  %v4094_v8 = vpop.eup %4093  ;;  %4101 = vpow2.f32 %v1393_v35 }
 0x284   :  { %v1759_v53 = vpop.f32.mrf.mxu2  ;;  %7075 = vst [vmem:[#allocation42_spill] sm:$0xff] %v5858_v2  ;;  %v5864_v27 = vpop.f32.mrf.mxu1  ;;  %v1413_v2 = vmul.f32 1.442695, %v5169_v11  ;;  %4103 = vpow2.f32 %v1095_v5  ;;  %v1724_v11 = vld [vmem:[%s6869_s2 + $0x4e8] sm:$0xff]  ;;  %v1115_v5 = vmul.f32 1.442695, %v7082_v37 }
 0x285   :  { %v5856_v6 = vadd.f32 %v1848_v44, %v1759_v53  ;;  %7077 = vst [vmem:[#allocation13_spill] sm:$0xff] %v5864_v27  ;;  %v1677_v53 = vld [vmem:[%s6869_s2 + $0x370] sm:$0xff]  ;;  %v7079_v44 = vld [vmem:[#allocation26_spill] sm:$0xff]  ;;  %2530 = vmatpush.msrb.mxu3 %v1724_v11 }
 0x286   :  { %1898 = vmatmul.f32.gmra.mxu3 %v4090_v23  ;;  %1963 = vmatmul.f32.gmra.mxu0 %v4092_v43  ;;  %v1097_v16 = vmul.f32 1.442695, %v7079_v44  ;;  %v4096_v21 = vpop.eup %4095  ;;  %v1411_v43 = vmul.f32 1.442695, %v5171_v20  ;;  %v1708_v20 = vld [vmem:[%s6869_s2 + $0x468] sm:$0xff]  ;;  %v7083_v44 = vld [vmem:[#allocation30_spill] sm:$0xff] }
 0x287   :  { %2052 = vmatmul.f32.gmra.mxu1 %v4094_v8  ;;  %2262 = vmatpush.msra.mxu0 %v1677_v53  ;;  %v4098_v8 = vpop.eup %4097 }
 0x288   :  { %v4100_v53 = vpop.eup %4099  ;;  %4105 = vpow2.f32 %v1097_v16  ;;  %2441 = vmatpush.msrb.mxu2 %v1708_v20  ;;  %v1117_v16 = vmul.f32 1.442695, %v7083_v44  ;;  %v7084_v20 = vld [vmem:[#allocation60_spill] sm:$0xff] }
 0x289   :  { %1809 = vmatmul.f32.gmra.mxu2 %v4088_v28  ;;  %v1851_v10 = vpop.f32.mrf.mxu3  ;;  %v4102_v25 = vpop.eup %4101  ;;  %4107 = vpow2.f32 %v1411_v43  ;;  %2263 = vmatpush.msra.mxu0 %v1676_v14  ;;  %v1431_v43 = vmul.f32 1.442695, %v5179_v30  ;;  %v1433_v14 = vmul.f32 1.442695, %v7084_v20  ;;  %v7085_v30 = vld [vmem:[#allocation33_spill] sm:$0xff] }
 0x28a   :  { %4109 = vpow2.f32 %v1413_v2  ;;  %v1692_v2 = vld [vmem:[%s6869_s2 + $0x3e8] sm:$0xff] }
 0x28b   :  { %v5880_v28 = vpop.f32.mrf.mxu0  ;;  %2352 = vmatpush.msra.mxu1 %v1692_v2  ;;  %4111 = vpow2.f32 %v1115_v5  ;;  %2264 = vmatpush.msra.mxu0 %v1675_v26  ;;  %v7092_v26 = vld [vmem:[#allocation68_spill] sm:$0xff] }
 0x28c   :  { %v1762_v23 = vpop.f32.mrf.mxu2  ;;  %7080 = vst [vmem:[#allocation14_spill] sm:$0xff] %v5880_v28  ;;  %v5883_v35 = vpop.f32.mrf.mxu1  ;;  %4113 = vpow2.f32 %v1117_v16  ;;  %v7086_v28 = vld [vmem:[#allocation34_spill] sm:$0xff] }
 0x28d   :  { %v5878_v9 = vadd.f32 %v1851_v10, %v1762_v23  ;;  %7081 = vst [vmem:[#allocation47_spill] sm:$0xff] %v5883_v35  ;;  %4115 = vpow2.f32 %v1431_v43  ;;  %v1137_v35 = vmul.f32 1.442695, %v7086_v28  ;;  %v1707_v16 = vld [vmem:[%s6869_s2 + $0x460] sm:$0xff] }
 0x28e   :  { %1901 = vmatmul.f32.gmra.mxu3 %v4098_v8  ;;  %1966 = vmatmul.f32.gmra.mxu0 %v4100_v53  ;;  %4117 = vpow2.f32 %v1433_v14  ;;  %v1723_v28 = vld [vmem:[%s6869_s2 + $0x4e0] sm:$0xff] }
 0x28f   :  { %2055 = vmatmul.f32.gmra.mxu1 %v4102_v25  ;;  %2442 = vmatpush.msrb.mxu2 %v1707_v16 }
 0x290   :  { %2531 = vmatpush.msrb.mxu3 %v1723_v28 }
 0x291   :  { %1812 = vmatmul.f32.gmra.mxu2 %v4096_v21  ;;  %v1854_v10 = vpop.f32.mrf.mxu3  ;;  %v4104_v21 = vpop.eup %4103 }
 0x292   :  { %v4106_v25 = vpop.eup %4105 }
 0x293   :  { %v5899_v53 = vpop.f32.mrf.mxu0  ;;  %v4108_v11 = vpop.eup %4107 }
 0x294   :  { %v1765_v23 = vpop.f32.mrf.mxu2  ;;  %v5905_v37 = vpop.f32.mrf.mxu1 }
 0x295   :  { %v5897_v8 = vadd.f32 %v1854_v10, %v1765_v23  ;;  %v4110_v44 = vpop.eup %4109  ;;  %v1135_v10 = vmul.f32 1.442695, %v7085_v30  ;;  %v1674_v30 = vld [vmem:[%s6869_s2 + $0x358] sm:$0xff] }
 0x296   :  { %1969 = vmatmul.f32.gmra.mxu0 %v4108_v11  ;;  %2188 = vmatmul.f32.vlgmr.msra.gmra.mxu3 %v4106_v25  ;;  %v4112_v20 = vpop.eup %4111 }
 0x297   :  { %2058 = vmatmul.f32.gmra.mxu1 %v4110_v44  ;;  %v4114_v43 = vpop.eup %4113  ;;  %4119 = vpow2.f32 %v1135_v10  ;;  %v1691_v44 = vld [vmem:[%s6869_s2 + $0x3e0] sm:$0xff]  ;;  %v7090_v10 = vld [vmem:[#allocation37_spill] sm:$0xff]  ;;  %2265 = vmatpush.msra.mxu0 %v1674_v30  ;;  %v1672_v30 = vld [vmem:[%s6869_s2 + $0x348] sm:$0xff] }
 0x298   :  { %v4116_v11 = vpop.eup %4115  ;;  %4121 = vpow2.f32 %v1137_v35  ;;  %v1690_v35 = vld [vmem:[%s6869_s2 + $0x3d8] sm:$0xff]  ;;  %2353 = vmatpush.msra.mxu1 %v1691_v44 }
 0x299   :  { %2099 = vmatmul.f32.vlgmr.msra.gmra.mxu2 %v4104_v21  ;;  %v1857_v23 = vpop.f32.mrf.mxu3  ;;  %v7089_v21 = vld [vmem:[#allocation63_spill] sm:$0xff]  ;;  %4123 = vpow2.f32 %v1451_v7  ;;  %v1673_v7 = vld [vmem:[%s6869_s2 + $0x350] sm:$0xff] }
 0x29a   :  { %v1453_v25 = vmul.f32 1.442695, %v7089_v21  ;;  %2354 = vmatpush.msra.mxu1 %v1690_v35  ;;  %2266 = vmatpush.msra.mxu0 %v1673_v7  ;;  %v1687_v35 = vld [vmem:[%s6869_s2 + $0x3c0] sm:$0xff]  ;;  %v1722_v7 = vld [vmem:[%s6869_s2 + $0x4d8] sm:$0xff] }
 0x29b   :  { %v5912_v5 = vpop.f32.mrf.mxu0  ;;  %2532 = vmatpush.msrb.mxu3 %v1722_v7 }
 0x29c   :  { %v1768_v27 = vpop.f32.mrf.mxu2  ;;  %v5918_v14 = vpop.f32.mrf.mxu1  ;;  %4125 = vpow2.f32 %v1453_v25  ;;  %v1689_v25 = vld [vmem:[%s6869_s2 + $0x3d0] sm:$0xff]  ;;  %2267 = vmatpush.msra.mxu0 %v1672_v30 }
 0x29d   :  { %v5910_v2 = vadd.f32 %v1857_v23, %v1768_v27  ;;  %v4118_v27 = vpop.eup %4117  ;;  %v1155_v23 = vmul.f32 1.442695, %v7090_v10  ;;  %2355 = vmatpush.msra.mxu1 %v1689_v25 }
 0x29e   :  { %1972 = vmatmul.f32.gmra.mxu0 %v4116_v11  ;;  %2191 = vmatmul.f32.gmra.mxu3 %v4114_v43  ;;  %v4120_v11 = vpop.eup %4119 }
 0x29f   :  { %7088 = vst [vmem:[#allocation46_spill] sm:$0xff] %v5910_v2  ;;  %2061 = vmatmul.f32.gmra.mxu1 %v4118_v27  ;;  %v1471_v27 = vmul.f32 1.442695, %v7092_v26  ;;  %v4122_v44 = vpop.eup %4121  ;;  %4127 = vpow2.f32 %v1155_v23  ;;  %v1706_v23 = vld [vmem:[%s6869_s2 + $0x458] sm:$0xff]  ;;  %2268 = vmatpush.msra.mxu0 %v1671_v58  ;;  %v1669_v58 = vld [vmem:[%s6869_s2 + $0x330] sm:$0xff] }
 0x2a0   :  { %2443 = vmatpush.msrb.mxu2 %v1706_v23  ;;  %v1670_v26 = vld [vmem:[%s6869_s2 + $0x338] sm:$0xff] }
 0x2a1   :  { %2102 = vmatmul.f32.gmra.mxu2 %v4112_v20  ;;  %v1860_v16 = vpop.f32.mrf.mxu3  ;;  %v7091_v20 = vld [vmem:[#allocation38_spill] sm:$0xff]  ;;  %2269 = vmatpush.msra.mxu0 %v1670_v26  ;;  %v7100_v26 = vld [vmem:[#allocation44_spill] sm:$0xff] }
 0x2a2   :  { %v1157_v43 = vmul.f32 1.442695, %v7091_v20  ;;  %v4124_v20 = vpop.eup %4123 }
 0x2a3   :  { %v5946_v10 = vpop.f32.mrf.mxu0  ;;  %2270 = vmatpush.msra.mxu0 %v1669_v58 }
 0x2a4   :  { %v1771_v21 = vpop.f32.mrf.mxu2  ;;  %v5949_v60 = vpop.f32.mrf.mxu1  ;;  %4129 = vpow2.f32 %v1157_v43  ;;  %v7095_v43 = vld [vmem:[#allocation40_spill] sm:$0xff] }
 0x2a5   :  { %v5944_v28 = vadd.f32 %v1860_v16, %v1771_v21  ;;  %v1688_v16 = vld [vmem:[%s6869_s2 + $0x3c8] sm:$0xff]  ;;  %v4126_v21 = vpop.eup %4125  ;;  %4131 = vpow2.f32 %v1471_v27  ;;  %v1175_v25 = vmul.f32 1.442695, %v7095_v43  ;;  %v1686_v27 = vld [vmem:[%s6869_s2 + $0x3b8] sm:$0xff] }
 0x2a6   :  { %1975 = vmatmul.f32.gmra.mxu0 %v4124_v20  ;;  %2194 = vmatmul.f32.gmra.mxu3 %v4122_v44  ;;  %4133 = vpow2.f32 %v1473_v19  ;;  %v7096_v19 = vld [vmem:[#allocation41_spill] sm:$0xff]  ;;  %v4128_v30 = vpop.eup %4127 }
 0x2a7   :  { %7093 = vst [vmem:[#allocation15_spill] sm:$0xff] %v5944_v28  ;;  %2064 = vmatmul.f32.gmra.mxu1 %v4126_v21  ;;  %v1177_v44 = vmul.f32 1.442695, %v7096_v19  ;;  %v1493_v28 = vmul.f32 1.442695, %v7099_v48  ;;  %4135 = vpow2.f32 %v1175_v25  ;;  %v1668_v48 = vld [vmem:[%s6869_s2 + $0x328] sm:$0xff] }
 0x2a8   :  { %2356 = vmatpush.msra.mxu1 %v1688_v16  ;;  %v7097_v16 = vld [vmem:[#allocation72_spill] sm:$0xff]  ;;  %2271 = vmatpush.msra.mxu0 %v1668_v48 }
 0x2a9   :  { %2105 = vmatmul.f32.gmra.mxu2 %v4120_v11  ;;  %v1863_v11 = vpop.f32.mrf.mxu3  ;;  %v1491_v21 = vmul.f32 1.442695, %v7097_v16  ;;  %4137 = vpow2.f32 %v1177_v44  ;;  %v1684_v25 = vld [vmem:[%s6869_s2 + $0x3a8] sm:$0xff]  ;;  %v1683_v44 = vld [vmem:[%s6869_s2 + $0x3a0] sm:$0xff] }
 0x2aa   :  { %2357 = vmatpush.msra.mxu1 %v1687_v35  ;;  %v4130_v17 = vpop.eup %4129  ;;  %v1685_v35 = vld [vmem:[%s6869_s2 + $0x3b0] sm:$0xff] }
 0x2ab   :  { %v5980_v23 = vpop.f32.mrf.mxu0  ;;  %v4132_v7 = vpop.eup %4131  ;;  %4139 = vpow2.f32 %v1491_v21 }
 0x2ac   :  { %v1774_v20 = vpop.f32.mrf.mxu2  ;;  %v5983_v15 = vpop.f32.mrf.mxu1  ;;  %2358 = vmatpush.msra.mxu1 %v1686_v27  ;;  %4141 = vpow2.f32 %v1493_v28  ;;  %v1195_v27 = vmul.f32 1.442695, %v7100_v26  ;;  %v7102_v28 = vld [vmem:[#allocation76_spill] sm:$0xff] }
 0x2ad   :  { %v5978_v43 = vadd.f32 %v1863_v11, %v1774_v20  ;;  %v4134_v11 = vpop.eup %4133  ;;  %v7101_v20 = vld [vmem:[#allocation45_spill] sm:$0xff] }
 0x2ae   :  { %1978 = vmatmul.f32.gmra.mxu0 %v4132_v7  ;;  %2197 = vmatmul.f32.gmra.mxu3 %v4130_v17  ;;  %v1667_v17 = vld [vmem:[%s6869_s2 + $0x320] sm:$0xff]  ;;  %v4136_v21 = vpop.eup %4135  ;;  %v1511_v7 = vmul.f32 1.442695, %v7102_v28  ;;  %4143 = vpow2.f32 %v1195_v27  ;;  %v1665_v27 = vld [vmem:[%s6869_s2 + $0x310] sm:$0xff]  ;;  %v1664_v28 = vld [vmem:[%s6869_s2 + $0x308] sm:$0xff] }
 0x2af   :  { %7098 = vst [vmem:[#allocation16_spill] sm:$0xff] %v5978_v43  ;;  %2067 = vmatmul.f32.gmra.mxu1 %v4134_v11  ;;  %v1705_v11 = vld [vmem:[%s6869_s2 + $0x450] sm:$0xff]  ;;  %v4138_v26 = vpop.eup %4137  ;;  %v7104_v43 = vld [vmem:[#allocation75_spill] sm:$0xff]  ;;  %2272 = vmatpush.msra.mxu0 %v1667_v17 }
 0x2b0   :  { %2359 = vmatpush.msra.mxu1 %v1685_v35  ;;  %v1513_v32 = vmul.f32 1.442695, %v7104_v43  ;;  %2444 = vmatpush.msrb.mxu2 %v1705_v11  ;;  %v1721_v43 = vld [vmem:[%s6869_s2 + $0x4d0] sm:$0xff] }
 0x2b1   :  { %2108 = vmatmul.f32.gmra.mxu2 %v4128_v30  ;;  %v1866_v19 = vpop.f32.mrf.mxu3  ;;  %v1197_v30 = vmul.f32 1.442695, %v7101_v20  ;;  %v4140_v48 = vpop.eup %4139  ;;  %v1681_v17 = vld [vmem:[%s6869_s2 + $0x390] sm:$0xff]  ;;  %2533 = vmatpush.msrb.mxu3 %v1721_v43 }
 0x2b2   :  { %2360 = vmatpush.msra.mxu1 %v1684_v25  ;;  %v1666_v25 = vld [vmem:[%s6869_s2 + $0x318] sm:$0xff]  ;;  %v4142_v20 = vpop.eup %4141 }
 0x2b3   :  { %v6008_v35 = vpop.f32.mrf.mxu0  ;;  %4145 = vpow2.f32 %v1197_v30  ;;  %2273 = vmatpush.msra.mxu0 %v1666_v25 }
 0x2b4   :  { %v1777_v16 = vpop.f32.mrf.mxu2  ;;  %v6014_v2 = vpop.f32.mrf.mxu1  ;;  %2361 = vmatpush.msra.mxu1 %v1683_v44  ;;  %4147 = vpow2.f32 %v1511_v7  ;;  %v7105_v44 = vld [vmem:[#allocation48_spill] sm:$0xff]  ;;  %v7106_v7 = vld [vmem:[#allocation49_spill] sm:$0xff] }
 0x2b5   :  { %v6006_v58 = vadd.f32 %v1866_v19, %v1777_v16  ;;  %v1682_v19 = vld [vmem:[%s6869_s2 + $0x398] sm:$0xff]  ;;  %4149 = vpow2.f32 %v1513_v32  ;;  %v1215_v30 = vmul.f32 1.442695, %v7105_v44  ;;  %v1217_v11 = vmul.f32 1.442695, %v7106_v7  ;;  %2274 = vmatpush.msra.mxu0 %v1665_v27  ;;  %v4144_v32 = vpop.eup %4143  ;;  %v1663_v27 = vld [vmem:[%s6869_s2 + $0x300] sm:$0xff] }
 0x2b6   :  { %1981 = vmatmul.f32.gmra.mxu0 %v4140_v48  ;;  %2200 = vmatmul.f32.gmra.mxu3 %v4138_v26  ;;  %v1531_v48 = vmul.f32 1.442695, %v5267_v52  ;;  %v1533_v44 = vmul.f32 1.442695, %v5265_v46  ;;  %v1679_v52 = vld [vmem:[%s6869_s2 + $0x380] sm:$0xff]  ;;  %v1704_v46 = vld [vmem:[%s6869_s2 + $0x448] sm:$0xff] }
 0x2b7   :  { %7103 = vst [vmem:[#allocation51_spill] sm:$0xff] %v6006_v58  ;;  %2070 = vmatmul.f32.gmra.mxu1 %v4142_v20  ;;  %2275 = vmatpush.msra.mxu0 %v1664_v28  ;;  %4151 = vpow2.f32 %v1215_v30  ;;  %v1720_v30 = vld [vmem:[%s6869_s2 + $0x4c8] sm:$0xff]  ;;  %v7109_v7 = vld [vmem:[#allocation53_spill] sm:$0xff] }
 0x2b8   :  { %2362 = vmatpush.msra.mxu1 %v1682_v19  ;;  %4153 = vpow2.f32 %v1217_v11  ;;  %2445 = vmatpush.msrb.mxu2 %v1704_v46  ;;  %v1237_v11 = vmul.f32 1.442695, %v7109_v7 }
 0x2b9   :  { %2111 = vmatmul.f32.gmra.mxu2 %v4136_v21  ;;  %v1869_v16 = vpop.f32.mrf.mxu3  ;;  %v1680_v21 = vld [vmem:[%s6869_s2 + $0x388] sm:$0xff]  ;;  %v4146_v20 = vpop.eup %4145  ;;  %4155 = vpow2.f32 %v1531_v48  ;;  %2276 = vmatpush.msra.mxu0 %v1663_v27  ;;  %v1551_v48 = vmul.f32 1.442695, %v5275_v63 }
 0x2ba   :  { %2363 = vmatpush.msra.mxu1 %v1681_v17  ;;  %v4148_v43 = vpop.eup %4147  ;;  %4157 = vpow2.f32 %v1533_v44  ;;  %2534 = vmatpush.msrb.mxu3 %v1720_v30  ;;  %v1553_v44 = vmul.f32 1.442695, %v5273_v45  ;;  %v7111_v63 = vld [vmem:[#allocation56_spill] sm:$0xff] }
 0x2bb   :  { %v6042_v19 = vpop.f32.mrf.mxu0  ;;  %v4150_v17 = vpop.eup %4149  ;;  %v1255_v46 = vmul.f32 1.442695, %v7111_v63  ;;  %v7113_v45 = vld [vmem:[#allocation84_spill] sm:$0xff]  ;;  %v1719_v63 = vld [vmem:[%s6869_s2 + $0x4c0] sm:$0xff] }
 0x2bc   :  { %v1780_v26 = vpop.f32.mrf.mxu2  ;;  %v6045_v58 = vpop.f32.mrf.mxu1  ;;  %2364 = vmatpush.msra.mxu1 %v1680_v21  ;;  %2535 = vmatpush.msrb.mxu3 %v1719_v63  ;;  %v1718_v63 = vld [vmem:[%s6869_s2 + $0x4b8] sm:$0xff] }
 0x2bd   :  { %v6040_v25 = vadd.f32 %v1869_v16, %v1780_v26  ;;  %v7108_v16 = vld [vmem:[#allocation52_spill] sm:$0xff] }
 0x2be   :  { %1984 = vmatmul.f32.gmra.mxu0 %v4148_v43  ;;  %2203 = vmatmul.f32.gmra.mxu3 %v4146_v20  ;;  %v1235_v28 = vmul.f32 1.442695, %v7108_v16 }
 0x2bf   :  { %7107 = vst [vmem:[#allocation50_spill] sm:$0xff] %v6040_v25  ;;  %2073 = vmatmul.f32.gmra.mxu1 %v4150_v17  ;;  %v1099_v25 = vmul.f32 1.442695, %v7113_v45  ;;  %v7117_v45 = vld [vmem:[#allocation59_spill] sm:$0xff]  ;;  %2536 = vmatpush.msrb.mxu3 %v1718_v63  ;;  %v7128_v63 = vld [vmem:[#allocation65_spill] sm:$0xff] }
 0x2c0   :  { %2365 = vmatpush.msra.mxu1 %v1679_v52  ;;  %4159 = vpow2.f32 %v1235_v28 }
 0x2c1   :  { %2114 = vmatmul.f32.gmra.mxu2 %v4144_v32  ;;  %v1872_v21 = vpop.f32.mrf.mxu3  ;;  %v4152_v32 = vpop.eup %4151  ;;  %4161 = vpow2.f32 %v1237_v11  ;;  %v1703_v11 = vld [vmem:[%s6869_s2 + $0x440] sm:$0xff] }
 0x2c2   :  { %v4154_v17 = vpop.eup %4153  ;;  %4163 = vpow2.f32 %v1551_v48  ;;  %2446 = vmatpush.msrb.mxu2 %v1703_v11  ;;  %v1277_v11 = vmul.f32 1.442695, %v7117_v45 }
 0x2c3   :  { %v6064_v43 = vpop.f32.mrf.mxu0  ;;  %v4156_v52 = vpop.eup %4155  ;;  %4165 = vpow2.f32 %v1553_v44 }
 0x2c4   :  { %v1783_v26 = vpop.f32.mrf.mxu2  ;;  %v6067_v27 = vpop.f32.mrf.mxu1  ;;  %4167 = vpow2.f32 %v1255_v46 }
 0x2c5   :  { %v6062_v20 = vadd.f32 %v1872_v21, %v1783_v26  ;;  %v4158_v16 = vpop.eup %4157  ;;  %v7112_v21 = vld [vmem:[#allocation57_spill] sm:$0xff] }
 0x2c6   :  { %1987 = vmatmul.f32.gmra.mxu0 %v4156_v52  ;;  %2206 = vmatmul.f32.gmra.mxu3 %v4154_v17  ;;  %v1257_v7 = vmul.f32 1.442695, %v7112_v21 }
 0x2c7   :  { %7110 = vst [vmem:[#allocation17_spill] sm:$0xff] %v6062_v20  ;;  %2076 = vmatmul.f32.gmra.mxu1 %v4158_v16  ;;  %v4160_v20 = vpop.eup %4159 }
 0x2c8   :  { %v4162_v48 = vpop.eup %4161  ;;  %4169 = vpow2.f32 %v1257_v7  ;;  %v1119_v7 = vmul.f32 1.442695, %v5311_v18  ;;  %v1702_v18 = vld [vmem:[%s6869_s2 + $0x438] sm:$0xff] }
 0x2c9   :  { %2117 = vmatmul.f32.gmra.mxu2 %v4152_v32  ;;  %v1875_v30 = vpop.f32.mrf.mxu3  ;;  %v7115_v32 = vld [vmem:[#allocation83_spill] sm:$0xff]  ;;  %v4164_v52 = vpop.eup %4163  ;;  %4171 = vpow2.f32 %v1099_v25  ;;  %v1121_v25 = vmul.f32 1.442695, %v5309_v3  ;;  %v7121_v3 = vld [vmem:[#allocation61_spill] sm:$0xff] }
 0x2ca   :  { %v1101_v17 = vmul.f32 1.442695, %v7115_v32  ;;  %v4166_v16 = vpop.eup %4165  ;;  %2447 = vmatpush.msrb.mxu2 %v1702_v18 }
 0x2cb   :  { %v6074_v28 = vpop.f32.mrf.mxu0  ;;  %v4168_v46 = vpop.eup %4167 }
 0x2cc   :  { %v1786_v26 = vpop.f32.mrf.mxu2  ;;  %v6080_v44 = vpop.f32.mrf.mxu1  ;;  %4173 = vpow2.f32 %v1101_v17 }
 0x2cd   :  { %v6072_v41 = vadd.f32 %v1875_v30, %v1786_v26  ;;  %v7116_v30 = vld [vmem:[#allocation58_spill] sm:$0xff] }
 0x2ce   :  { %1990 = vmatmul.f32.gmra.mxu0 %v4164_v52  ;;  %2209 = vmatmul.f32.gmra.mxu3 %v4162_v48  ;;  %v1275_v21 = vmul.f32 1.442695, %v7116_v30  ;;  %v1295_v30 = vmul.f32 1.442695, %v7121_v3  ;;  %v1315_v3 = vmul.f32 1.442695, %v7128_v63 }
 0x2cf   :  { %7114 = vst [vmem:[#allocation18_spill] sm:$0xff] %v6072_v41  ;;  %2079 = vmatmul.f32.gmra.mxu1 %v4166_v16  ;;  %v4170_v41 = vpop.eup %4169  ;;  %v1717_v63 = vld [vmem:[%s6869_s2 + $0x4b0] sm:$0xff] }
 0x2d0   :  { %4175 = vpow2.f32 %v1275_v21  ;;  %2537 = vmatpush.msrb.mxu3 %v1717_v63  ;;  %v1716_v63 = vld [vmem:[%s6869_s2 + $0x4a8] sm:$0xff] }
 0x2d1   :  { %2120 = vmatmul.f32.gmra.mxu2 %v4160_v20  ;;  %v1878_v26 = vpop.f32.mrf.mxu3  ;;  %v4172_v20 = vpop.eup %4171  ;;  %4177 = vpow2.f32 %v1277_v11 }
 0x2d2   :  { %v4174_v17 = vpop.eup %4173  ;;  %4179 = vpow2.f32 %v1119_v7  ;;  %2538 = vmatpush.msrb.mxu3 %v1716_v63  ;;  %v7144_v63 = vld [vmem:[#allocation77_spill] sm:$0xff] }
 0x2d3   :  { %v6090_v48 = vpop.f32.mrf.mxu0  ;;  %4181 = vpow2.f32 %v1121_v25 }
 0x2d4   :  { %v1789_v32 = vpop.f32.mrf.mxu2  ;;  %7119 = vst [vmem:[#allocation54_spill] sm:$0xff] %v6090_v48  ;;  %v6093_v16 = vpop.f32.mrf.mxu1  ;;  %4183 = vpow2.f32 %v1295_v30 }
 0x2d5   :  { %v6088_v52 = vadd.f32 %v1878_v26, %v1789_v32  ;;  %7120 = vst [vmem:[#allocation25_spill] sm:$0xff] %v6093_v16  ;;  %v7122_v26 = vld [vmem:[#allocation62_spill] sm:$0xff] }
 0x2d6   :  { %2212 = vmatmul.f32.gmra.mxu3 %v4170_v41  ;;  %2277 = vmatmul.f32.vlgmr.msra.gmra.mxu0 %v4172_v20  ;;  %v1297_v41 = vmul.f32 1.442695, %v7122_v26  ;;  %v4176_v11 = vpop.eup %4175  ;;  %v7123_v32 = vld [vmem:[#allocation90_spill] sm:$0xff] }
 0x2d7   :  { %7118 = vst [vmem:[#allocation55_spill] sm:$0xff] %v6088_v52  ;;  %2366 = vmatmul.f32.vlgmr.msra.gmra.mxu1 %v4174_v17  ;;  %v4178_v17 = vpop.eup %4177  ;;  %v7126_v52 = vld [vmem:[#allocation89_spill] sm:$0xff]  ;;  %v7129_v26 = vld [vmem:[#allocation66_spill] sm:$0xff] }
 0x2d8   :  { %v1141_v16 = vmul.f32 1.442695, %v7126_v52  ;;  %v4180_v25 = vpop.eup %4179  ;;  %4185 = vpow2.f32 %v1297_v41  ;;  %v7130_v52 = vld [vmem:[#allocation94_spill] sm:$0xff]  ;;  %v1701_v41 = vld [vmem:[%s6869_s2 + $0x430] sm:$0xff] }
 0x2d9   :  { %2123 = vmatmul.f32.gmra.mxu2 %v4168_v46  ;;  %v1881_v21 = vpop.f32.mrf.mxu3  ;;  %v1139_v46 = vmul.f32 1.442695, %v7123_v32  ;;  %v4182_v18 = vpop.eup %4181 }
 0x2da   :  { %2448 = vmatpush.msrb.mxu2 %v1701_v41 }
 0x2db   :  { %v6106_v20 = vpop.f32.mrf.mxu0  ;;  %4187 = vpow2.f32 %v1139_v46  ;;  %v7132_v46 = vld [vmem:[#allocation93_spill] sm:$0xff] }
 0x2dc   :  { %v1792_v45 = vpop.f32.mrf.mxu2  ;;  %7125 = vst [vmem:[#allocation29_spill] sm:$0xff] %v6106_v20  ;;  %v6109_v48 = vpop.f32.mrf.mxu1  ;;  %4189 = vpow2.f32 %v1141_v16  ;;  %v1159_v20 = vmul.f32 1.442695, %v7130_v52  ;;  %v1161_v16 = vmul.f32 1.442695, %v7132_v46  ;;  %v7134_v52 = vld [vmem:[#allocation70_spill] sm:$0xff] }
 0x2dd   :  { %v6104_v7 = vadd.f32 %v1881_v21, %v1792_v45  ;;  %7127 = vst [vmem:[#allocation30_spill] sm:$0xff] %v6109_v48  ;;  %v1317_v45 = vmul.f32 1.442695, %v7129_v26  ;;  %4191 = vpow2.f32 %v1315_v3  ;;  %v1337_v41 = vmul.f32 1.442695, %v7134_v52 }
 0x2de   :  { %2215 = vmatmul.f32.gmra.mxu3 %v4178_v17  ;;  %2280 = vmatmul.f32.gmra.mxu0 %v4180_v25 }
 0x2df   :  { %7124 = vst [vmem:[#allocation26_spill] sm:$0xff] %v6104_v7  ;;  %2369 = vmatmul.f32.gmra.mxu1 %v4182_v18  ;;  %v4184_v7 = vpop.eup %4183  ;;  %4193 = vpow2.f32 %v1317_v45  ;;  %v1179_v45 = vmul.f32 1.442695, %v5366_v55  ;;  %v1700_v55 = vld [vmem:[%s6869_s2 + $0x428] sm:$0xff] }
 0x2e0   :  { %4195 = vpow2.f32 %v1159_v20  ;;  %v1181_v20 = vmul.f32 1.442695, %v5364_v31  ;;  %2449 = vmatpush.msrb.mxu2 %v1700_v55  ;;  %v7138_v31 = vld [vmem:[#allocation73_spill] sm:$0xff] }
 0x2e1   :  { %2126 = vmatmul.f32.gmra.mxu2 %v4176_v11  ;;  %v1884_v21 = vpop.f32.mrf.mxu3  ;;  %v4186_v11 = vpop.eup %4185  ;;  %4197 = vpow2.f32 %v1161_v16 }
 0x2e2   :  { %v4188_v25 = vpop.eup %4187 }
 0x2e3   :  { %v6116_v30 = vpop.f32.mrf.mxu0  ;;  %v4190_v18 = vpop.eup %4189 }
 0x2e4   :  { %v1795_v32 = vpop.f32.mrf.mxu2  ;;  %v6122_v17 = vpop.f32.mrf.mxu1 }
 0x2e5   :  { %v6114_v48 = vadd.f32 %v1884_v21, %v1795_v32  ;;  %v7133_v21 = vld [vmem:[#allocation69_spill] sm:$0xff]  ;;  %v4192_v3 = vpop.eup %4191 }
 0x2e6   :  { %2218 = vmatmul.f32.gmra.mxu3 %v4186_v11  ;;  %2283 = vmatmul.f32.gmra.mxu0 %v4188_v25  ;;  %v1335_v26 = vmul.f32 1.442695, %v7133_v21  ;;  %v1355_v21 = vmul.f32 1.442695, %v7138_v31  ;;  %v1375_v31 = vmul.f32 1.442695, %v7144_v63 }
 0x2e7   :  { %7131 = vst [vmem:[#allocation60_spill] sm:$0xff] %v6114_v48  ;;  %2372 = vmatmul.f32.gmra.mxu1 %v4190_v18  ;;  %v4194_v48 = vpop.eup %4193  ;;  %v7150_v63 = vld [vmem:[#allocation79_spill] sm:$0xff] }
 0x2e8   :  { %v4196_v16 = vpop.eup %4195  ;;  %4199 = vpow2.f32 %v1335_v26 }
 0x2e9   :  { %2129 = vmatmul.f32.gmra.mxu2 %v4184_v7  ;;  %v1887_v32 = vpop.f32.mrf.mxu3  ;;  %v4198_v18 = vpop.eup %4197  ;;  %4201 = vpow2.f32 %v1337_v41 }
 0x2ea   :  { %4203 = vpow2.f32 %v1179_v45 }
 0x2eb   :  { %v6132_v25 = vpop.f32.mrf.mxu0  ;;  %4205 = vpow2.f32 %v1181_v20 }
 0x2ec   :  { %v1798_v46 = vpop.f32.mrf.mxu2  ;;  %7136 = vst [vmem:[#allocation34_spill] sm:$0xff] %v6132_v25  ;;  %v6135_v7 = vpop.f32.mrf.mxu1  ;;  %4207 = vpow2.f32 %v1355_v21 }
 0x2ed   :  { %v6130_v11 = vadd.f32 %v1887_v32, %v1798_v46  ;;  %7137 = vst [vmem:[#allocation64_spill] sm:$0xff] %v6135_v7  ;;  %v7139_v32 = vld [vmem:[#allocation74_spill] sm:$0xff]  ;;  %v7140_v46 = vld [vmem:[#allocation100_spill] sm:$0xff] }
 0x2ee   :  { %2221 = vmatmul.f32.gmra.mxu3 %v4194_v48  ;;  %2286 = vmatmul.f32.gmra.mxu0 %v4196_v16  ;;  %v1357_v48 = vmul.f32 1.442695, %v7139_v32  ;;  %v4200_v41 = vpop.eup %4199  ;;  %v7145_v32 = vld [vmem:[#allocation78_spill] sm:$0xff] }
 0x2ef   :  { %7135 = vst [vmem:[#allocation33_spill] sm:$0xff] %v6130_v11  ;;  %2375 = vmatmul.f32.gmra.mxu1 %v4198_v18  ;;  %v4202_v18 = vpop.eup %4201  ;;  %v7142_v11 = vld [vmem:[#allocation99_spill] sm:$0xff] }
 0x2f0   :  { %v1201_v7 = vmul.f32 1.442695, %v7142_v11  ;;  %v4204_v20 = vpop.eup %4203  ;;  %4209 = vpow2.f32 %v1357_v48  ;;  %v1219_v11 = vmul.f32 1.442695, %v5405_v0  ;;  %v1715_v0 = vld [vmem:[%s6869_s2 + $0x4a0] sm:$0xff] }
 0x2f1   :  { %2132 = vmatmul.f32.gmra.mxu2 %v4192_v3  ;;  %v1890_v26 = vpop.f32.mrf.mxu3  ;;  %v1199_v3 = vmul.f32 1.442695, %v7140_v46  ;;  %v4206_v55 = vpop.eup %4205  ;;  %2539 = vmatpush.msrb.mxu3 %v1715_v0  ;;  %v1698_v0 = vld [vmem:[%s6869_s2 + $0x418] sm:$0xff] }
 0x2f3   :  { %v6148_v16 = vpop.f32.mrf.mxu0  ;;  %4211 = vpow2.f32 %v1199_v3 }
 0x2f4   :  { %v1801_v52 = vpop.f32.mrf.mxu2  ;;  %v6151_v25 = vpop.f32.mrf.mxu1  ;;  %4213 = vpow2.f32 %v1201_v7  ;;  %v1699_v7 = vld [vmem:[%s6869_s2 + $0x420] sm:$0xff] }
 0x2f5   :  { %v6146_v45 = vadd.f32 %v1890_v26, %v1801_v52  ;;  %7143 = vst [vmem:[#allocation37_spill] sm:$0xff] %v6151_v25  ;;  %v1377_v52 = vmul.f32 1.442695, %v7145_v32  ;;  %4215 = vpow2.f32 %v1375_v31  ;;  %2450 = vmatpush.msrb.mxu2 %v1699_v7  ;;  %v1395_v31 = vmul.f32 1.442695, %v7150_v63  ;;  %v7151_v32 = vld [vmem:[#allocation80_spill] sm:$0xff] }
 0x2f6   :  { %2224 = vmatmul.f32.gmra.mxu3 %v4202_v18  ;;  %2289 = vmatmul.f32.gmra.mxu0 %v4204_v20  ;;  %v7148_v18 = vld [vmem:[#allocation103_spill] sm:$0xff]  ;;  %v1714_v63 = vld [vmem:[%s6869_s2 + $0x498] sm:$0xff] }
 0x2f7   :  { %7141 = vst [vmem:[#allocation63_spill] sm:$0xff] %v6146_v45  ;;  %2378 = vmatmul.f32.gmra.mxu1 %v4206_v55  ;;  %v4208_v45 = vpop.eup %4207  ;;  %v1221_v20 = vmul.f32 1.442695, %v7148_v18  ;;  %4217 = vpow2.f32 %v1377_v52  ;;  %v7152_v52 = vld [vmem:[#allocation107_spill] sm:$0xff]  ;;  %2451 = vmatpush.msrb.mxu2 %v1698_v0 }
 0x2f8   :  { %v4210_v48 = vpop.eup %4209  ;;  %4219 = vpow2.f32 %v1219_v11  ;;  %v7154_v11 = vld [vmem:[#allocation106_spill] sm:$0xff]  ;;  %2540 = vmatpush.msrb.mxu3 %v1714_v63 }
 0x2f9   :  { %2135 = vmatmul.f32.gmra.mxu2 %v4200_v41  ;;  %v1893_v26 = vpop.f32.mrf.mxu3  ;;  %v4212_v41 = vpop.eup %4211  ;;  %4221 = vpow2.f32 %v1221_v20 }
 0x2fa   :  { %v4214_v55 = vpop.eup %4213  ;;  %4223 = vpow2.f32 %v1395_v31 }
 0x2fb   :  { %v6158_v21 = vpop.f32.mrf.mxu0 }
 0x2fc   :  { %v1804_v46 = vpop.f32.mrf.mxu2  ;;  %7147 = vst [vmem:[#allocation68_spill] sm:$0xff] %v6158_v21  ;;  %v6161_v3 = vpop.f32.mrf.mxu1 }
 0x2fd   :  { %v6156_v25 = vadd.f32 %v1893_v26, %v1804_v46  ;;  %7149 = vst [vmem:[#allocation67_spill] sm:$0xff] %v6161_v3  ;;  %v1397_v46 = vmul.f32 1.442695, %v7151_v32 }
 0x2fe   :  { %2227 = vmatmul.f32.gmra.mxu3 %v4210_v48  ;;  %2292 = vmatmul.f32.gmra.mxu0 %v4212_v41  ;;  %v1239_v48 = vmul.f32 1.442695, %v7152_v52 }
 0x2ff   :  { %7146 = vst [vmem:[#allocation38_spill] sm:$0xff] %v6156_v25  ;;  %2381 = vmatmul.f32.gmra.mxu1 %v4214_v55  ;;  %v4216_v25 = vpop.eup %4215  ;;  %4225 = vpow2.f32 %v1397_v46  ;;  %v7156_v46 = vld [vmem:[#allocation82_spill] sm:$0xff] }
 0x300   :  { %v4218_v21 = vpop.eup %4217  ;;  %4227 = vpow2.f32 %v1239_v48 }
 0x301   :  { %2138 = vmatmul.f32.gmra.mxu2 %v4208_v45  ;;  %v1896_v26 = vpop.f32.mrf.mxu3  ;;  %v1241_v45 = vmul.f32 1.442695, %v7154_v11  ;;  %v4220_v20 = vpop.eup %4219 }
 0x302   :  { %v4222_v7 = vpop.eup %4221 }
 0x303   :  { %v6174_v3 = vpop.f32.mrf.mxu0  ;;  %4229 = vpow2.f32 %v1241_v45  ;;  %v4224_v52 = vpop.eup %4223 }
 0x304   :  { %v1807_v18 = vpop.f32.mrf.mxu2  ;;  %v6177_v55 = vpop.f32.mrf.mxu1 }
 0x305   :  { %v6172_v41 = vadd.f32 %v1896_v26, %v1807_v18  ;;  %v7155_v26 = vld [vmem:[#allocation81_spill] sm:$0xff] }
 0x306   :  { %2230 = vmatmul.f32.gmra.mxu3 %v4218_v21  ;;  %2295 = vmatmul.f32.gmra.mxu0 %v4220_v20  ;;  %v1415_v31 = vmul.f32 1.442695, %v7155_v26  ;;  %v1417_v21 = vmul.f32 1.442695, %v7156_v46  ;;  %v4226_v20 = vpop.eup %4225 }
 0x307   :  { %7153 = vst [vmem:[#allocation40_spill] sm:$0xff] %v6172_v41  ;;  %2384 = vmatmul.f32.gmra.mxu1 %v4222_v7  ;;  %v1261_v7 = vmul.f32 1.442695, %v5440_v50  ;;  %v4228_v45 = vpop.eup %4227  ;;  %v1279_v50 = vmul.f32 1.442695, %v5476_v49  ;;  %v1713_v49 = vld [vmem:[%s6869_s2 + $0x490] sm:$0xff] }
 0x308   :  { %4231 = vpow2.f32 %v1415_v31  ;;  %2541 = vmatpush.msrb.mxu3 %v1713_v49 }
 0x309   :  { %2141 = vmatmul.f32.gmra.mxu2 %v4216_v25  ;;  %v1899_v32 = vpop.f32.mrf.mxu3  ;;  %v1259_v25 = vmul.f32 1.442695, %v5442_v51  ;;  %v4230_v0 = vpop.eup %4229  ;;  %4233 = vpow2.f32 %v1417_v21  ;;  %v7159_v51 = vld [vmem:[#allocation85_spill] sm:$0xff] }
 0x30a   :  { %v1435_v63 = vmul.f32 1.442695, %v7159_v51 }
 0x30b   :  { %v6190_v11 = vpop.f32.mrf.mxu0  ;;  %4235 = vpow2.f32 %v1259_v25 }
 0x30c   :  { %v1810_v18 = vpop.f32.mrf.mxu2  ;;  %v6193_v41 = vpop.f32.mrf.mxu1  ;;  %4237 = vpow2.f32 %v1261_v7  ;;  %v1923_v7 = vadd.f32 %v5899_v53, %v5782_v59 }
 0x30d   :  { %v6188_v48 = vadd.f32 %v1899_v32, %v1810_v18  ;;  %7158 = vst [vmem:[#allocation72_spill] sm:$0xff] %v6193_v41  ;;  %v7160_v32 = vld [vmem:[#allocation86_spill] sm:$0xff]  ;;  %4239 = vpow2.f32 %v1435_v63  ;;  %v7162_v63 = vld [vmem:[#allocation88_spill] sm:$0xff] }
 0x30e   :  { %2233 = vmatmul.f32.gmra.mxu3 %v4226_v20  ;;  %2298 = vmatmul.f32.gmra.mxu0 %v4228_v45  ;;  %v1437_v46 = vmul.f32 1.442695, %v7160_v32  ;;  %v1281_v20 = vmul.f32 1.442695, %v5468_v38  ;;  %v1697_v45 = vld [vmem:[%s6869_s2 + $0x410] sm:$0xff]  ;;  %v7161_v38 = vld [vmem:[#allocation87_spill] sm:$0xff]  ;;  %v2012_v53 = vadd.f32 %v5905_v37, %v1923_v7  ;;  %v1926_v37 = vadd.f32 %v5912_v5, %v5798_v42 }
 0x30f   :  { %7157 = vst [vmem:[#allocation41_spill] sm:$0xff] %v6188_v48  ;;  %2387 = vmatmul.f32.gmra.mxu1 %v4230_v0  ;;  %v4232_v48 = vpop.eup %4231  ;;  %2452 = vmatpush.msrb.mxu2 %v1697_v45  ;;  %v1455_v59 = vmul.f32 1.442695, %v7161_v38  ;;  %v7163_v42 = vld [vmem:[#allocation91_spill] sm:$0xff] }
 0x310   :  { %v4234_v21 = vpop.eup %4233  ;;  %4241 = vpow2.f32 %v1437_v46  ;;  %v1475_v5 = vmul.f32 1.442695, %v7163_v42  ;;  %v2015_v49 = vadd.f32 %v5918_v14, %v1926_v37  ;;  %v1929_v14 = vadd.f32 %v5946_v10, %v5808_v22 }
 0x311   :  { %2144 = vmatmul.f32.gmra.mxu2 %v4224_v52  ;;  %v1902_v26 = vpop.f32.mrf.mxu3  ;;  %v4236_v52 = vpop.eup %4235  ;;  %4243 = vpow2.f32 %v1279_v50  ;;  %v1339_v22 = vmul.f32 1.442695, %v5588_v54 }
 0x312   :  { %v4238_v0 = vpop.eup %4237  ;;  %4245 = vpow2.f32 %v1281_v20 }
 0x313   :  { %v6200_v31 = vpop.f32.mrf.mxu0  ;;  %v4240_v46 = vpop.eup %4239  ;;  %4247 = vpow2.f32 %v1455_v59  ;;  %v7164_v59 = vld [vmem:[#allocation92_spill] sm:$0xff] }
 0x314   :  { %v1813_v18 = vpop.f32.mrf.mxu2  ;;  %v6203_v25 = vpop.f32.mrf.mxu1 }
 0x315   :  { %v6198_v41 = vadd.f32 %v1902_v26, %v1813_v18  ;;  %v1457_v26 = vmul.f32 1.442695, %v7162_v63  ;;  %v1299_v18 = vmul.f32 1.442695, %v5518_v56  ;;  %v1696_v56 = vld [vmem:[%s6869_s2 + $0x408] sm:$0xff] }
 0x316   :  { %2236 = vmatmul.f32.gmra.mxu3 %v4234_v21  ;;  %2301 = vmatmul.f32.gmra.mxu0 %v4236_v52  ;;  %v4242_v50 = vpop.eup %4241 }
 0x317   :  { %2390 = vmatmul.f32.gmra.mxu1 %v4238_v0  ;;  %v4244_v45 = vpop.eup %4243  ;;  %4249 = vpow2.f32 %v1457_v26  ;;  %2453 = vmatpush.msrb.mxu2 %v1696_v56  ;;  %v1319_v26 = vmul.f32 1.442695, %v5549_v24  ;;  %v7165_v24 = vld [vmem:[#allocation95_spill] sm:$0xff] }
 0x318   :  { %v4246_v0 = vpop.eup %4245  ;;  %4251 = vpow2.f32 %v1299_v18 }
 0x319   :  { %2147 = vmatmul.f32.gmra.mxu2 %v4232_v48  ;;  %v2189_v51 = vpop.f32.mrf.mxu3  ;;  %v1301_v48 = vmul.f32 1.442695, %v5510_v57  ;;  %v1712_v57 = vld [vmem:[%s6869_s2 + $0x488] sm:$0xff]  ;;  %v4248_v63 = vpop.eup %4247 }
 0x31a   :  { %2542 = vmatpush.msrb.mxu3 %v1712_v57  ;;  %v7166_v57 = vld [vmem:[#allocation96_spill] sm:$0xff] }
 0x31b   :  { %v6217_v52 = vpop.f32.mrf.mxu0  ;;  %4253 = vpow2.f32 %v1301_v48  ;;  %v1497_v42 = vmul.f32 1.442695, %v7166_v57 }
 0x31c   :  { %v2100_v32 = vpop.f32.mrf.mxu2  ;;  %v6220_v20 = vpop.f32.mrf.mxu1  ;;  %4255 = vpow2.f32 %v1475_v5 }
 0x31d   :  { %v2101_v21 = vadd.f32 %v2100_v32, %v2012_v53  ;;  %v1477_v53 = vmul.f32 1.442695, %v7164_v59  ;;  %v4250_v18 = vpop.eup %4249 }
 0x31e   :  { %2239 = vmatmul.f32.gmra.mxu3 %v4242_v50  ;;  %2304 = vmatmul.f32.gmra.mxu0 %v4244_v45  ;;  %v4252_v48 = vpop.eup %4251 }
 0x31f   :  { %v6224_v7 = vadd.f32 %v2189_v51, %v2101_v21  ;;  %2393 = vmatmul.f32.gmra.mxu1 %v4246_v0  ;;  %v1321_v21 = vmul.f32 1.442695, %v5544_v39  ;;  %4257 = vpow2.f32 %v1477_v53  ;;  %v1495_v0 = vmul.f32 1.442695, %v7165_v24 }
 0x320   :  { %4259 = vpow2.f32 %v1319_v26  ;;  %v2018_v39 = vadd.f32 %v5949_v60, %v1929_v14  ;;  %v1341_v53 = vmul.f32 1.442695, %v5583_v4  ;;  %v1932_v60 = vadd.f32 %v5980_v23, %v5824_v40  ;;  %v1711_v4 = vld [vmem:[%s6869_s2 + $0x480] sm:$0xff]  ;;  %v7167_v40 = vld [vmem:[#allocation97_spill] sm:$0xff] }
 0x321   :  { %2150 = vmatmul.f32.gmra.mxu2 %v4240_v46  ;;  %v2192_v38 = vpop.f32.mrf.mxu3  ;;  %v4254_v37 = vpop.eup %4253  ;;  %4261 = vpow2.f32 %v1321_v21  ;;  %2543 = vmatpush.msrb.mxu3 %v1711_v4  ;;  %v1515_v23 = vmul.f32 1.442695, %v7167_v40 }
 0x322   :  { %4263 = vpow2.f32 %v1495_v0  ;;  %v1359_v0 = vmul.f32 1.442695, %v5604_v47  ;;  %v7169_v47 = vld [vmem:[#allocation101_spill] sm:$0xff] }
 0x323   :  { %v6236_v46 = vpop.f32.mrf.mxu0  ;;  %4265 = vpow2.f32 %v1497_v42  ;;  %v1361_v42 = vmul.f32 1.442695, %v5602_v12 }
 0x324   :  { %v2103_v51 = vpop.f32.mrf.mxu2  ;;  %v6239_v50 = vpop.f32.mrf.mxu1  ;;  %4267 = vpow2.f32 %v1339_v22 }
 0x325   :  { %v2104_v32 = vadd.f32 %v2103_v51, %v2015_v49  ;;  %v4256_v49 = vpop.eup %4255  ;;  %4269 = vpow2.f32 %v1341_v53 }
 0x326   :  { %2242 = vmatmul.f32.gmra.mxu3 %v4250_v18  ;;  %2307 = vmatmul.f32.gmra.mxu0 %v4252_v48  ;;  %v4258_v59 = vpop.eup %4257  ;;  %v2021_v18 = vadd.f32 %v5983_v15, %v1932_v60  ;;  %v7168_v48 = vld [vmem:[#allocation98_spill] sm:$0xff]  ;;  %4271 = vpow2.f32 %v1515_v23  ;;  %v1935_v15 = vadd.f32 %v6008_v35, %v5843_v62  ;;  %v1379_v62 = vmul.f32 1.442695, %v5621_v13  ;;  %v7171_v13 = vld [vmem:[#allocation104_spill] sm:$0xff] }
 0x327   :  { %v6243_v45 = vadd.f32 %v2192_v38, %v2104_v32  ;;  %2396 = vmatmul.f32.gmra.mxu1 %v4254_v37  ;;  %v1695_v32 = vld [vmem:[%s6869_s2 + $0x400] sm:$0xff]  ;;  %v1517_v14 = vmul.f32 1.442695, %v7168_v48  ;;  %v1381_v23 = vmul.f32 1.442695, %v5618_v61 }
 0x328   :  { %2454 = vmatpush.msrb.mxu2 %v1695_v32  ;;  %v2024_v12 = vadd.f32 %v6014_v2, %v1935_v15  ;;  %v1938_v2 = vadd.f32 %v6042_v19, %v5856_v6  ;;  %v1399_v6 = vmul.f32 1.442695, %v5639_v1  ;;  %v7173_v1 = vld [vmem:[#allocation108_spill] sm:$0xff] }
 0x329   :  { %2153 = vmatmul.f32.gmra.mxu2 %v4248_v63  ;;  %v2195_v56 = vpop.f32.mrf.mxu3  ;;  %v4260_v63 = vpop.eup %4259  ;;  %4273 = vpow2.f32 %v1517_v14 }
 0x32a   :  { %v4262_v54 = vpop.eup %4261  ;;  %4275 = vpow2.f32 %v1359_v0  ;;  %v2027_v61 = vadd.f32 %v6045_v58, %v1938_v2  ;;  %v7172_v0 = vld [vmem:[#allocation105_spill] sm:$0xff]  ;;  %v1941_v58 = vadd.f32 %v6064_v43, %v5878_v9  ;;  %v1419_v9 = vmul.f32 1.442695, %v5657_v33  ;;  %v7175_v33 = vld [vmem:[#allocation110_spill] sm:$0xff] }
 0x32b   :  { %v6249_v38 = vpop.f32.mrf.mxu0  ;;  %v4264_v24 = vpop.eup %4263  ;;  %4277 = vpow2.f32 %v1361_v42 }
 0x32c   :  { %v2106_v5 = vpop.f32.mrf.mxu2  ;;  %v6252_v51 = vpop.f32.mrf.mxu1 }
 0x32d   :  { %v2107_v10 = vadd.f32 %v2106_v5, %v2018_v39  ;;  %v4266_v57 = vpop.eup %4265 }
 0x32e   :  { %2245 = vmatmul.f32.gmra.mxu3 %v4258_v59  ;;  %2310 = vmatmul.f32.gmra.mxu0 %v4260_v63  ;;  %v1535_v59 = vmul.f32 1.442695, %v7169_v47  ;;  %v7170_v63 = vld [vmem:[#allocation102_spill] sm:$0xff] }
 0x32f   :  { %v6256_v26 = vadd.f32 %v2195_v56, %v2107_v10  ;;  %2399 = vmatmul.f32.gmra.mxu1 %v4262_v54  ;;  %v1537_v60 = vmul.f32 1.442695, %v7170_v63  ;;  %v1103_v63 = vmul.f32 1.442695, %v7173_v1  ;;  %v7179_v1 = vld [vmem:[#allocation54_spill] sm:$0xff] }
 0x330   :  { %4279 = vpow2.f32 %v1535_v59 }
 0x331   :  { %2156 = vmatmul.f32.gmra.mxu2 %v4256_v49  ;;  %v2198_v21 = vpop.f32.mrf.mxu3  ;;  %v4268_v49 = vpop.eup %4267  ;;  %4281 = vpow2.f32 %v1537_v60 }
 0x332   :  { %v4270_v10 = vpop.eup %4269  ;;  %4283 = vpow2.f32 %v1379_v62 }
 0x333   :  { %v6268_v56 = vpop.f32.mrf.mxu0  ;;  %v4272_v54 = vpop.eup %4271  ;;  %4285 = vpow2.f32 %v1381_v23 }
 0x334   :  { %v2109_v37 = vpop.f32.mrf.mxu2  ;;  %v6271_v5 = vpop.f32.mrf.mxu1 }
 0x335   :  { %v2110_v39 = vadd.f32 %v2109_v37, %v2021_v18  ;;  %v4274_v40 = vpop.eup %4273  ;;  %v1555_v37 = vmul.f32 1.442695, %v7171_v13 }
 0x336   :  { %2248 = vmatmul.f32.gmra.mxu3 %v4266_v57  ;;  %2313 = vmatmul.f32.gmra.mxu0 %v4268_v49 }
 0x337   :  { %v6275_v22 = vadd.f32 %v2198_v21, %v2110_v39  ;;  %2402 = vmatmul.f32.gmra.mxu1 %v4270_v10  ;;  %v4276_v21 = vpop.eup %4275  ;;  %v1557_v39 = vmul.f32 1.442695, %v7172_v0  ;;  %v1401_v10 = vmul.f32 1.442695, %v5636_v29  ;;  %4287 = vpow2.f32 %v1555_v37  ;;  %v7176_v0 = vld [vmem:[#allocation111_spill] sm:$0xff] }
 0x338   :  { %v4278_v14 = vpop.eup %4277  ;;  %v2030_v29 = vadd.f32 %v6067_v27, %v1941_v58  ;;  %v1944_v27 = vadd.f32 %v6074_v28, %v5897_v8  ;;  %v1439_v8 = vmul.f32 1.442695, %v5669_v34  ;;  %v7180_v34 = vld [vmem:[#allocation112_spill] sm:$0xff] }
 0x339   :  { %2159 = vmatmul.f32.gmra.mxu2 %v4264_v24  ;;  %v2201_v53 = vpop.f32.mrf.mxu3  ;;  %v4280_v42 = vpop.eup %4279  ;;  %4289 = vpow2.f32 %v1557_v39  ;;  %v1125_v39 = vmul.f32 1.442695, %v7176_v0  ;;  %v7185_v0 = vld [vmem:[#allocation15_spill] sm:$0xff] }
 0x33a   :  { %v4282_v15 = vpop.eup %4281  ;;  %4291 = vpow2.f32 %v1399_v6 }
 0x33b   :  { %v6281_v4 = vpop.f32.mrf.mxu0  ;;  %v4284_v59 = vpop.eup %4283  ;;  %4293 = vpow2.f32 %v1401_v10 }
 0x33c   :  { %v2112_v32 = vpop.f32.mrf.mxu2  ;;  %v6284_v18 = vpop.f32.mrf.mxu1  ;;  %4295 = vpow2.f32 %v1103_v63 }
 0x33d   :  { %v2113_v35 = vadd.f32 %v2112_v32, %v2024_v12  ;;  %v7174_v32 = vld [vmem:[#allocation109_spill] sm:$0xff] }
 0x33e   :  { %2251 = vmatmul.f32.gmra.mxu3 %v4274_v40  ;;  %2316 = vmatmul.f32.gmra.mxu0 %v4276_v21  ;;  %v1421_v21 = vmul.f32 1.442695, %v5654_v36  ;;  %v2033_v36 = vadd.f32 %v6080_v44, %v1944_v27 }
 0x33f   :  { %v6288_v48 = vadd.f32 %v2201_v53, %v2113_v35  ;;  %2405 = vmatmul.f32.gmra.mxu1 %v4278_v14  ;;  %v4286_v53 = vpop.eup %4285 }
 0x340   :  { %v4288_v35 = vpop.eup %4287 }
 0x341   :  { %2162 = vmatmul.f32.gmra.mxu2 %v4272_v54  ;;  %v2204_v24 = vpop.f32.mrf.mxu3  ;;  %v1105_v54 = vmul.f32 1.442695, %v7174_v32  ;;  %v4290_v23 = vpop.eup %4289 }
 0x342   :  { %v4292_v14 = vpop.eup %4291 }
 0x343   :  { %v6294_v49 = vpop.f32.mrf.mxu0  ;;  %v4294_v37 = vpop.eup %4293  ;;  %4297 = vpow2.f32 %v1105_v54  ;;  %v7181_v54 = vld [vmem:[#allocation25_spill] sm:$0xff] }
 0x344   :  { %v2115_v57 = vpop.f32.mrf.mxu2  ;;  %v6297_v47 = vpop.f32.mrf.mxu1  ;;  %4299 = vpow2.f32 %v1419_v9  ;;  %v7182_v9 = vld [vmem:[#allocation113_spill] sm:$0xff] }
 0x345   :  { %v2116_v19 = vadd.f32 %v2115_v57, %v2027_v61  ;;  %4301 = vpow2.f32 %v1421_v21  ;;  %v1123_v61 = vmul.f32 1.442695, %v7175_v33 }
 0x346   :  { %2254 = vmatmul.f32.gmra.mxu3 %v4282_v15  ;;  %2319 = vmatmul.f32.gmra.mxu0 %v4284_v59  ;;  %v7177_v15 = vld [vmem:[#allocation128_spill] sm:$0xff] }
 0x347   :  { %v6301_v12 = vadd.f32 %v2204_v24, %v2116_v19  ;;  %2408 = vmatmul.f32.gmra.mxu1 %v4286_v53  ;;  %v1441_v10 = vmul.f32 1.442695, %v7177_v15  ;;  %4303 = vpow2.f32 %v1123_v61  ;;  %v7178_v53 = vld [vmem:[#allocation46_spill] sm:$0xff]  ;;  %v7184_v61 = vld [vmem:[#allocation131_spill] sm:$0xff] }
 0x348   :  { %v1947_v63 = vadd.f32 %v7179_v1, %v7178_v53  ;;  %4305 = vpow2.f32 %v1125_v39  ;;  %v7186_v39 = vld [vmem:[#allocation29_spill] sm:$0xff] }
 0x349   :  { %2165 = vmatmul.f32.gmra.mxu2 %v4280_v42  ;;  %v2207_v60 = vpop.f32.mrf.mxu3  ;;  %v4296_v42 = vpop.eup %4295  ;;  %4307 = vpow2.f32 %v1439_v8 }
 0x34a   :  { %v4298_v19 = vpop.eup %4297  ;;  %4309 = vpow2.f32 %v1441_v10 }
 0x34b   :  { %v6307_v40 = vpop.f32.mrf.mxu0  ;;  %v4300_v58 = vpop.eup %4299 }
 0x34c   :  { %v2118_v62 = vpop.f32.mrf.mxu2  ;;  %v6310_v2 = vpop.f32.mrf.mxu1 }
 0x34d   :  { %v2119_v43 = vadd.f32 %v2118_v62, %v2030_v29  ;;  %v2036_v62 = vadd.f32 %v7181_v54, %v1947_v63  ;;  %v7190_v63 = vld [vmem:[#allocation136_spill] sm:$0xff] }
 0x34e   :  { %2257 = vmatmul.f32.gmra.mxu3 %v4290_v23  ;;  %2322 = vmatmul.f32.gmra.mxu0 %v4292_v14  ;;  %v7183_v14 = vld [vmem:[#allocation132_spill] sm:$0xff] }
 0x34f   :  { %v6314_v13 = vadd.f32 %v2207_v60, %v2119_v43  ;;  %2411 = vmatmul.f32.gmra.mxu1 %v4294_v37  ;;  %v4302_v60 = vpop.eup %4301  ;;  %v1145_v43 = vmul.f32 1.442695, %v7182_v9  ;;  %v1459_v27 = vmul.f32 1.442695, %v7183_v14 }
 0x350   :  { %v4304_v21 = vpop.eup %4303 }
 0x351   :  { %2168 = vmatmul.f32.gmra.mxu2 %v4288_v35  ;;  %v2210_v24 = vpop.f32.mrf.mxu3  ;;  %v4306_v33 = vpop.eup %4305 }
 0x353   :  { %v2278_v6 = vpop.f32.mrf.mxu0 }
 0x354   :  { %v2121_v57 = vpop.f32.mrf.mxu2  ;;  %v2279_v59 = vadd.f32 %v2278_v6, %v6224_v7  ;;  %v2367_v29 = vpop.f32.mrf.mxu1  ;;  %v1143_v7 = vmul.f32 1.442695, %v7180_v34 }
 0x355   :  { %v2122_v28 = vadd.f32 %v2121_v57, %v2033_v36  ;;  %v1461_v36 = vmul.f32 1.442695, %v7184_v61  ;;  %v1950_v57 = vadd.f32 %v7186_v39, %v7185_v0 }
 0x356   :  { %v6326_v32 = vadd.f32 %v2367_v29, %v2279_v59  ;;  %2325 = vmatmul.f32.gmra.mxu0 %v4300_v58  ;;  %2544 = vmatmul.f32.vlgmr.msrb.gmra.mxu3 %v4298_v19  ;;  %4311 = vpow2.f32 %v1143_v7  ;;  %v7188_v19 = vld [vmem:[#allocation30_spill] sm:$0xff]  ;;  %v7189_v59 = vld [vmem:[#allocation115_spill] sm:$0xff]  ;;  %v1479_v29 = vmul.f32 1.442695, %v7190_v63 }
 0x357   :  { %v6324_v44 = vadd.f32 %v2210_v24, %v2122_v28  ;;  %2414 = vmatmul.f32.gmra.mxu1 %v4302_v60  ;;  %v4308_v24 = vpop.eup %4307  ;;  %4313 = vpow2.f32 %v1145_v43  ;;  %v7187_v28 = vld [vmem:[#allocation114_spill] sm:$0xff]  ;;  %v2039_v15 = vadd.f32 %v7188_v19, %v1950_v57  ;;  %v1165_v58 = vmul.f32 1.442695, %v7189_v59  ;;  %v7191_v7 = vld [vmem:[#allocation135_spill] sm:$0xff] }
 0x358   :  { %v4310_v8 = vpop.eup %4309  ;;  %4315 = vpow2.f32 %v1459_v27  ;;  %v1163_v6 = vmul.f32 1.442695, %v7187_v28  ;;  %v1481_v54 = vmul.f32 1.442695, %v7191_v7  ;;  %v7197_v19 = vld [vmem:[#allocation51_spill] sm:$0xff] }
 0x359   :  { %2455 = vmatmul.f32.vlgmr.msrb.gmra.mxu2 %v4296_v42  ;;  %v2213_v35 = vpop.f32.mrf.mxu3  ;;  %4317 = vpow2.f32 %v1461_v36 }
 0x35a   :  { %4319 = vpow2.f32 %v1163_v6 }
 0x35b   :  { %4321 = vpow2.f32 %v1165_v58 }
 0x35c   :  { %v2124_v23 = vpop.f32.mrf.mxu2  ;;  %v4312_v1 = vpop.eup %4311  ;;  %4323 = vpow2.f32 %v1479_v29 }
 0x35d   :  { %v2125_v37 = vadd.f32 %v2124_v23, %v2036_v62  ;;  %v4314_v34 = vpop.eup %4313  ;;  %4325 = vpow2.f32 %v1481_v54 }
 0x35e   :  { %2328 = vmatmul.f32.gmra.mxu0 %v4308_v24  ;;  %2547 = vmatmul.f32.gmra.mxu3 %v4306_v33  ;;  %v4316_v62 = vpop.eup %4315  ;;  %v7194_v33 = vld [vmem:[#allocation117_spill] sm:$0xff] }
 0x35f   :  { %v6335_v42 = vadd.f32 %v2213_v35, %v2125_v37  ;;  %2417 = vmatmul.f32.gmra.mxu1 %v4310_v8  ;;  %v7192_v35 = vld [vmem:[#allocation16_spill] sm:$0xff]  ;;  %v4318_v23 = vpop.eup %4317  ;;  %v1185_v61 = vmul.f32 1.442695, %v7194_v33  ;;  %v7196_v8 = vld [vmem:[#allocation139_spill] sm:$0xff] }
 0x360   :  { %v1953_v9 = vadd.f32 %v6116_v30, %v7192_v35  ;;  %v4320_v24 = vpop.eup %4319  ;;  %v7195_v30 = vld [vmem:[#allocation140_spill] sm:$0xff]  ;;  %v1501_v28 = vmul.f32 1.442695, %v7196_v8  ;;  %v7207_v8 = vld [vmem:[#allocation121_spill] sm:$0xff] }
 0x361   :  { %2458 = vmatmul.f32.gmra.mxu2 %v4304_v21  ;;  %v2216_v10 = vpop.f32.mrf.mxu3  ;;  %v7193_v21 = vld [vmem:[#allocation116_spill] sm:$0xff]  ;;  %v1499_v0 = vmul.f32 1.442695, %v7195_v30  ;;  %v4322_v57 = vpop.eup %4321 }
 0x362   :  { %v1183_v14 = vmul.f32 1.442695, %v7193_v21  ;;  %v2042_v27 = vadd.f32 %v6122_v17, %v1953_v9  ;;  %v4324_v6 = vpop.eup %4323  ;;  %v7199_v17 = vld [vmem:[#allocation118_spill] sm:$0xff]  ;;  %v7203_v21 = vld [vmem:[#allocation21_spill] sm:$0xff] }
 0x363   :  { %v4326_v58 = vpop.eup %4325 }
 0x364   :  { %v2127_v53 = vpop.f32.mrf.mxu2  ;;  %4327 = vpow2.f32 %v1183_v14  ;;  %v1521_v14 = vmul.f32 1.442695, %v7203_v21  ;;  %v7214_v21 = vld [vmem:[#allocation123_spill] sm:$0xff] }
 0x365   :  { %v2128_v60 = vadd.f32 %v2127_v53, %v2039_v15  ;;  %v7198_v15 = vld [vmem:[#allocation34_spill] sm:$0xff]  ;;  %4329 = vpow2.f32 %v1185_v61  ;;  %v1203_v53 = vmul.f32 1.442695, %v7199_v17  ;;  %v7209_v17 = vld [vmem:[#allocation3_spill] sm:$0xff] }
 0x366   :  { %2331 = vmatmul.f32.gmra.mxu0 %v4316_v62  ;;  %2550 = vmatmul.f32.gmra.mxu3 %v4314_v34  ;;  %4331 = vpow2.f32 %v1499_v0  ;;  %v7202_v62 = vld [vmem:[#allocation22_spill] sm:$0xff]  ;;  %v7206_v0 = vld [vmem:[#allocation37_spill] sm:$0xff] }
 0x367   :  { %v6344_v43 = vadd.f32 %v2216_v10, %v2128_v60  ;;  %2420 = vmatmul.f32.gmra.mxu1 %v4318_v23  ;;  %v1956_v10 = vadd.f32 %v7198_v15, %v7197_v19  ;;  %4333 = vpow2.f32 %v1501_v28  ;;  %v7201_v60 = vld [vmem:[#allocation119_spill] sm:$0xff]  ;;  %v1519_v35 = vmul.f32 1.442695, %v7202_v62 }
 0x368   :  { %v1205_v34 = vmul.f32 1.442695, %v7201_v60  ;;  %4335 = vpow2.f32 %v1203_v53  ;;  %v1225_v28 = vmul.f32 1.442695, %v7207_v8  ;;  %v1541_v53 = vmul.f32 1.442695, %v7209_v17 }
 0x369   :  { %2461 = vmatmul.f32.gmra.mxu2 %v4312_v1  ;;  %v2219_v37 = vpop.f32.mrf.mxu3  ;;  %v7200_v1 = vld [vmem:[#allocation64_spill] sm:$0xff]  ;;  %v7217_v8 = vld [vmem:[#allocation18_spill] sm:$0xff]  ;;  %v7218_v17 = vld [vmem:[#allocation125_spill] sm:$0xff] }
 0x36a   :  { %v2045_v63 = vadd.f32 %v7200_v1, %v1956_v10  ;;  %v4328_v54 = vpop.eup %4327  ;;  %4337 = vpow2.f32 %v1205_v34 }
 0x36b   :  { %v4330_v23 = vpop.eup %4329  ;;  %4339 = vpow2.f32 %v1519_v35  ;;  %v7213_v35 = vld [vmem:[#allocation67_spill] sm:$0xff] }
 0x36c   :  { %v2130_v36 = vpop.f32.mrf.mxu2  ;;  %4341 = vpow2.f32 %v1521_v14  ;;  %v1245_v14 = vmul.f32 1.442695, %v7214_v21 }
 0x36d   :  { %v2131_v39 = vadd.f32 %v2130_v36, %v2042_v27  ;;  %v4332_v27 = vpop.eup %4331 }
 0x36e   :  { %2334 = vmatmul.f32.gmra.mxu0 %v4324_v6  ;;  %2553 = vmatmul.f32.gmra.mxu3 %v4322_v57  ;;  %v4334_v36 = vpop.eup %4333 }
 0x36f   :  { %v6353_v59 = vadd.f32 %v2219_v37, %v2131_v39  ;;  %2423 = vmatmul.f32.gmra.mxu1 %v4326_v58  ;;  %v7204_v37 = vld [vmem:[#allocation50_spill] sm:$0xff]  ;;  %v4336_v19 = vpop.eup %4335 }
 0x370   :  { %v1959_v33 = vadd.f32 %v6148_v16, %v7204_v37  ;;  %v7208_v16 = vld [vmem:[#allocation4_spill] sm:$0xff]  ;;  %v4338_v58 = vpop.eup %4337 }
 0x371   :  { %2464 = vmatmul.f32.gmra.mxu2 %v4320_v24  ;;  %v2222_v29 = vpop.f32.mrf.mxu3  ;;  %v7205_v24 = vld [vmem:[#allocation120_spill] sm:$0xff]  ;;  %v1539_v15 = vmul.f32 1.442695, %v7208_v16  ;;  %v4340_v1 = vpop.eup %4339 }
 0x372   :  { %v1223_v30 = vmul.f32 1.442695, %v7205_v24  ;;  %v2048_v39 = vadd.f32 %v7206_v0, %v1959_v33  ;;  %v7215_v33 = vld [vmem:[#allocation6_spill] sm:$0xff]  ;;  %v7216_v0 = vld [vmem:[#allocation5_spill] sm:$0xff] }
 0x374   :  { %v2133_v7 = vpop.f32.mrf.mxu2  ;;  %4343 = vpow2.f32 %v1223_v30 }
 0x375   :  { %v2134_v9 = vadd.f32 %v2133_v7, %v2045_v63  ;;  %v7210_v63 = vld [vmem:[#allocation17_spill] sm:$0xff]  ;;  %v4342_v7 = vpop.eup %4341  ;;  %4345 = vpow2.f32 %v1225_v28  ;;  %v1965_v28 = vadd.f32 %v6174_v3, %v7217_v8  ;;  %v7219_v3 = vld [vmem:[#allocation124_spill] sm:$0xff] }
 0x376   :  { %2337 = vmatmul.f32.gmra.mxu0 %v4332_v27  ;;  %2556 = vmatmul.f32.gmra.mxu3 %v4330_v23  ;;  %4347 = vpow2.f32 %v1539_v15 }
 0x377   :  { %v6362_v61 = vadd.f32 %v2222_v29, %v2134_v9  ;;  %2426 = vmatmul.f32.gmra.mxu1 %v4334_v36  ;;  %v7211_v29 = vld [vmem:[#allocation68_spill] sm:$0xff]  ;;  %4349 = vpow2.f32 %v1541_v53  ;;  %v1559_v36 = vmul.f32 1.442695, %v7215_v33  ;;  %v2054_v16 = vadd.f32 %v6177_v55, %v1965_v28  ;;  %v7223_v33 = vld [vmem:[#allocation126_spill] sm:$0xff] }
 0x378   :  { %v1962_v60 = vadd.f32 %v7211_v29, %v7210_v63  ;;  %v1265_v53 = vmul.f32 1.442695, %v7218_v17  ;;  %v1263_v29 = vmul.f32 1.442695, %v7219_v3  ;;  %v7221_v55 = vld [vmem:[#allocation72_spill] sm:$0xff] }
 0x379   :  { %2467 = vmatmul.f32.gmra.mxu2 %v4328_v54  ;;  %v2225_v57 = vpop.f32.mrf.mxu3  ;;  %v7212_v54 = vld [vmem:[#allocation122_spill] sm:$0xff]  ;;  %v3768_v3 = vld [vmem:[%s6870_s3 + $0x48] sm:$0xff] }
 0x37a   :  { %v1243_v62 = vmul.f32 1.442695, %v7212_v54  ;;  %v2051_v9 = vadd.f32 %v7213_v35, %v1962_v60  ;;  %v4344_v37 = vpop.eup %4343  ;;  %3081 = vmatpush.bf16.msrb.mxu1 %v3768_v3 }
 0x37b   :  { %v4346_v30 = vpop.eup %4345 }
 0x37c   :  { %v2136_v6 = vpop.f32.mrf.mxu2  ;;  %4351 = vpow2.f32 %v1243_v62 }
 0x37d   :  { %v2137_v10 = vadd.f32 %v2136_v6, %v2048_v39  ;;  %v1561_v39 = vmul.f32 1.442695, %v7216_v0  ;;  %4353 = vpow2.f32 %v1245_v14  ;;  %v7222_v14 = vld [vmem:[#allocation127_spill] sm:$0xff] }
 0x37e   :  { %2340 = vmatmul.f32.gmra.mxu0 %v4340_v1  ;;  %2559 = vmatmul.f32.gmra.mxu3 %v4338_v58  ;;  %4355 = vpow2.f32 %v1559_v36  ;;  %v1283_v36 = vmul.f32 1.442695, %v7223_v33 }
 0x37f   :  { %v6371_v34 = vadd.f32 %v2225_v57, %v2137_v10  ;;  %2429 = vmatmul.f32.gmra.mxu1 %v4342_v7  ;;  %v4348_v57 = vpop.eup %4347  ;;  %4357 = vpow2.f32 %v1561_v39  ;;  %v7220_v7 = vld [vmem:[#allocation55_spill] sm:$0xff] }
 0x380   :  { %v1968_v54 = vadd.f32 %v6190_v11, %v7220_v7  ;;  %4359 = vpow2.f32 %v1265_v53  ;;  %v7224_v11 = vld [vmem:[#allocation26_spill] sm:$0xff]  ;;  %v7227_v53 = vld [vmem:[#allocation60_spill] sm:$0xff] }
 0x381   :  { %2470 = vmatmul.f32.gmra.mxu2 %v4336_v19  ;;  %v2228_v23 = vpop.f32.mrf.mxu3  ;;  %v4350_v19 = vpop.eup %4349  ;;  %4361 = vpow2.f32 %v1263_v29 }
 0x382   :  { %v4352_v58 = vpop.eup %4351 }
 0x383   :  { %v4354_v63 = vpop.eup %4353 }
 0x384   :  { %v2139_v27 = vpop.f32.mrf.mxu2  ;;  %v4356_v60 = vpop.eup %4355 }
 0x385   :  { %v2140_v24 = vadd.f32 %v2139_v27, %v2051_v9  ;;  %v4358_v35 = vpop.eup %4357  ;;  %v2057_v9 = vadd.f32 %v7221_v55, %v1968_v54  ;;  %v1285_v27 = vmul.f32 1.442695, %v7222_v14  ;;  %v7228_v54 = vld [vmem:[#allocation134_spill] sm:$0xff] }
 0x386   :  { %2343 = vmatmul.f32.gmra.mxu0 %v4348_v57  ;;  %2562 = vmatmul.f32.gmra.mxu3 %v4346_v30  ;;  %v1971_v30 = vadd.f32 %v6200_v31, %v7224_v11  ;;  %v3766_v57 = vld [vmem:[%s6870_s3 + $0x38] sm:$0xff] }
 0x387   :  { %v6380_v6 = vadd.f32 %v2228_v23, %v2140_v24  ;;  %2432 = vmatmul.f32.gmra.mxu1 %v4350_v19  ;;  %v4360_v24 = vpop.eup %4359  ;;  %4363 = vpow2.f32 %v1285_v27  ;;  %3016 = vmatpush.bf16.msrb.mxu0 %v3766_v57  ;;  %v7226_v31 = vld [vmem:[#allocation129_spill] sm:$0xff] }
 0x388   :  { %v4362_v39 = vpop.eup %4361  ;;  %4365 = vpow2.f32 %v1283_v36  ;;  %v2060_v8 = vadd.f32 %v6203_v25, %v1971_v30 }
 0x389   :  { %2473 = vmatmul.f32.gmra.mxu2 %v4344_v37  ;;  %v2231_v15 = vpop.f32.mrf.mxu3 }
 0x38c   :  { %v2142_v10 = vpop.f32.mrf.mxu2 }
 0x38d   :  { %v2143_v1 = vadd.f32 %v2142_v10, %v2054_v16  ;;  %v7225_v16 = vld [vmem:[#allocation130_spill] sm:$0xff]  ;;  %v4364_v17 = vpop.eup %4363 }
 0x38e   :  { %2346 = vmatmul.f32.gmra.mxu0 %v4356_v60  ;;  %2565 = vmatmul.f32.gmra.mxu3 %v4354_v63  ;;  %v4366_v29 = vpop.eup %4365 }
 0x38f   :  { %v6387_v62 = vadd.f32 %v2231_v15, %v2143_v1  ;;  %2435 = vmatmul.f32.gmra.mxu1 %v4358_v35  ;;  %v1305_v15 = vmul.f32 1.442695, %v7225_v16  ;;  %v1974_v1 = vadd.f32 %v6217_v52, %v7227_v53  ;;  %v1325_v35 = vmul.f32 1.442695, %v7228_v54  ;;  %v7229_v52 = vld [vmem:[#allocation133_spill] sm:$0xff] }
 0x391   :  { %2476 = vmatmul.f32.gmra.mxu2 %v4352_v58  ;;  %v2234_v23 = vpop.f32.mrf.mxu3  ;;  %v1303_v58 = vmul.f32 1.442695, %v7226_v31  ;;  %4367 = vpow2.f32 %v1305_v15  ;;  %v2063_v25 = vadd.f32 %v6220_v20, %v1974_v1  ;;  %v7235_v1 = vld [vmem:[#allocation20_spill] sm:$0xff] }
 0x392   :  { %v1363_v3 = vmul.f32 1.442695, %v7235_v1 }
 0x393   :  { %4369 = vpow2.f32 %v1303_v58 }
 0x394   :  { %v2145_v21 = vpop.f32.mrf.mxu2  ;;  %4371 = vpow2.f32 %v1325_v35 }
 0x395   :  { %v2146_v37 = vadd.f32 %v2145_v21, %v2057_v9  ;;  %v1323_v9 = vmul.f32 1.442695, %v7229_v52  ;;  %v7230_v21 = vld [vmem:[#allocation33_spill] sm:$0xff] }
 0x396   :  { %2568 = vmatmul.f32.gmra.mxu3 %v4360_v24  ;;  %v1977_v14 = vadd.f32 %v6236_v46, %v7230_v21  ;;  %v7231_v24 = vld [vmem:[#allocation138_spill] sm:$0xff] }
 0x397   :  { %v6394_v0 = vadd.f32 %v2234_v23, %v2146_v37  ;;  %v4368_v23 = vpop.eup %4367  ;;  %4373 = vpow2.f32 %v1323_v9  ;;  %v1345_v11 = vmul.f32 1.442695, %v7231_v24 }
 0x398   :  { %v2066_v20 = vadd.f32 %v6239_v50, %v1977_v14  ;;  %v3765_v50 = vld [vmem:[%s6870_s3 + $0x30] sm:$0xff] }
 0x399   :  { %2479 = vmatmul.f32.gmra.mxu2 %v4362_v39  ;;  %v2237_v28 = vpop.f32.mrf.mxu3  ;;  %v4370_v37 = vpop.eup %4369  ;;  %v7232_v39 = vld [vmem:[#allocation137_spill] sm:$0xff]  ;;  %4375 = vpow2.f32 %v1345_v11  ;;  %3017 = vmatpush.bf16.msrb.mxu0 %v3765_v50  ;;  %v7241_v50 = vld [vmem:[#allocation28_spill] sm:$0xff] }
 0x39a   :  { %v1343_v57 = vmul.f32 1.442695, %v7232_v39 }
 0x39c   :  { %v2148_v19 = vpop.f32.mrf.mxu2  ;;  %4377 = vpow2.f32 %v1343_v57 }
 0x39d   :  { %v2149_v10 = vadd.f32 %v2148_v19, %v2060_v8  ;;  %v4372_v8 = vpop.eup %4371  ;;  %v6421_v19 = vpop.f32.mrf.mxu0 }
 0x39e   :  { %2571 = vmatmul.f32.gmra.mxu3 %v4364_v17  ;;  %v4374_v15 = vpop.eup %4373  ;;  %v7234_v17 = vld [vmem:[#allocation19_spill] sm:$0xff] }
 0x39f   :  { %v6404_v63 = vadd.f32 %v2237_v28, %v2149_v10  ;;  %v7233_v28 = vld [vmem:[#allocation63_spill] sm:$0xff] }
 0x3a0   :  { %v1980_v46 = vadd.f32 %v6249_v38, %v7233_v28  ;;  %v1365_v38 = vmul.f32 1.442695, %v7234_v17  ;;  %v7240_v28 = vld [vmem:[#allocation27_spill] sm:$0xff] }
 0x3a1   :  { %2482 = vmatmul.f32.gmra.mxu2 %v4366_v29  ;;  %v2240_v60 = vpop.f32.mrf.mxu3  ;;  %v6431_v29 = vpop.f32.mrf.mxu1 }
 0x3a2   :  { %v2069_v10 = vadd.f32 %v6252_v51, %v1980_v46  ;;  %4379 = vpow2.f32 %v1365_v38  ;;  %v1405_v46 = vmul.f32 1.442695, %v7240_v28 }
 0x3a3   :  { %4381 = vpow2.f32 %v1363_v3 }
 0x3a4   :  { %v2151_v7 = vpop.f32.mrf.mxu2 }
 0x3a5   :  { %v2152_v55 = vadd.f32 %v2151_v7, %v2063_v25  ;;  %v4376_v25 = vpop.eup %4375  ;;  %v6437_v51 = vpop.f32.mrf.mxu0 }
 0x3a6   :  { %2574 = vmatmul.f32.gmra.mxu3 %v4368_v23  ;;  %v4378_v35 = vpop.eup %4377  ;;  %v7237_v23 = vld [vmem:[#allocation23_spill] sm:$0xff] }
 0x3a7   :  { %v6414_v27 = vadd.f32 %v2240_v60, %v2152_v55  ;;  %v7236_v60 = vld [vmem:[#allocation38_spill] sm:$0xff]  ;;  %v1385_v21 = vmul.f32 1.442695, %v7237_v23  ;;  %v1992_v23 = vadd.f32 %v6307_v40, %v6198_v41 }
 0x3a8   :  { %v1983_v7 = vadd.f32 %v6268_v56, %v7236_v60  ;;  %v7239_v56 = vld [vmem:[#allocation40_spill] sm:$0xff]  ;;  %v7243_v60 = vld [vmem:[#allocation31_spill] sm:$0xff] }
 0x3a9   :  { %2485 = vmatmul.f32.gmra.mxu2 %v4370_v37  ;;  %v2243_v33 = vpop.f32.mrf.mxu3  ;;  %v7238_v37 = vld [vmem:[#allocation24_spill] sm:$0xff]  ;;  %4383 = vpow2.f32 %v1385_v21 }
 0x3aa   :  { %v2072_v55 = vadd.f32 %v6271_v5, %v1983_v7 }
 0x3ac   :  { %v2154_v36 = vpop.f32.mrf.mxu2 }
 0x3ad   :  { %v2155_v30 = vadd.f32 %v2154_v36, %v2066_v20  ;;  %v1383_v20 = vmul.f32 1.442695, %v7238_v37  ;;  %v1986_v36 = vadd.f32 %v6281_v4, %v7239_v56  ;;  %v6449_v39 = vpop.f32.mrf.mxu0  ;;  %v1403_v4 = vmul.f32 1.442695, %v7241_v50  ;;  %v7245_v56 = vld [vmem:[#allocation8_spill] sm:$0xff] }
 0x3ae   :  { %2577 = vmatmul.f32.gmra.mxu3 %v4372_v8 }
 0x3af   :  { %v6423_v16 = vadd.f32 %v2243_v33, %v2155_v30  ;;  %v4380_v33 = vpop.eup %4379  ;;  %v6446_v30 = vpop.f32.mrf.mxu1  ;;  %4385 = vpow2.f32 %v1383_v20  ;;  %v2075_v5 = vadd.f32 %v6284_v18, %v1986_v36  ;;  %v3764_v18 = vld [vmem:[%s6870_s3 + $0x28] sm:$0xff]  ;;  %v1445_v36 = vmul.f32 1.442695, %v7245_v56 }
 0x3b0   :  { %v4382_v11 = vpop.eup %4381  ;;  %4387 = vpow2.f32 %v1405_v46  ;;  %3018 = vmatpush.bf16.msrb.mxu0 %v3764_v18 }
 0x3b1   :  { %2488 = vmatmul.f32.gmra.mxu2 %v4374_v15  ;;  %v2246_v31 = vpop.f32.mrf.mxu3  ;;  %4389 = vpow2.f32 %v1403_v4 }
 0x3b4   :  { %v2157_v58 = vpop.f32.mrf.mxu2 }
 0x3b5   :  { %v2158_v53 = vadd.f32 %v2157_v58, %v2069_v10  ;;  %v4384_v10 = vpop.eup %4383  ;;  %v6464_v7 = vpop.f32.mrf.mxu0 }
 0x3b6   :  { %2580 = vmatmul.f32.gmra.mxu3 %v4376_v25  ;;  %v4386_v38 = vpop.eup %4385 }
 0x3b7   :  { %v6435_v54 = vadd.f32 %v2246_v31, %v2158_v53  ;;  %v7242_v31 = vld [vmem:[#allocation41_spill] sm:$0xff]  ;;  %v6460_v53 = vpop.f32.mrf.mxu1 }
 0x3b8   :  { %v1989_v58 = vadd.f32 %v6294_v49, %v7242_v31  ;;  %v1425_v49 = vmul.f32 1.442695, %v7243_v60 }
 0x3b9   :  { %2491 = vmatmul.f32.gmra.mxu2 %v4378_v35  ;;  %v2249_v52 = vpop.f32.mrf.mxu3 }
 0x3ba   :  { %v2078_v1 = vadd.f32 %v6297_v47, %v1989_v58  ;;  %4391 = vpow2.f32 %v1425_v49  ;;  %v2081_v47 = vadd.f32 %v6310_v2, %v1992_v23  ;;  %v7249_v49 = vld [vmem:[#allocation10_spill] sm:$0xff] }
 0x3bb   :  { %v3767_v23 = vld [vmem:[%s6870_s3 + $0x40] sm:$0xff] }
 0x3bc   :  { %v2160_v9 = vpop.f32.mrf.mxu2  ;;  %3082 = vmatpush.bf16.msrb.mxu1 %v3767_v23 }
 0x3bd   :  { %v2161_v14 = vadd.f32 %v2160_v9, %v2072_v55  ;;  %v7244_v55 = vld [vmem:[#allocation32_spill] sm:$0xff]  ;;  %v4388_v9 = vpop.eup %4387  ;;  %v6476_v41 = vpop.f32.mrf.mxu0 }
 0x3be   :  { %2583 = vmatmul.f32.gmra.mxu3 %v4380_v33 }
 0x3bf   :  { %v6444_v24 = vadd.f32 %v2249_v52, %v2161_v14  ;;  %v1423_v52 = vmul.f32 1.442695, %v7244_v55  ;;  %v4390_v14 = vpop.eup %4389  ;;  %v6472_v20 = vpop.f32.mrf.mxu1  ;;  %v2282_v55 = vadd.f32 %v6421_v19, %v6243_v45 }
 0x3c1   :  { %2494 = vmatmul.f32.gmra.mxu2 %v4382_v11  ;;  %v2252_v57 = vpop.f32.mrf.mxu3  ;;  %4393 = vpow2.f32 %v1423_v52  ;;  %v7250_v52 = vld [vmem:[#allocation9_spill] sm:$0xff]  ;;  %v2371_v56 = vadd.f32 %v6431_v29, %v2282_v55 }
 0x3c2   :  { %4395 = vpow2.f32 %v1445_v36 }
 0x3c4   :  { %v2163_v8 = vpop.f32.mrf.mxu2 }
 0x3c5   :  { %v2164_v15 = vadd.f32 %v2163_v8, %v2075_v5  ;;  %v7246_v5 = vld [vmem:[#allocation7_spill] sm:$0xff]  ;;  %v4392_v8 = vpop.eup %4391 }
 0x3c6   :  { %2586 = vmatmul.f32.gmra.mxu3 %v4384_v10  ;;  %v7248_v10 = vld [vmem:[#allocation36_spill] sm:$0xff] }
 0x3c7   :  { %v6455_v17 = vadd.f32 %v2252_v57, %v2164_v15  ;;  %v1443_v57 = vmul.f32 1.442695, %v7246_v5  ;;  %v4394_v28 = vpop.eup %4393  ;;  %v7247_v15 = vld [vmem:[#allocation35_spill] sm:$0xff]  ;;  %v1463_v31 = vmul.f32 1.442695, %v7248_v10  ;;  %v6483_v58 = vpop.f32.mrf.mxu1 }
 0x3c8   :  { %v1465_v50 = vmul.f32 1.442695, %v7247_v15 }
 0x3c9   :  { %2497 = vmatmul.f32.gmra.mxu2 %v4386_v38  ;;  %v2255_v3 = vpop.f32.mrf.mxu3  ;;  %4397 = vpow2.f32 %v1443_v57  ;;  %v4396_v38 = vpop.eup %4395  ;;  %v7251_v57 = vld [vmem:[#allocation11_spill] sm:$0xff] }
 0x3ca   :  { %4399 = vpow2.f32 %v1465_v50 }
 0x3cb   :  { %4401 = vpow2.f32 %v1463_v31  ;;  %v7253_v31 = vld [vmem:[#allocation43_spill] sm:$0xff] }
 0x3cc   :  { %v2166_v25 = vpop.f32.mrf.mxu2 }
 0x3cd   :  { %v2167_v35 = vadd.f32 %v2166_v25, %v2078_v1  ;;  %v3763_v25 = vld [vmem:[%s6870_s3 + $0x20] sm:$0xff] }
 0x3ce   :  { %2589 = vmatmul.f32.gmra.mxu3 %v4388_v9  ;;  %3019 = vmatpush.bf16.msrb.mxu0 %v3763_v25  ;;  %v1483_v9 = vmul.f32 1.442695, %v7250_v52 }
 0x3cf   :  { %v6469_v21 = vadd.f32 %v2255_v3, %v2167_v35  ;;  %v4398_v1 = vpop.eup %4397  ;;  %v6487_v3 = vpop.f32.mrf.mxu0  ;;  %v1485_v35 = vmul.f32 1.442695, %v7249_v49 }
 0x3d1   :  { %2500 = vmatmul.f32.gmra.mxu2 %v4390_v14  ;;  %v2258_v37 = vpop.f32.mrf.mxu3  ;;  %v4400_v14 = vpop.eup %4399  ;;  %4403 = vpow2.f32 %v1485_v35  ;;  %v2291_v35 = vadd.f32 %v6464_v7, %v6288_v48 }
 0x3d2   :  { %4405 = vpow2.f32 %v1483_v9 }
 0x3d3   :  { %v2380_v23 = vadd.f32 %v6472_v20, %v2291_v35 }
 0x3d4   :  { %v2169_v33 = vpop.f32.mrf.mxu2 }
 0x3d5   :  { %v2170_v11 = vadd.f32 %v2169_v33, %v2081_v47  ;;  %v2285_v47 = vadd.f32 %v6437_v51, %v6256_v26  ;;  %v6501_v33 = vpop.f32.mrf.mxu1  ;;  %v7252_v51 = vld [vmem:[#allocation39_spill] sm:$0xff] }
 0x3d6   :  { %2592 = vmatmul.f32.gmra.mxu3 %v4392_v8  ;;  %v1505_v8 = vmul.f32 1.442695, %v7251_v57 }
 0x3d7   :  { %v6478_v40 = vadd.f32 %v2258_v37, %v2170_v11  ;;  %v4402_v37 = vpop.eup %4401  ;;  %v2374_v45 = vadd.f32 %v6446_v30, %v2285_v47  ;;  %v6505_v19 = vpop.f32.mrf.mxu0  ;;  %v7255_v47 = vld [vmem:[#allocation13_spill] sm:$0xff] }
 0x3d8   :  { %4407 = vpow2.f32 %v1505_v8 }
 0x3d9   :  { %2503 = vmatmul.f32.gmra.mxu2 %v4394_v28  ;;  %v2545_v2 = vpop.f32.mrf.mxu3  ;;  %v1503_v28 = vmul.f32 1.442695, %v7252_v51 }
 0x3db   :  { %4409 = vpow2.f32 %v1503_v28 }
 0x3dc   :  { %v2456_v46 = vpop.f32.mrf.mxu2 }
 0x3dd   :  { %v2457_v4 = vadd.f32 %v2456_v46, %v6326_v32  ;;  %v2288_v46 = vadd.f32 %v6449_v39, %v6275_v22 }
 0x3de   :  { %2595 = vmatmul.f32.gmra.mxu3 %v4396_v38  ;;  %v1525_v38 = vmul.f32 1.442695, %v7253_v31 }
 0x3df   :  { %v6485_v18 = vadd.f32 %v2545_v2, %v2457_v4  ;;  %v4404_v2 = vpop.eup %4403  ;;  %v6517_v4 = vpop.f32.mrf.mxu1  ;;  %v2377_v10 = vadd.f32 %v6460_v53, %v2288_v46  ;;  %v3762_v53 = vld [vmem:[%s6870_s3 + $0x18] sm:$0xff] }
 0x3e0   :  { %v4406_v50 = vpop.eup %4405  ;;  %4411 = vpow2.f32 %v1525_v38  ;;  %3020 = vmatpush.bf16.msrb.mxu0 %v3762_v53  ;;  %v2300_v53 = vadd.f32 %v6505_v19, %v6324_v44 }
 0x3e1   :  { %2506 = vmatmul.f32.gmra.mxu2 %v4398_v1  ;;  %v2548_v60 = vpop.f32.mrf.mxu3  ;;  %v6522_v1 = vpop.f32.mrf.mxu0 }
 0x3e2   :  { %v4408_v49 = vpop.eup %4407 }
 0x3e3   :  { %v4410_v52 = vpop.eup %4409 }
 0x3e4   :  { %v2459_v32 = vpop.f32.mrf.mxu2 }
 0x3e5   :  { %v2460_v36 = vadd.f32 %v2459_v32, %v2371_v56 }
 0x3e6   :  { %2598 = vmatmul.f32.gmra.mxu3 %v4400_v14 }
 0x3e7   :  { %v6511_v15 = vadd.f32 %v2548_v60, %v2460_v36  ;;  %v7254_v60 = vld [vmem:[#allocation12_spill] sm:$0xff]  ;;  %v6536_v7 = vpop.f32.mrf.mxu1 }
 0x3e8   :  { %v1523_v32 = vmul.f32 1.442695, %v7254_v60 }
 0x3e9   :  { %2509 = vmatmul.f32.gmra.mxu2 %v4402_v37  ;;  %v2551_v11 = vpop.f32.mrf.mxu3  ;;  %v1545_v37 = vmul.f32 1.442695, %v7255_v47  ;;  %v6542_v57 = vpop.f32.mrf.mxu0 }
 0x3ea   :  { %4413 = vpow2.f32 %v1523_v32 }
 0x3eb   :  { %4415 = vpow2.f32 %v1545_v37 }
 0x3ec   :  { %v2462_v5 = vpop.f32.mrf.mxu2 }
 0x3ed   :  { %v2463_v26 = vadd.f32 %v2462_v5, %v2374_v45  ;;  %v7256_v45 = vld [vmem:[#allocation42_spill] sm:$0xff]  ;;  %v2294_v5 = vadd.f32 %v6476_v41, %v6301_v12  ;;  %v7257_v12 = vld [vmem:[#allocation47_spill] sm:$0xff] }
 0x3ee   :  { %2601 = vmatmul.f32.gmra.mxu3 %v4404_v2  ;;  %v1543_v36 = vmul.f32 1.442695, %v7256_v45  ;;  %v1565_v41 = vmul.f32 1.442695, %v7257_v12 }
 0x3ef   :  { %v6513_v29 = vadd.f32 %v2551_v11, %v2463_v26  ;;  %v4412_v11 = vpop.eup %4411  ;;  %v2383_v51 = vadd.f32 %v6483_v58, %v2294_v5 }
 0x3f0   :  { %v4414_v20 = vpop.eup %4413  ;;  %4417 = vpow2.f32 %v1543_v36 }
 0x3f1   :  { %2512 = vmatmul.f32.gmra.mxu2 %v4406_v50  ;;  %v3790_v30 = vpack.i.bf16 %v6513_v29, %v6511_v15  ;;  %v2554_v22 = vpop.f32.mrf.mxu3  ;;  %v7258_v50 = vld [vmem:[#allocation14_spill] sm:$0xff]  ;;  %4419 = vpow2.f32 %v1565_v41  ;;  %v2308_v58 = vpop.f32.mrf.mxu0 }
 0x3f3   :  { %3791 = vrot.lane.b32.xlu0 %v3790_v30, %s4433_s17  ;;  %v1563_v30 = vmul.f32 1.442695, %v7258_v50 }
 0x3f4   :  { %v2465_v39 = vpop.f32.mrf.mxu2 }
 0x3f5   :  { %v2466_v25 = vadd.f32 %v2465_v39, %v2377_v10  ;;  %v2394_v10 = vpop.f32.mrf.mxu1  ;;  %v2297_v39 = vadd.f32 %v6487_v3, %v6314_v13  ;;  %4421 = vpow2.f32 %v1563_v30  ;;  %v2309_v30 = vadd.f32 %v2308_v58, %v6353_v59 }
 0x3f6   :  { %2604 = vmatmul.f32.gmra.mxu3 %v4408_v49 }
 0x3f7   :  { %v6527_v55 = vadd.f32 %v2554_v22, %v2466_v25  ;;  %v4416_v22 = vpop.eup %4415  ;;  %v2386_v32 = vadd.f32 %v6501_v33, %v2297_v39 }
 0x3f8   :  { %v4418_v38 = vpop.eup %4417 }
 0x3f9   :  { %2515 = vmatmul.f32.gmra.mxu2 %v4410_v52  ;;  %v3795_v9 = vpack.i.bf16 %v6527_v55, %v6513_v29  ;;  %v2557_v48 = vpop.f32.mrf.mxu3  ;;  %v4420_v35 = vpop.eup %4419 }
 0x3fa   :  { %v2311_v47 = vpop.f32.mrf.mxu0 }
 0x3fb   :  { %3796 = vrot.lane.b32.xlu0 %v3795_v9, %s4434_s20  ;;  %v3761_v9 = vld [vmem:[%s6870_s3 + $0x10] sm:$0xff]  ;;  %v4422_v33 = vpop.eup %4421 }
 0x3fc   :  { %v2468_v14 = vpop.f32.mrf.mxu2  ;;  %3021 = vmatpush.bf16.msrb.mxu0 %v3761_v9 }
 0x3fd   :  { %v2469_v56 = vadd.f32 %v2468_v14, %v2380_v23  ;;  %v2397_v23 = vpop.f32.mrf.mxu1  ;;  %v2389_v14 = vadd.f32 %v6517_v4, %v2300_v53 }
 0x3fe   :  { %2607 = vmatmul.f32.gmra.mxu3 %v4412_v11 }
 0x3ff   :  { %v6544_v8 = vadd.f32 %v2557_v48, %v2469_v56  ;;  %v2303_v56 = vadd.f32 %v6522_v1, %v6335_v42  ;;  %v2306_v42 = vadd.f32 %v6542_v57, %v6344_v43  ;;  %v3760_v43 = vld [vmem:[%s6870_s3 + $0x8] sm:$0xff] }
 0x400   :  { %3022 = vmatpush.bf16.msrb.mxu0 %v3760_v43 }
 0x401   :  { %2518 = vmatmul.f32.gmra.mxu2 %v4414_v20  ;;  %v3800_v26 = vpack.i.bf16 %v6544_v8, %v6527_v55  ;;  %v2560_v28 = vpop.f32.mrf.mxu3  ;;  %v2392_v5 = vadd.f32 %v6536_v7, %v2303_v56  ;;  %v2395_v12 = vadd.f32 %v2394_v10, %v2306_v42 }
 0x403   :  { %3801 = vrot.lane.b32.xlu1 %v3800_v26, %s4435_s21 }
 0x404   :  { %v2471_v2 = vpop.f32.mrf.mxu2 }
 0x405   :  { %v2472_v46 = vadd.f32 %v2471_v2, %v2383_v51  ;;  %v2400_v4 = vpop.f32.mrf.mxu1  ;;  %v2314_v51 = vpop.f32.mrf.mxu0 }
 0x406   :  { %2610 = vmatmul.f32.gmra.mxu3 %v4416_v22 }
 0x407   :  { %v6554_v31 = vadd.f32 %v2560_v28, %v2472_v46 }
 0x409   :  { %v2883_v25 = vpack.c.bf16 %v6554_v31, %v6544_v8  ;;  %2521 = vmatmul.f32.gmra.mxu2 %v4418_v38  ;;  %v3810_v60 = vpack.i.bf16 %v6554_v31, %v6544_v8  ;;  %v2563_v13 = vpop.f32.mrf.mxu3  ;;  %v2398_v38 = vadd.f32 %v2397_v23, %v2309_v30  ;;  %v2315_v23 = vadd.f32 %v2314_v51, %v6371_v34 }
 0x40b   :  { %3811 = vrot.lane.b32.xlu2 %v3810_v60, %s4434_s20  ;;  %3662 = vmatmul.msk.bf16.vlgmr.msrb.gmra.mxu1 %vm2819_vm2, %v2883_v25 }
 0x40c   :  { %3806 = vrot.lane.b32.xlu1 %v3800_v26, %s4433_s17  ;;  %v2474_v3 = vpop.f32.mrf.mxu2 }
 0x40d   :  { %v2475_v49 = vadd.f32 %v2474_v3, %v2386_v32  ;;  %v2403_v41 = vpop.f32.mrf.mxu1  ;;  %v2317_v22 = vpop.f32.mrf.mxu0  ;;  %v2312_v32 = vadd.f32 %v2311_v47, %v6362_v61 }
 0x40e   :  { %2613 = vmatmul.f32.gmra.mxu3 %v4420_v35  ;;  %v2318_v34 = vadd.f32 %v2317_v22, %v6380_v6 }
 0x40f   :  { %v6566_v52 = vadd.f32 %v2563_v13, %v2475_v49  ;;  %v2401_v35 = vadd.f32 %v2400_v4, %v2312_v32  ;;  %v3759_v4 = vld [vmem:[%s6870_s3] sm:$0xff] }
 0x410   :  { %3023 = vmatpush.bf16.msrb.mxu0 %v3759_v4 }
 0x411   :  { %2524 = vmatmul.f32.gmra.mxu2 %v4422_v33  ;;  %v3815_v48 = vpack.i.bf16 %v6566_v52, %v6554_v31  ;;  %v2566_v44 = vpop.f32.mrf.mxu3 }
 0x413   :  { %3816 = vrot.lane.b32.xlu2 %v3815_v48, %s4435_s21  ;;  %3821 = vrot.lane.b32.xlu0 %v3815_v48, %s4433_s17 }
 0x414   :  { %v2477_v19 = vpop.f32.mrf.mxu2 }
 0x415   :  { %v2478_v37 = vadd.f32 %v2477_v19, %v2389_v14  ;;  %v2406_v60 = vpop.f32.mrf.mxu1  ;;  %v2320_v3 = vpop.f32.mrf.mxu0 }
 0x417   :  { %v6578_v45 = vadd.f32 %v2566_v44, %v2478_v37  ;;  %v2404_v44 = vadd.f32 %v2403_v41, %v2315_v23 }
 0x419   :  { %v2885_v36 = vpack.c.bf16 %v6578_v45, %v6566_v52  ;;  %v3825_v11 = vpack.i.bf16 %v6578_v45, %v6566_v52  ;;  %v2569_v20 = vpop.f32.mrf.mxu3 }
 0x41b   :  { %3663 = vmatmul.msk.bf16.gmra.mxu1 %vm2819_vm2, %v2885_v36  ;;  %3826 = vrot.lane.b32.xlu1 %v3825_v11, %s4434_s20 }
 0x41c   :  { %v2480_v26 = vpop.f32.mrf.mxu2 }
 0x41d   :  { %v2481_v28 = vadd.f32 %v2480_v26, %v2392_v5  ;;  %v2409_v14 = vpop.f32.mrf.mxu1  ;;  %v2323_v19 = vpop.f32.mrf.mxu0  ;;  %v2407_v26 = vadd.f32 %v2406_v60, %v2318_v34 }
 0x41f   :  { %v6589_v1 = vadd.f32 %v2569_v20, %v2481_v28 }
 0x421   :  { %v3830_v2 = vpack.i.bf16 %v6589_v1, %v6578_v45  ;;  %v2572_v7 = vpop.f32.mrf.mxu3 }
 0x423   :  { %3831 = vrot.lane.b32.xlu2 %v3830_v2, %s4435_s21  ;;  %3836 = vrot.lane.b32.xlu0 %v3830_v2, %s4433_s17  ;;  %v2321_v2 = vadd.f32 %v2320_v3, %v6387_v62 }
 0x424   :  { %v2483_v46 = vpop.f32.mrf.mxu2 }
 0x425   :  { %v2484_v50 = vadd.f32 %v2483_v46, %v2395_v12  ;;  %v2412_v20 = vpop.f32.mrf.mxu1  ;;  %v2326_v42 = vpop.f32.mrf.mxu0  ;;  %v2410_v46 = vadd.f32 %v2409_v14, %v2321_v2 }
 0x426   :  { %v2327_v3 = vadd.f32 %v2326_v42, %v6404_v63 }
 0x427   :  { %v6596_v39 = vadd.f32 %v2572_v7, %v2484_v50 }
 0x429   :  { %v2887_v57 = vpack.c.bf16 %v6596_v39, %v6589_v1  ;;  %v3840_v10 = vpack.i.bf16 %v6596_v39, %v6589_v1  ;;  %v2575_v59 = vpop.f32.mrf.mxu3 }
 0x42b   :  { %3664 = vmatmul.msk.bf16.gmra.mxu1 %vm2819_vm2, %v2887_v57  ;;  %3841 = vrot.lane.b32.xlu1 %v3840_v10, %s4434_s20  ;;  %v2324_v57 = vadd.f32 %v2323_v19, %v6394_v0 }
 0x42c   :  { %v2486_v58 = vpop.f32.mrf.mxu2 }
 0x42d   :  { %v2487_v25 = vadd.f32 %v2486_v58, %v2398_v38  ;;  %v2415_v30 = vpop.f32.mrf.mxu1  ;;  %v2329_v62 = vpop.f32.mrf.mxu0 }
 0x42f   :  { %v6608_v13 = vadd.f32 %v2575_v59, %v2487_v25  ;;  %v2413_v59 = vadd.f32 %v2412_v20, %v2324_v57 }
 0x431   :  { %v3845_v49 = vpack.i.bf16 %v6608_v13, %v6596_v39  ;;  %v2578_v53 = vpop.f32.mrf.mxu3 }
 0x433   :  { %3846 = vrot.lane.b32.xlu2 %v3845_v49, %s4435_s21  ;;  %3851 = vrot.lane.b32.xlu0 %v3845_v49, %s4433_s17 }
 0x434   :  { %v2489_v9 = vpop.f32.mrf.mxu2 }
 0x435   :  { %v2490_v33 = vadd.f32 %v2489_v9, %v2401_v35  ;;  %v2418_v32 = vpop.f32.mrf.mxu1  ;;  %v2332_v0 = vpop.f32.mrf.mxu0  ;;  %v2416_v9 = vadd.f32 %v2415_v30, %v2327_v3 }
 0x437   :  { %v6615_v48 = vadd.f32 %v2578_v53, %v2490_v33 }
 0x439   :  { %v2889_v61 = vpack.c.bf16 %v6615_v48, %v6608_v13  ;;  %v3855_v47 = vpack.i.bf16 %v6615_v48, %v6608_v13  ;;  %v2581_v37 = vpop.f32.mrf.mxu3 }
 0x43b   :  { %3665 = vmatmul.msk.bf16.gmra.mxu1 %vm2819_vm2, %v2889_v61  ;;  %3856 = vrot.lane.b32.xlu1 %v3855_v47, %s4434_s20  ;;  %v2330_v61 = vadd.f32 %v2329_v62, %v6414_v27 }
 0x43c   :  { %v2492_v56 = vpop.f32.mrf.mxu2 }
 0x43d   :  { %v2493_v36 = vadd.f32 %v2492_v56, %v2404_v44  ;;  %v2421_v47 = vpop.f32.mrf.mxu1  ;;  %v2419_v19 = vadd.f32 %v2418_v32, %v2330_v61 }
 0x43f   :  { %v6624_v11 = vadd.f32 %v2581_v37, %v2493_v36  ;;  %v2335_v37 = vpop.f32.mrf.mxu0 }
 0x441   :  { %v3860_v5 = vpack.i.bf16 %v6624_v11, %v6615_v48  ;;  %v2584_v51 = vpop.f32.mrf.mxu3 }
 0x443   :  { %3861 = vrot.lane.b32.xlu2 %v3860_v5, %s4435_s21  ;;  %3866 = vrot.lane.b32.xlu0 %v3860_v5, %s4433_s17  ;;  %v2333_v5 = vadd.f32 %v2332_v0, %v6423_v16  ;;  %v2336_v16 = vadd.f32 %v2335_v37, %v6435_v54 }
 0x444   :  { %v2495_v28 = vpop.f32.mrf.mxu2 }
 0x445   :  { %v2496_v6 = vadd.f32 %v2495_v28, %v2407_v26  ;;  %v2422_v28 = vadd.f32 %v2421_v47, %v2333_v5 }
 0x447   :  { %v6634_v12 = vadd.f32 %v2584_v51, %v2496_v6  ;;  %v2424_v51 = vpop.f32.mrf.mxu1  ;;  %v2338_v2 = vpop.f32.mrf.mxu0 }
 0x449   :  { %v2891_v7 = vpack.c.bf16 %v6634_v12, %v6624_v11  ;;  %v3870_v41 = vpack.i.bf16 %v6634_v12, %v6624_v11  ;;  %v2587_v50 = vpop.f32.mrf.mxu3 }
 0x44b   :  { %3666 = vmatmul.msk.bf16.gmra.mxu1 %vm2819_vm2, %v2891_v7  ;;  %3871 = vrot.lane.b32.xlu1 %v3870_v41, %s4434_s20 }
 0x44c   :  { %v2498_v22 = vpop.f32.mrf.mxu2 }
 0x44d   :  { %v2499_v43 = vadd.f32 %v2498_v22, %v2410_v46 }
 0x44f   :  { %v6643_v10 = vadd.f32 %v2587_v50, %v2499_v43  ;;  %v2425_v43 = vadd.f32 %v2424_v51, %v2336_v16 }
 0x451   :  { %v3875_v38 = vpack.i.bf16 %v6643_v10, %v6634_v12  ;;  %v2590_v58 = vpop.f32.mrf.mxu3 }
 0x453   :  { %3876 = vrot.lane.b32.xlu2 %v3875_v38, %s4435_s21  ;;  %3881 = vrot.lane.b32.xlu0 %v3875_v38, %s4433_s17 }
 0x454   :  { %v2501_v25 = vpop.f32.mrf.mxu2 }
 0x455   :  { %v2502_v60 = vadd.f32 %v2501_v25, %v2413_v59  ;;  %v2427_v59 = vpop.f32.mrf.mxu1 }
 0x457   :  { %v6650_v49 = vadd.f32 %v2590_v58, %v2502_v60 }
 0x459   :  { %v2893_v35 = vpack.c.bf16 %v6650_v49, %v6643_v10  ;;  %v3885_v53 = vpack.i.bf16 %v6650_v49, %v6643_v10  ;;  %v2593_v33 = vpop.f32.mrf.mxu3 }
 0x45b   :  { %3667 = vmatmul.msk.bf16.gmra.mxu1 %vm2819_vm2, %v2893_v35  ;;  %3886 = vrot.lane.b32.xlu1 %v3885_v53, %s4434_s20  ;;  %v2339_v35 = vadd.f32 %v2338_v2, %v6444_v24  ;;  %v2341_v53 = vpop.f32.mrf.mxu0 }
 0x45c   :  { %v2504_v23 = vpop.f32.mrf.mxu2 }
 0x45d   :  { %v2505_v14 = vadd.f32 %v2504_v23, %v2416_v9  ;;  %v2428_v24 = vadd.f32 %v2427_v59, %v2339_v35 }
 0x45f   :  { %v6659_v63 = vadd.f32 %v2593_v33, %v2505_v14 }
 0x461   :  { %v3890_v44 = vpack.i.bf16 %v6659_v63, %v6650_v49  ;;  %v2596_v56 = vpop.f32.mrf.mxu3 }
 0x463   :  { %3891 = vrot.lane.b32.xlu2 %v3890_v44, %s4435_s21  ;;  %3896 = vrot.lane.b32.xlu0 %v3890_v44, %s4433_s17  ;;  %v2344_v51 = vpop.f32.mrf.mxu0 }
 0x464   :  { %v2507_v36 = vpop.f32.mrf.mxu2 }
 0x465   :  { %v2508_v34 = vadd.f32 %v2507_v36, %v2419_v19  ;;  %v3792_v4 = vpop.permute.xlu0 %3791  ;;  %v3812_v14 = vpop.permute.xlu2 %3811 }
 0x466   :  { %v3794_v30 = vunpack.i.h.bf16 %v3792_v4  ;;  %v3793_v22 = vunpack.i.l.bf16 %v3792_v4  ;;  %v2430_v36 = vpop.f32.mrf.mxu1  ;;  %v2342_v4 = vadd.f32 %v2341_v53, %v6455_v17  ;;  %v3814_v2 = vunpack.i.h.bf16 %v3812_v14 }
 0x467   :  { %v6666_v20 = vadd.f32 %v2596_v56, %v2508_v34 }
 0x468   :  { %v2821_v60 = vsel %vm2819_vm2, %v6511_v15, %v3794_v30  ;;  %v2820_v32 = vsel %vm2819_vm2, %v6485_v18, %v3793_v22 }
 0x469   :  { %v2895_v27 = vpack.c.bf16 %v6666_v20, %v6659_v63  ;;  %v3900_v26 = vpack.i.bf16 %v6666_v20, %v6659_v63  ;;  %v2599_v42 = vpop.f32.mrf.mxu3 }
 0x46b   :  { %3668 = vmatmul.msk.bf16.gmra.mxu1 %vm2819_vm2, %v2895_v27  ;;  %3901 = vrot.lane.b32.xlu1 %v3900_v26, %s4434_s20 }
 0x46c   :  { %v2510_v6 = vpop.f32.mrf.mxu2 }
 0x46d   :  { %v2511_v7 = vadd.f32 %v2510_v6, %v2422_v28  ;;  %v3797_v46 = vpop.permute.xlu0 %3796  ;;  %v3817_v16 = vpop.permute.xlu2 %3816 }
 0x46e   :  { %v3799_v57 = vunpack.i.h.bf16 %v3797_v46  ;;  %v3798_v62 = vunpack.i.l.bf16 %v3797_v46  ;;  %v2431_v46 = vadd.f32 %v2430_v36, %v2342_v4 }
 0x46f   :  { %v6675_v41 = vadd.f32 %v2599_v42, %v2511_v7  ;;  %v3813_v7 = vunpack.i.l.bf16 %v3812_v14 }
 0x470   :  { %v2841_v9 = vsel %vm2840_vm3, %v2820_v32, %v3798_v62  ;;  %v2842_v33 = vsel %vm2840_vm3, %v2821_v60, %v3799_v57 }
 0x471   :  { %v3905_v50 = vpack.i.bf16 %v6675_v41, %v6666_v20  ;;  %v2602_v38 = vpop.f32.mrf.mxu3 }
 0x473   :  { %3906 = vrot.lane.b32.xlu2 %v3905_v50, %s4435_s21  ;;  %3911 = vrot.lane.b32.xlu0 %v3905_v50, %s4433_s17 }
 0x474   :  { %v2513_v58 = vpop.f32.mrf.mxu2 }
 0x475   :  { %v2514_v54 = vadd.f32 %v2513_v58, %v2425_v43  ;;  %v3802_v25 = vpop.permute.xlu1 %3801  ;;  %v3818_v43 = vunpack.i.l.bf16 %v3817_v16  ;;  %v2433_v58 = vpop.f32.mrf.mxu1 }
 0x476   :  { %v3804_v3 = vunpack.i.h.bf16 %v3802_v25  ;;  %v3803_v0 = vunpack.i.l.bf16 %v3802_v25 }
 0x477   :  { %v6688_v23 = vadd.f32 %v2602_v38, %v2514_v54 }
 0x478   :  { %v2862_v61 = vsel %vm2861_vm4, %v2841_v9, %v3803_v0  ;;  %v2863_v47 = vsel %vm2861_vm4, %v2842_v33, %v3804_v3  ;;  %v2347_v3 = vpop.f32.mrf.mxu0 }
 0x479   :  { %v2882_v15 = vpack.c.bf16 %v2863_v47, %v2862_v61  ;;  %v2897_v18 = vpack.c.bf16 %v6688_v23, %v6675_v41  ;;  %v3915_v44 = vpack.i.bf16 %v6688_v23, %v6675_v41  ;;  %v2605_v19 = vpop.f32.mrf.mxu3  ;;  %v2348_v33 = vadd.f32 %v2347_v3, %v6478_v40 }
 0x47b   :  { %3669 = vmatmul.msk.bf16.gmra.mxu1 %vm2819_vm2, %v2897_v18  ;;  %3916 = vrot.lane.b32.xlu1 %v3915_v44, %s4434_s20 }
 0x47c   :  { %3024 = vmatmul.bf16.vlgmr.msrb.gmra.mxu0 %v2882_v15  ;;  %v2516_v37 = vpop.f32.mrf.mxu2 }
 0x47d   :  { %v2517_v56 = vadd.f32 %v2516_v37, %v2428_v24  ;;  %v2436_v24 = vpop.f32.mrf.mxu1 }
 0x47e   :  { %v3807_v34 = vpop.permute.xlu1 %3806  ;;  %v2437_v37 = vadd.f32 %v2436_v24, %v2348_v33 }
 0x47f   :  { %v2606_v5 = vadd.f32 %v2605_v19, %v2517_v56  ;;  %v3809_v27 = vunpack.i.h.bf16 %v3807_v34  ;;  %v3808_v26 = vunpack.i.l.bf16 %v3807_v34  ;;  %v3832_v19 = vpop.permute.xlu2 %3831 }
 0x481   :  { %v2823_v28 = vsel %vm2819_vm2, %v6527_v55, %v3809_v27  ;;  %v2822_v42 = vsel %vm2819_vm2, %v6513_v29, %v3808_v26  ;;  %v3920_v6 = vpack.i.bf16 %v2606_v5, %v6688_v23  ;;  %v2608_v17 = vpop.f32.mrf.mxu3  ;;  %v3819_v55 = vunpack.i.h.bf16 %v3817_v16 }
 0x482   :  { %v2843_v30 = vsel %vm2840_vm3, %v2822_v42, %v3813_v7  ;;  %v2844_v22 = vsel %vm2840_vm3, %v2823_v28, %v3814_v2  ;;  %v2345_v29 = vadd.f32 %v2344_v51, %v6469_v21  ;;  %v3833_v27 = vunpack.i.l.bf16 %v3832_v19 }
 0x483   :  { %3921 = vrot.lane.b32.xlu2 %v3920_v6, %s4435_s21  ;;  %3926 = vrot.lane.b32.xlu0 %v3920_v6, %s4433_s17  ;;  %v2864_v38 = vsel %vm2861_vm4, %v2843_v30, %v3818_v43  ;;  %v2865_v59 = vsel %vm2861_vm4, %v2844_v22, %v3819_v55 }
 0x484   :  { %v2519_v50 = vpop.f32.mrf.mxu2  ;;  %v2884_v60 = vpack.c.bf16 %v2865_v59, %v2864_v38  ;;  %v2434_v32 = vadd.f32 %v2433_v58, %v2345_v29 }
 0x485   :  { %v2520_v57 = vadd.f32 %v2519_v50, %v2431_v46  ;;  %v3822_v0 = vpop.permute.xlu0 %3821 }
 0x486   :  { %v3824_v14 = vunpack.i.h.bf16 %v3822_v0  ;;  %v3823_v61 = vunpack.i.l.bf16 %v3822_v0 }
 0x487   :  { %v2609_v62 = vadd.f32 %v2608_v17, %v2520_v57 }
 0x488   :  { %v2825_v56 = vsel %vm2819_vm2, %v6554_v31, %v3824_v14  ;;  %v2824_v36 = vsel %vm2819_vm2, %v6544_v8, %v3823_v61 }
 0x489   :  { %v2899_v54 = vpack.c.bf16 %v2609_v62, %v2606_v5  ;;  %v3930_v25 = vpack.i.bf16 %v2609_v62, %v2606_v5  ;;  %v2611_v53 = vpop.f32.mrf.mxu3  ;;  %v3834_v5 = vunpack.i.h.bf16 %v3832_v19 }
 0x48b   :  { %3670 = vmatmul.msk.bf16.gmra.mxu1 %vm2819_vm2, %v2899_v54  ;;  %3931 = vrot.lane.b32.xlu1 %v3930_v25, %s4434_s20 }
 0x48c   :  { %3029 = vmatmul.bf16.gmra.mxu0 %v2884_v60  ;;  %v2522_v35 = vpop.f32.mrf.mxu2 }
 0x48d   :  { %v2523_v21 = vadd.f32 %v2522_v35, %v2434_v32  ;;  %v3827_v9 = vpop.permute.xlu1 %3826  ;;  %v3847_v30 = vpop.permute.xlu2 %3846 }
 0x48e   :  { %v3829_v15 = vunpack.i.h.bf16 %v3827_v9  ;;  %v3828_v18 = vunpack.i.l.bf16 %v3827_v9  ;;  %v3849_v29 = vunpack.i.h.bf16 %v3847_v30 }
 0x48f   :  { %v2612_v47 = vadd.f32 %v2611_v53, %v2523_v21 }
 0x490   :  { %v2845_v34 = vsel %vm2840_vm3, %v2824_v36, %v3828_v18  ;;  %v2846_v40 = vsel %vm2840_vm3, %v2825_v56, %v3829_v15 }
 0x491   :  { %v3935_v44 = vpack.i.bf16 %v2612_v47, %v2609_v62  ;;  %v2614_v51 = vpop.f32.mrf.mxu3  ;;  %v2866_v42 = vsel %vm2861_vm4, %v2845_v34, %v3833_v27  ;;  %v2867_v6 = vsel %vm2861_vm4, %v2846_v40, %v3834_v5  ;;  %v3848_v62 = vunpack.i.l.bf16 %v3847_v30 }
 0x492   :  { %v2886_v2 = vpack.c.bf16 %v2867_v6, %v2866_v42 }
 0x493   :  { %3936 = vrot.lane.b32.xlu2 %v3935_v44, %s4435_s21 }
 0x494   :  { %v2525_v4 = vpop.f32.mrf.mxu2 }
 0x495   :  { %v2526_v26 = vadd.f32 %v2525_v4, %v2437_v37  ;;  %v3837_v8 = vpop.permute.xlu0 %3836 }
 0x496   :  { %v3839_v16 = vunpack.i.h.bf16 %v3837_v8  ;;  %v3838_v46 = vunpack.i.l.bf16 %v3837_v8 }
 0x497   :  { %v2615_v28 = vadd.f32 %v2614_v51, %v2526_v26 }
 0x498   :  { %v2827_v22 = vsel %vm2819_vm2, %v6578_v45, %v3839_v16  ;;  %v2826_v55 = vsel %vm2819_vm2, %v6566_v52, %v3838_v46  ;;  %v3084_v46 = vpop.f32.mrf.mxu1 }
 0x499   :  { %v2901_v31 = vpack.c.bf16 %v2615_v28, %v2612_v47 }
 0x49b   :  { %3671 = vmatmul.msk.bf16.gmra.mxu1 %vm2819_vm2, %v2901_v31 }
 0x49c   :  { %3034 = vmatmul.bf16.gmra.mxu0 %v2886_v2 }
 0x49d   :  { %v3842_v7 = vpop.permute.xlu1 %3841  ;;  %v3862_v0 = vpop.permute.xlu2 %3861 }
 0x49e   :  { %v3844_v17 = vunpack.i.h.bf16 %v3842_v7  ;;  %v3843_v50 = vunpack.i.l.bf16 %v3842_v7  ;;  %v3864_v9 = vunpack.i.h.bf16 %v3862_v0  ;;  %v3863_v33 = vunpack.i.l.bf16 %v3862_v0 }
 0x4a0   :  { %v2847_v43 = vsel %vm2840_vm3, %v2826_v55, %v3843_v50  ;;  %v2848_v57 = vsel %vm2840_vm3, %v2827_v22, %v3844_v17 }
 0x4a1   :  { %v2868_v38 = vsel %vm2861_vm4, %v2847_v43, %v3848_v62  ;;  %v2869_v59 = vsel %vm2861_vm4, %v2848_v57, %v3849_v29  ;;  %v3086_v29 = vpop.f32.mrf.mxu1 }
 0x4a2   :  { %v2888_v58 = vpack.c.bf16 %v2869_v59, %v2868_v38 }
 0x4a5   :  { %v3852_v54 = vpop.permute.xlu0 %3851 }
 0x4a6   :  { %v3854_v60 = vunpack.i.h.bf16 %v3852_v54  ;;  %v3853_v32 = vunpack.i.l.bf16 %v3852_v54 }
 0x4a8   :  { %v2829_v52 = vsel %vm2819_vm2, %v6596_v39, %v3854_v60  ;;  %v2828_v35 = vsel %vm2819_vm2, %v6589_v1, %v3853_v32 }
 0x4ac   :  { %3039 = vmatmul.bf16.gmra.mxu0 %v2888_v58 }
 0x4ad   :  { %v3857_v25 = vpop.permute.xlu1 %3856  ;;  %v3877_v37 = vpop.permute.xlu2 %3876 }
 0x4ae   :  { %v3859_v45 = vunpack.i.h.bf16 %v3857_v25  ;;  %v3858_v3 = vunpack.i.l.bf16 %v3857_v25  ;;  %v3879_v40 = vunpack.i.h.bf16 %v3877_v37  ;;  %v3878_v4 = vunpack.i.l.bf16 %v3877_v37 }
 0x4b0   :  { %v2849_v53 = vsel %vm2840_vm3, %v2828_v35, %v3858_v3  ;;  %v2850_v21 = vsel %vm2840_vm3, %v2829_v52, %v3859_v45  ;;  %v3089_v52 = vpop.f32.mrf.mxu1 }
 0x4b1   :  { %v2870_v14 = vsel %vm2861_vm4, %v2849_v53, %v3863_v33  ;;  %v2871_v61 = vsel %vm2861_vm4, %v2850_v21, %v3864_v9 }
 0x4b2   :  { %v2890_v47 = vpack.c.bf16 %v2871_v61, %v2870_v14 }
 0x4b5   :  { %v3867_v15 = vpop.permute.xlu0 %3866 }
 0x4b6   :  { %v3869_v44 = vunpack.i.h.bf16 %v3867_v15  ;;  %v3868_v24 = vunpack.i.l.bf16 %v3867_v15 }
 0x4b8   :  { %v2831_v1 = vsel %vm2819_vm2, %v6615_v48, %v3869_v44  ;;  %v2830_v56 = vsel %vm2819_vm2, %v6608_v13, %v3868_v24  ;;  %v3091_v61 = vpop.f32.mrf.mxu1 }
 0x4bc   :  { %3044 = vmatmul.bf16.gmra.mxu0 %v2890_v47 }
 0x4bd   :  { %v3872_v18 = vpop.permute.xlu1 %3871  ;;  %v3892_v2 = vpop.permute.xlu2 %3891 }
 0x4be   :  { %v3874_v39 = vunpack.i.h.bf16 %v3872_v18  ;;  %v3873_v19 = vunpack.i.l.bf16 %v3872_v18  ;;  %v3894_v17 = vunpack.i.h.bf16 %v3892_v2  ;;  %v3893_v50 = vunpack.i.l.bf16 %v3892_v2 }
 0x4c0   :  { %v2851_v36 = vsel %vm2840_vm3, %v2830_v56, %v3873_v19  ;;  %v2852_v34 = vsel %vm2840_vm3, %v2831_v1, %v3874_v39 }
 0x4c1   :  { %v2872_v5 = vsel %vm2861_vm4, %v2851_v36, %v3878_v4  ;;  %v2873_v27 = vsel %vm2861_vm4, %v2852_v34, %v3879_v40 }
 0x4c2   :  { %v2892_v26 = vpack.c.bf16 %v2873_v27, %v2872_v5 }
 0x4c5   :  { %v3882_v51 = vpop.permute.xlu0 %3881 }
 0x4c6   :  { %v3884_v42 = vunpack.i.h.bf16 %v3882_v51  ;;  %v3883_v6 = vunpack.i.l.bf16 %v3882_v51 }
 0x4c8   :  { %v2833_v13 = vsel %vm2819_vm2, %v6634_v12, %v3884_v42  ;;  %v2832_v8 = vsel %vm2819_vm2, %v6624_v11, %v3883_v6 }
 0x4cc   :  { %3049 = vmatmul.bf16.gmra.mxu0 %v2892_v26 }
 0x4cd   :  { %v3887_v28 = vpop.permute.xlu1 %3886  ;;  %v3907_v59 = vpop.permute.xlu2 %3906 }
 0x4ce   :  { %v3889_v48 = vunpack.i.h.bf16 %v3887_v28  ;;  %v3888_v31 = vunpack.i.l.bf16 %v3887_v28  ;;  %v3909_v32 = vunpack.i.h.bf16 %v3907_v59  ;;  %v3908_v45 = vunpack.i.l.bf16 %v3907_v59 }
 0x4d0   :  { %v2853_v7 = vsel %vm2840_vm3, %v2832_v8, %v3888_v31  ;;  %v2854_v16 = vsel %vm2840_vm3, %v2833_v13, %v3889_v48 }
 0x4d1   :  { %v2874_v30 = vsel %vm2861_vm4, %v2853_v7, %v3893_v50  ;;  %v2875_v22 = vsel %vm2861_vm4, %v2854_v16, %v3894_v17  ;;  %v3776_v50 = vld [vmem:[%s6872_s5 + $0x38] sm:$0xff] }
 0x4d2   :  { %v2894_v55 = vpack.c.bf16 %v2875_v22, %v2874_v30  ;;  %3265 = vmatpush.bf16.msra.mxu2 %v3776_v50 }
 0x4d5   :  { %v3897_v43 = vpop.permute.xlu0 %3896 }
 0x4d6   :  { %v3899_v12 = vunpack.i.h.bf16 %v3897_v43  ;;  %v3898_v62 = vunpack.i.l.bf16 %v3897_v43 }
 0x4d8   :  { %v2835_v58 = vsel %vm2819_vm2, %v6650_v49, %v3899_v12  ;;  %v2834_v54 = vsel %vm2819_vm2, %v6643_v10, %v3898_v62 }
 0x4dc   :  { %3054 = vmatmul.bf16.gmra.mxu0 %v2894_v55 }
 0x4dd   :  { %v3902_v57 = vpop.permute.xlu1 %3901  ;;  %v3922_v10 = vpop.permute.xlu2 %3921 }
 0x4de   :  { %v3904_v38 = vunpack.i.h.bf16 %v3902_v57  ;;  %v3903_v11 = vunpack.i.l.bf16 %v3902_v57  ;;  %v3924_v24 = vunpack.i.h.bf16 %v3922_v10  ;;  %v3923_v39 = vunpack.i.l.bf16 %v3922_v10 }
 0x4e0   :  { %v2855_v25 = vsel %vm2840_vm3, %v2834_v54, %v3903_v11  ;;  %v2856_v60 = vsel %vm2840_vm3, %v2835_v58, %v3904_v38 }
 0x4e1   :  { %v2876_v3 = vsel %vm2861_vm4, %v2855_v25, %v3908_v45  ;;  %v2877_v0 = vsel %vm2861_vm4, %v2856_v60, %v3909_v32  ;;  %v3775_v25 = vld [vmem:[%s6872_s5 + $0x30] sm:$0xff] }
 0x4e2   :  { %v2896_v35 = vpack.c.bf16 %v2877_v0, %v2876_v3  ;;  %3266 = vmatpush.bf16.msra.mxu2 %v3775_v25 }
 0x4e5   :  { %v3912_v53 = vpop.permute.xlu0 %3911 }
 0x4e6   :  { %v3914_v9 = vunpack.i.h.bf16 %v3912_v53  ;;  %v3913_v49 = vunpack.i.l.bf16 %v3912_v53 }
 0x4e8   :  { %v2837_v47 = vsel %vm2819_vm2, %v6666_v20, %v3914_v9  ;;  %v2836_v15 = vsel %vm2819_vm2, %v6659_v63, %v3913_v49  ;;  %v6775_v20 = vld [vmem:[%s6871_s4] ss:$0 sm:$0xff]  ;;  %v3094_v63 = vpop.f32.mrf.mxu1 }
 0x4ec   :  { %3059 = vmatmul.bf16.gmra.mxu0 %v2896_v35 }
 0x4ed   :  { %v3917_v21 = vpop.permute.xlu1 %3916  ;;  %v3937_v28 = vpop.permute.xlu2 %3936 }
 0x4ee   :  { %v3919_v33 = vunpack.i.h.bf16 %v3917_v21  ;;  %v3918_v14 = vunpack.i.l.bf16 %v3917_v21  ;;  %v3939_v7 = vunpack.i.h.bf16 %v3937_v28  ;;  %v3938_v16 = vunpack.i.l.bf16 %v3937_v28 }
 0x4f0   :  { %v2857_v18 = vsel %vm2840_vm3, %v2836_v15, %v3918_v14  ;;  %v2858_v44 = vsel %vm2840_vm3, %v2837_v47, %v3919_v33  ;;  %v3096_v30 = vpop.f32.mrf.mxu1  ;;  %v3774_v47 = vld [vmem:[%s6872_s5 + $0x28] sm:$0xff] }
 0x4f1   :  { %v2878_v19 = vsel %vm2861_vm4, %v2857_v18, %v3923_v39  ;;  %v2879_v37 = vsel %vm2861_vm4, %v2858_v44, %v3924_v24  ;;  %3267 = vmatpush.bf16.msra.mxu2 %v3774_v47 }
 0x4f2   :  { %v2898_v56 = vpack.c.bf16 %v2879_v37, %v2878_v19  ;;  %v3773_v37 = vld [vmem:[%s6872_s5 + $0x20] sm:$0xff] }
 0x4f5   :  { %v3927_v36 = vpop.permute.xlu0 %3926  ;;  %3268 = vmatpush.bf16.msra.mxu2 %v3773_v37 }
 0x4f6   :  { %v3929_v40 = vunpack.i.h.bf16 %v3927_v36  ;;  %v3928_v4 = vunpack.i.l.bf16 %v3927_v36 }
 0x4f8   :  { %v2839_v6 = vsel %vm2819_vm2, %v6688_v23, %v3929_v40  ;;  %v2838_v48 = vsel %vm2819_vm2, %v6675_v41, %v3928_v4  ;;  %v3778_v23 = vld [vmem:[%s6872_s5 + $0x48] sm:$0xff]  ;;  %v3099_v57 = vpop.f32.mrf.mxu1 }
 0x4f9   :  { %v3025_v1 = vpop.f32.mrf.mxu0  ;;  %3284 = vmatpush.bf16.msra.mxu3 %v3778_v23 }
 0x4fa   :  { %v3026_v5 = vadd.f32 %v6775_v20, %v3025_v1 }
 0x4fc   :  { %3064 = vmatmul.bf16.gmra.mxu0 %v2898_v56  ;;  %v3085_v31 = vadd.f32 %v3084_v46, %v3026_v5 }
 0x4fd   :  { %v3932_v34 = vpop.permute.xlu1 %3931 }
 0x4fe   :  { %v3934_v27 = vunpack.i.h.bf16 %v3932_v34  ;;  %v3933_v26 = vunpack.i.l.bf16 %v3932_v34 }
 0x500   :  { %v2859_v2 = vsel %vm2840_vm3, %v2838_v48, %v3933_v26  ;;  %v2860_v13 = vsel %vm2840_vm3, %v2839_v6, %v3934_v27  ;;  %v3101_v54 = vpop.f32.mrf.mxu1 }
 0x501   :  { %v3027_v51 = vpop.f32.mrf.mxu0  ;;  %v2880_v41 = vsel %vm2861_vm4, %v2859_v2, %v3938_v16  ;;  %v2881_v46 = vsel %vm2861_vm4, %v2860_v13, %v3939_v7  ;;  %v3772_v13 = vld [vmem:[%s6872_s5 + $0x18] sm:$0xff] }
 0x502   :  { %v3028_v42 = vadd.f32 %v6775_v20, %v3027_v51  ;;  %v2900_v55 = vpack.c.bf16 %v2881_v46, %v2880_v41  ;;  %3269 = vmatpush.bf16.msra.mxu2 %v3772_v13 }
 0x504   :  { %v3087_v8 = vadd.f32 %v3086_v29, %v3028_v42 }
 0x506   :  { %v3134_v17 = vmax.f32 %v3085_v31, %v3087_v8  ;;  %v3777_v8 = vld [vmem:[%s6872_s5 + $0x40] sm:$0xff] }
 0x507   :  { %3285 = vmatpush.bf16.msra.mxu3 %v3777_v8 }
 0x508   :  { %v3104_v32 = vpop.f32.mrf.mxu1 }
 0x509   :  { %v3030_v22 = vpop.f32.mrf.mxu0 }
 0x50a   :  { %v3031_v43 = vadd.f32 %v6775_v20, %v3030_v22 }
 0x50c   :  { %3069 = vmatmul.bf16.gmra.mxu0 %v2900_v55  ;;  %v3090_v62 = vadd.f32 %v3089_v52, %v3031_v43 }
 0x510   :  { %v3106_v0 = vpop.f32.mrf.mxu1 }
 0x511   :  { %v3032_v29 = vpop.f32.mrf.mxu0 }
 0x512   :  { %v3033_v12 = vadd.f32 %v6775_v20, %v3032_v29 }
 0x514   :  { %v3092_v38 = vadd.f32 %v3091_v61, %v3033_v12 }
 0x516   :  { %v3135_v11 = vmax.f32 %v3090_v62, %v3092_v38 }
 0x518   :  { %v6795_v59 = vmax.f32 %v3134_v17, %v3135_v11  ;;  %v3109_v18 = vpop.f32.mrf.mxu1 }
 0x519   :  { %v3035_v58 = vpop.f32.mrf.mxu0 }
 0x51a   :  { %v3036_v35 = vadd.f32 %v6775_v20, %v3035_v58 }
 0x51c   :  { %v3095_v49 = vadd.f32 %v3094_v63, %v3036_v35 }
 0x520   :  { %v3111_v39 = vpop.f32.mrf.mxu1 }
 0x521   :  { %v3037_v60 = vpop.f32.mrf.mxu0 }
 0x522   :  { %v3038_v3 = vadd.f32 %v6775_v20, %v3037_v60 }
 0x524   :  { %v3097_v21 = vadd.f32 %v3096_v30, %v3038_v3 }
 0x526   :  { %v3137_v10 = vmax.f32 %v3095_v49, %v3097_v21 }
 0x528   :  { %v3114_v1 = vpop.f32.mrf.mxu1 }
 0x529   :  { %v3040_v45 = vpop.f32.mrf.mxu0 }
 0x52a   :  { %v3041_v52 = vadd.f32 %v6775_v20, %v3040_v45 }
 0x52c   :  { %v3100_v33 = vadd.f32 %v3099_v57, %v3041_v52 }
 0x530   :  { %v3116_v42 = vpop.f32.mrf.mxu1 }
 0x531   :  { %v3042_v53 = vpop.f32.mrf.mxu0 }
 0x532   :  { %v3043_v9 = vadd.f32 %v6775_v20, %v3042_v53 }
 0x534   :  { %v3102_v14 = vadd.f32 %v3101_v54, %v3043_v9  ;;  %v3771_v54 = vld [vmem:[%s6872_s5 + $0x10] sm:$0xff] }
 0x535   :  { %3270 = vmatpush.bf16.msra.mxu2 %v3771_v54 }
 0x536   :  { %v3138_v61 = vmax.f32 %v3100_v33, %v3102_v14 }
 0x538   :  { %v3139_v15 = vmax.f32 %v3137_v10, %v3138_v61  ;;  %v3119_v31 = vpop.f32.mrf.mxu1 }
 0x539   :  { %v3045_v44 = vpop.f32.mrf.mxu0 }
 0x53a   :  { %3150 = vrot.lane.b32.xlu0 %v3139_v15, %s4433_s17  ;;  %v3046_v36 = vadd.f32 %v6775_v20, %v3045_v44 }
 0x53c   :  { %v3105_v5 = vadd.f32 %v3104_v32, %v3046_v36  ;;  %v3770_v32 = vld [vmem:[%s6872_s5 + $0x8] sm:$0xff] }
 0x53d   :  { %3271 = vmatpush.bf16.msra.mxu2 %v3770_v32 }
 0x540   :  { %v3121_v16 = vpop.f32.mrf.mxu1 }
 0x541   :  { %v3047_v24 = vpop.f32.mrf.mxu0 }
 0x542   :  { %v3048_v56 = vadd.f32 %v6775_v20, %v3047_v24 }
 0x544   :  { %v3107_v40 = vadd.f32 %v3106_v0, %v3048_v56 }
 0x546   :  { %v3140_v51 = vmax.f32 %v3105_v5, %v3107_v40 }
 0x548   :  { %v3124_v57 = vpop.f32.mrf.mxu1 }
 0x549   :  { %v3050_v19 = vpop.f32.mrf.mxu0 }
 0x54a   :  { %v3051_v63 = vadd.f32 %v6775_v20, %v3050_v19 }
 0x54c   :  { %v3110_v27 = vadd.f32 %v3109_v18, %v3051_v63 }
 0x550   :  { %v3126_v11 = vpop.f32.mrf.mxu1 }
 0x551   :  { %v3052_v34 = vpop.f32.mrf.mxu0 }
 0x552   :  { %v3053_v4 = vadd.f32 %v6775_v20, %v3052_v34 }
 0x554   :  { %v3112_v26 = vadd.f32 %v3111_v39, %v3053_v4 }
 0x556   :  { %v3141_v28 = vmax.f32 %v3110_v27, %v3112_v26 }
 0x558   :  { %v3142_v6 = vmax.f32 %v3140_v51, %v3141_v28  ;;  %v3129_v25 = vpop.f32.mrf.mxu1 }
 0x559   :  { %v3055_v48 = vpop.f32.mrf.mxu0 }
 0x55a   :  { %3154 = vrot.lane.b32.xlu1 %v3142_v6, %s4434_s20  ;;  %v3056_v50 = vadd.f32 %v6775_v20, %v3055_v48  ;;  %v3298_v6 = vld [vmem:[%s6874_s7 + $0x8] sm:$0xff]  ;;  %v3297_v48 = vld [vmem:[%s6874_s7] sm:$0xff] }
 0x55c   :  { %v3115_v22 = vadd.f32 %v3114_v1, %v3056_v50 }
 0x560   :  { %v3131_v21 = vpop.f32.mrf.mxu1 }
 0x561   :  { %v3057_v2 = vpop.f32.mrf.mxu0 }
 0x562   :  { %v3058_v17 = vadd.f32 %v6775_v20, %v3057_v2  ;;  %v3941_v2 = vld [vmem:[%s6873_s6] ss:$0 sm:$0xff] }
 0x564   :  { %v3117_v41 = vadd.f32 %v3116_v42, %v3058_v17  ;;  %v3299_v42 = vld [vmem:[%s6874_s7 + $0x10] sm:$0xff] }
 0x566   :  { %v3143_v29 = vmax.f32 %v3115_v22, %v3117_v41 }
 0x569   :  { %v3060_v7 = vpop.f32.mrf.mxu0 }
 0x56a   :  { %v3061_v23 = vadd.f32 %v6775_v20, %v3060_v7 }
 0x56c   :  { %v3120_v55 = vadd.f32 %v3119_v31, %v3061_v23  ;;  %v14_v31 = vstv %s6875_s8 }
 0x56d   :  { %15 = vst [vmem:[#allocation2] sm:$0x1] %v14_v31 }
 0x571   :  { %v3062_v30 = vpop.f32.mrf.mxu0 }
 0x572   :  { %v3063_v46 = vadd.f32 %v6775_v20, %v3062_v30 }
 0x574   :  { %v3122_v43 = vadd.f32 %v3121_v16, %v3063_v46  ;;  %v3942_v46 = vld [vmem:[#allocation2] ss:$0 sm:$0xff] }
 0x576   :  { %v3144_v12 = vmax.f32 %v3120_v55, %v3122_v43 }
 0x578   :  { %v3145_v62 = vmax.f32 %v3143_v29, %v3144_v12 }
 0x579   :  { %v3065_v38 = vpop.f32.mrf.mxu0 }
 0x57a   :  { %3158 = vrot.lane.b32.xlu2 %v3145_v62, %s4435_s21  ;;  %v3066_v3 = vadd.f32 %v6775_v20, %v3065_v38 }
 0x57c   :  { %v3125_v9 = vadd.f32 %v3124_v57, %v3066_v3 }
 0x581   :  { %v3067_v58 = vpop.f32.mrf.mxu0 }
 0x582   :  { %v3068_v45 = vadd.f32 %v6775_v20, %v3067_v58 }
 0x584   :  { %v3127_v52 = vadd.f32 %v3126_v11, %v3068_v45 }
 0x586   :  { %v3146_v14 = vmax.f32 %v3125_v9, %v3127_v52 }
 0x589   :  { %v3070_v60 = vpop.f32.mrf.mxu0 }
 0x58a   :  { %v3071_v0 = vadd.f32 %v6775_v20, %v3070_v60 }
 0x58c   :  { %v3130_v49 = vadd.f32 %v3129_v25, %v3071_v0 }
 0x591   :  { %v3072_v35 = vpop.f32.mrf.mxu0 }
 0x592   :  { %v3073_v53 = vadd.f32 %v6775_v20, %v3072_v35  ;;  %v3769_v20 = vld [vmem:[%s6872_s5] sm:$0xff] }
 0x593   :  { %3272 = vmatpush.bf16.msra.mxu2 %v3769_v20 }
 0x594   :  { %v3132_v33 = vadd.f32 %v3131_v21, %v3073_v53 }
 0x596   :  { %v3147_v10 = vmax.f32 %v3130_v49, %v3132_v33 }
 0x598   :  { %v3148_v61 = vmax.f32 %v3146_v14, %v3147_v10 }
 0x59a   :  { %v3167_v47 = vmin.f32 %v3148_v61, 0.0  ;;  %vm3165_vm5 = vcmp.gt.f32.partialorder %v3148_v61, 0.0 }
 0x59c   :  { %v3170_v15 = vmul.f32 1.442695, %v3167_v47 }
 0x59e   :  { %4423 = vpow2.f32 %v3170_v15 }
 0x5a4   :  { %v4424_v18 = vpop.eup %4423 }
 0x5a5   :  { %v3673_v44 = vadd.f32 -1.0, %v4424_v18 }
 0x5a7   :  { %v3175_v24 = vsel %vm3165_vm5, %v3148_v61, %v3673_v44 }
 0x5a8   :  { %v3177_v39 = vpack.c.bf16 %v3175_v24, %v3175_v24 }
 0x5aa   :  { %3714 = vmatmul.msk.bf16.vlgmr.msra.gmra.mxu3 %vm2819_vm2, %v3177_v39 }
 0x5ac   :  { %v3151_v19 = vpop.permute.xlu0 %3150 }
 0x5ad   :  { %v3161_v1 = vsel %vm2819_vm2, %v6795_v59, %v3151_v19  ;;  %v3300_v59 = vld [vmem:[%s6874_s7 + $0x18] sm:$0xff] }
 0x5ae   :  { %3320 = vmatpush.msrb.mxu2 %v3300_v59 }
 0x5b0   :  { %3321 = vmatpush.msrb.mxu2 %v3299_v42 }
 0x5b2   :  { %3322 = vmatpush.msrb.mxu2 %v3298_v6 }
 0x5b4   :  { %3323 = vmatpush.msrb.mxu2 %v3297_v48 }
 0x5cc   :  { %v3155_v37 = vpop.permute.xlu1 %3154 }
 0x5cd   :  { %v3162_v56 = vsel %vm2840_vm3, %v3161_v1, %v3155_v37 }
 0x5d4   :  { %v3159_v36 = vpop.permute.xlu2 %3158 }
 0x5d5   :  { %v3163_v63 = vsel %vm2861_vm4, %v3162_v56, %v3159_v36 }
 0x5d6   :  { %v3166_v34 = vmin.f32 %v3163_v63, 0.0  ;;  %vm3164_vm6 = vcmp.gt.f32.partialorder %v3163_v63, 0.0 }
 0x5d8   :  { %v3168_v40 = vmul.f32 1.442695, %v3166_v34 }
 0x5da   :  { %4425 = vpow2.f32 %v3168_v40 }
 0x5e0   :  { %v4426_v4 = vpop.eup %4425 }
 0x5e1   :  { %v3672_v5 = vadd.f32 -1.0, %v4426_v4 }
 0x5e3   :  { %v3174_v27 = vsel %vm3164_vm6, %v3163_v63, %v3672_v5 }
 0x5e4   :  { %v3176_v26 = vpack.c.bf16 %v3174_v27, %v3174_v27 }
 0x5e6   :  { %3273 = vmatmul.bf16.vlgmr.msra.gmra.mxu2 %v3176_v26 }
 0x62d   :  { %v3287_v51 = vpop.f32.mrf.mxu3 }
 0x635   :  { %v3289_v28 = vpop.f32.mrf.mxu3 }
 0x669   :  { %v3274_v13 = vpop.f32.mrf.mxu2 }
 0x66a   :  { %v3275_v8 = vadd.f32 %v3941_v2, %v3274_v13 }
 0x66c   :  { %v3288_v7 = vadd.f32 %v3287_v51, %v3275_v8 }
 0x66e   :  { %v3292_v16 = vmin.f32 %v3288_v7, 0.0  ;;  %vm3291_vm7 = vcmp.gt.f32.partialorder %v3288_v7, 0.0 }
 0x670   :  { %v3293_v17 = vmul.f32 1.442695, %v3292_v16 }
 0x671   :  { %v3276_v50 = vpop.f32.mrf.mxu2 }
 0x672   :  { %4427 = vpow2.f32 %v3293_v17 }
 0x678   :  { %v4428_v23 = vpop.eup %4427 }
 0x679   :  { %v3715_v30 = vadd.f32 -1.0, %v4428_v23 }
 0x67b   :  { %v3296_v41 = vsel %vm3291_vm7, %v3288_v7, %v3715_v30 }
 0x67c   :  { %3716 = vmatmul.msk.f32.vlgmr.msrb.gmra.mxu2 %vm2819_vm2, %v3296_v41 }
 0x6ff   :  { %v3325_v22 = vpop.f32.mrf.mxu2 }
 0x700   :  { %v3326_v55 = vadd.f32 %v3942_v46, %v3325_v22 }
 0x702   :  { %3329 = vst.msk [vmem:[%s6876_s9] sm:$0xff] %vm3328_vm8, %v3326_v55 }

</bundles_post_ra>
